<compile_context>
chip_gen: v7x
topology: tpu7x:2x2x1
jax: 0.10.0
libtpu: 0.0.40
codegen_flags: <defaults>
</compile_context>

<pallas_src>
import functools
import math

import jax
import jax.numpy as jnp
from jax.experimental import pallas as pl
from jax.experimental.pallas import tpu as pltpu


def _pick_tile(n, pref, quantum=128):
    """Largest multiple of `quantum` <= pref that divides n, else n (full)."""
    if n <= pref:
        return n
    best = n
    t = quantum
    while t <= pref:
        if n % t == 0:
            best = t
        t += quantum
    return best


# ----------------------------------------------------------------------------
# Pallas kernel 1: 3x3 conv (pad=1, stride=1) without im2col.
# Per grid step (one image, one Cout tile): 9 bf16 MXU matmuls, each tap's
# result shifted/masked into a (HW, Cout_tile) f32 VMEM accumulator.
# ----------------------------------------------------------------------------
def _conv3x3_kernel(x_ref, w_ref, b_ref, o_ref, acc_ref, *, H, W, relu_in):
    HW = H * W
    x = x_ref[0]                                    # (HW, Cin) bf16
    if relu_in:
        x = jnp.maximum(x, 0)                       # fused F.relu on the input
    acc_ref[...] = jnp.zeros_like(acc_ref)

    for ky in range(3):
        for kx in range(3):
            dy, dx = ky - 1, kx - 1
            ytap = jnp.dot(x, w_ref[ky * 3 + kx],
                           preferred_element_type=jnp.float32)   # (HW, TN) f32
            s = dy * W + dx                         # flat-index shift of this tap
            # output rows p in [p0, p1) read ytap rows q = p + s
            p0 = W if dy < 0 else 0
            p1 = HW - (W if dy > 0 else 0)
            q0, q1 = p0 + s, p1 + s
            if q0 < 0:                              # trimmed rows are col-masked
                p0 -= q0
                q0 = 0
            if q1 > HW:
                p1 -= (q1 - HW)
                q1 = HW
            if p1 <= p0:
                continue
            L = p1 - p0
            upd = ytap[q0:q1, :]
            if dx != 0:
                colp = (jax.lax.broadcasted_iota(jnp.int32, (L, 1), 0) + p0) % W
                valid = jnp.logical_and(colp + dx >= 0, colp + dx < W)
                upd = jnp.where(valid, upd, 0.0)
            acc_ref[p0:p1, :] = acc_ref[p0:p1, :] + upd

    o_ref[0] = acc_ref[...] + b_ref[...]            # bias broadcast over rows


def conv3x3(x, w, b, relu_in=False, cout_tile=256):
    """x: (B, H, W, Cin) NHWC.  w: (Cout, Cin, 3, 3) torch layout.  b: (Cout,)."""
    B, H, W, Cin = x.shape
    Cout = w.shape[0]
    HW = H * W

    # (ky, kx, Cin, Cout) tap-major weight matrix; pad Cout to a lane-dense
    # multiple of 128 (pred2 has Cout=2) so output stores are unmasked.
    wq = jnp.transpose(w, (2, 3, 1, 0)).reshape(9, Cin, Cout)
    bq = b.reshape(1, Cout).astype(jnp.float32)
    cp = Cout if Cout % 128 == 0 else ((Cout + 127) // 128) * 128
    if cp != Cout:
        wq = jnp.pad(wq, ((0, 0), (0, 0), (0, cp - Cout)))
        bq = jnp.pad(bq, ((0, 0), (0, cp - Cout)))

    tn = cp if (cp <= cout_tile or cp % cout_tile != 0) else cout_tile
    grid = (B, cp // tn)
    flops = 2 * B * HW * 9 * Cin * cp
    bytes_acc = B * HW * Cin * 2 + 9 * Cin * cp * 2 + B * HW * cp * 4 + cp * 4

    out = pl.pallas_call(
        functools.partial(_conv3x3_kernel, H=H, W=W, relu_in=relu_in),
        out_shape=jax.ShapeDtypeStruct((B, HW, cp), jnp.float32),
        grid_spec=pltpu.PrefetchScalarGridSpec(
            num_scalar_prefetch=0,
            grid=grid,
            in_specs=[
                pl.BlockSpec((1, HW, Cin), lambda bb, j: (bb, 0, 0)),
                pl.BlockSpec((9, Cin, tn), lambda bb, j: (0, 0, j)),
                pl.BlockSpec((1, tn), lambda bb, j: (0, j)),
            ],
            out_specs=pl.BlockSpec((1, HW, tn), lambda bb, j: (bb, 0, j)),
            scratch_shapes=[pltpu.VMEM((HW, tn), jnp.float32)],
        ),
        compiler_params=pltpu.CompilerParams(
            dimension_semantics=("parallel", "parallel"),
            vmem_limit_bytes=48 * 1024 * 1024,
        ),
        cost_estimate=pl.CostEstimate(flops=flops, transcendentals=0,
                                      bytes_accessed=bytes_acc),
    )(x.reshape(B, HW, Cin).astype(jnp.bfloat16),
      wq.astype(jnp.bfloat16), bq)

    out = out.reshape(B, H, W, cp)
    if cp != Cout:
        out = out[..., :Cout]
    return out


# ----------------------------------------------------------------------------
# Pallas kernel 2: Memory read (space-time memory), flash-attention style.
#   per query position: softmax over the T*H*W memory axis of (q·k)/sqrt(D_e),
#   then weighted sum of memory values.  Output layout (N, HW, D_o) = NHWC.
# ----------------------------------------------------------------------------
def _memory_kernel(qi_ref, mi_ref, mo_ref, o_ref, m_s, l_s, acc_s, *, scale):
    k = pl.program_id(2)

    @pl.when(k == 0)
    def _():
        m_s[...] = jnp.full(m_s.shape, -jnp.inf, jnp.float32)
        l_s[...] = jnp.zeros_like(l_s)
        acc_s[...] = jnp.zeros_like(acc_s)

    qi = qi_ref[0]                                   # (Tq, D_e) bf16
    mi = mi_ref[0]                                   # (D_e, Tk) bf16
    s = jnp.dot(qi, mi, preferred_element_type=jnp.float32) * scale   # (Tq, Tk)

    m_prev = m_s[...]
    m_new = jnp.maximum(m_prev, jnp.max(s, axis=1, keepdims=True))
    alpha = jnp.exp(m_prev - m_new)                  # (Tq, 1)
    p = jnp.exp(s - m_new)                           # (Tq, Tk)
    l_s[...] = alpha * l_s[...] + jnp.sum(p, axis=1, keepdims=True)
    acc_s[...] = alpha * acc_s[...] + jnp.dot(
        p.astype(mo_ref.dtype), mo_ref[0], preferred_element_type=jnp.float32)
    m_s[...] = m_new

    @pl.when(k == pl.num_programs(2) - 1)
    def _():
        o_ref[0] = (acc_s[...] * pl.reciprocal(l_s[...], approx=True)
                    ).astype(o_ref.dtype)


def memory_read(m_in, m_out_t, q_in_t, *, q_tile=256, mem_tile=512):
    """m_in: (N, D_e, THW); m_out_t: (N, THW, D_o); q_in_t: (1, HW, D_e).
    Returns mem: (N, HW, D_o) f32 (channels-last)."""
    N, d_e, thw = m_in.shape
    d_o = m_out_t.shape[2]
    hw = q_in_t.shape[1]
    tq = _pick_tile(hw, q_tile)
    tk = _pick_tile(thw, mem_tile)
    grid = (N, hw // tq, thw // tk)

    flops = 2 * N * hw * thw * (d_e + d_o)
    bytes_acc = (m_in.size + m_out_t.size + q_in_t.size) * 2 + N * hw * d_o * 4

    return pl.pallas_call(
        functools.partial(_memory_kernel, scale=1.0 / math.sqrt(d_e)),
        out_shape=jax.ShapeDtypeStruct((N, hw, d_o), jnp.float32),
        grid_spec=pltpu.PrefetchScalarGridSpec(
            num_scalar_prefetch=0,
            grid=grid,
            in_specs=[
                pl.BlockSpec((1, tq, d_e), lambda n, j, k: (0, j, 0)),  # shared q
                pl.BlockSpec((1, d_e, tk), lambda n, j, k: (n, 0, k)),
                pl.BlockSpec((1, tk, d_o), lambda n, j, k: (n, k, 0)),
            ],
            out_specs=pl.BlockSpec((1, tq, d_o), lambda n, j, k: (n, j, 0)),
            scratch_shapes=[
                pltpu.VMEM((tq, 1), jnp.float32),    # running max
                pltpu.VMEM((tq, 1), jnp.float32),    # running denom
                pltpu.VMEM((tq, d_o), jnp.float32),  # accumulator
            ],
        ),
        compiler_params=pltpu.CompilerParams(
            dimension_semantics=("parallel", "parallel", "arbitrary"),
            vmem_limit_bytes=48 * 1024 * 1024,
        ),
        cost_estimate=pl.CostEstimate(flops=flops, transcendentals=N * hw * thw,
                                      bytes_accessed=bytes_acc),
    )(q_in_t.astype(jnp.bfloat16), m_in.astype(jnp.bfloat16),
      m_out_t.astype(jnp.bfloat16))


# ----------------------------------------------------------------------------
# Pallas kernel 3: 2-way channel softmax (take fg prob) + Soft_aggregation.
#   ps = softmax([l0, l1], channel)[1]; em[0] = prod(1-ps); em[1:N+1] = ps;
#   clamp; logit = log(em/(1-em)).  Tiled over HW (lanes), f32 math.
# ----------------------------------------------------------------------------
def _soft_agg_kernel(l0_ref, l1_ref, o_ref, *, num_objects, K):
    l0 = l0_ref[...]                                 # (N, T)
    l1 = l1_ref[...]
    ps = 1.0 / (1.0 + jnp.exp(l0 - l1))              # softmax(·, dim=channel)[1]
    bg = jnp.ones_like(ps[0:1, :])
    for i in range(num_objects):                     # prod over objects
        bg = bg * (1.0 - ps[i:i + 1, :])
    eps = 1e-7

    def to_logit(e):
        e = jnp.clip(e, eps, 1.0 - eps)
        return jnp.log(e / (1.0 - e))

    o_ref[0:1, :] = to_logit(bg)
    o_ref[1:num_objects + 1, :] = to_logit(ps)
    if K > num_objects + 1:
        fill = math.log(eps / (1.0 - eps))
        o_ref[num_objects + 1:, :] = jnp.full(
            (K - num_objects - 1, l0.shape[1]), fill, jnp.float32)


def soft_aggregation(l0, l1, *, num_objects, K, hw_tile=2048):
    N, hw = l0.shape
    t = _pick_tile(hw, hw_tile)
    return pl.pallas_call(
        functools.partial(_soft_agg_kernel, num_objects=num_objects, K=K),
        out_shape=jax.ShapeDtypeStruct((K, hw), jnp.float32),
        grid=(hw // t,),
        in_specs=[pl.BlockSpec((N, t), lambda j: (0, j)),
                  pl.BlockSpec((N, t), lambda j: (0, j))],
        out_specs=pl.BlockSpec((K, t), lambda j: (0, j)),
        compiler_params=pltpu.CompilerParams(dimension_semantics=("parallel",)),
    )(l0.astype(jnp.float32), l1.astype(jnp.float32))


# ----------------------------------------------------------------------------
# Decoder / Refine / ResBlock built from the Pallas conv kernel (glue: residual
# adds and bilinear upsampling).  Skip features stay un-broadcast (B=1).
# ----------------------------------------------------------------------------
def resblock(p, x):
    r = conv3x3(x, p['conv1_w'], p['conv1_b'], relu_in=True)
    r = conv3x3(r, p['conv2_w'], p['conv2_b'], relu_in=True)
    return x + r


def refine(p, f, pm, scale=2):
    # f is the shared (B=1) skip feature: convFS/ResFS computed once, results
    # are identical across objects so broadcasting happens only at the add.
    s = conv3x3(f, p['convFS_w'], p['convFS_b'])
    s = resblock(p['ResFS'], s)
    B, H, W, C = pm.shape
    up = jax.image.resize(pm, (B, H * scale, W * scale, C), method='bilinear')
    m = s + up                                       # (1,...) + (N,...) broadcast
    return resblock(p['ResMM'], m)


def decoder(p, m4_in, r3, r2):
    m4 = conv3x3(m4_in, p['convFM_w'], p['convFM_b'])
    m4 = resblock(p['ResMM'], m4)
    m3 = refine(p['RF3'], r3, m4)
    m2 = refine(p['RF2'], r2, m3)
    p2 = conv3x3(m2, p['pred2_w'], p['pred2_b'], relu_in=True)
    B, H, W, C = p2.shape
    return jax.image.resize(p2, (B, 4 * H, 4 * W, C), method='bilinear')  # NHWC


# ----------------------------------------------------------------------------
# STM core paths (memorize / segment), minus the pretrained ResNet encoders.
# ----------------------------------------------------------------------------
def pad_memory(mem, num_objects, K):
    # mem: (num_objects, C, H, W) -> (1, K, C, 1, H, W)
    N, C, H, W = mem.shape
    pad = jnp.zeros((1, K, C, 1, H, W), jnp.float32)
    return pad.at[0, 1:num_objects + 1, :, 0].set(mem)


def memorize_core(params, r4_mem, num_objects, K):
    """r4_mem stands in for Encoder_M output: (num_objects, 1024, Hr, Wr) NCHW."""
    x = jnp.transpose(r4_mem, (0, 2, 3, 1))          # NHWC
    k4 = jnp.transpose(conv3x3(x, *params['KV_M_key']), (0, 3, 1, 2))
    v4 = jnp.transpose(conv3x3(x, *params['KV_M_val']), (0, 3, 1, 2))
    return pad_memory(k4, num_objects, K), pad_memory(v4, num_objects, K)


def segment_core(params, keys, values, r4, r3, r2, num_objects, K):
    """keys:(1,K,keydim,T,Hr,Wr) values:(1,K,valdim,T,Hr,Wr), r4/r3/r2 NCHW (B=1)."""
    N = num_objects
    _, _, keydim, T, Hr, Wr = keys.shape
    valdim = values.shape[2]
    HW = Hr * Wr

    # KV of the query frame's r4 features (B=1, shared across objects).
    r4_nhwc = jnp.transpose(r4, (0, 2, 3, 1))
    k4 = conv3x3(r4_nhwc, *params['KV_Q_key'])       # (1, Hr, Wr, keydim)
    v4 = conv3x3(r4_nhwc, *params['KV_Q_val'])       # (1, Hr, Wr, valdim)

    q_in = k4.reshape(1, HW, keydim)                 # un-broadcast (shared)
    m_in = keys[0, 1:N + 1].reshape(N, keydim, T * HW)
    m_out = jnp.transpose(values[0, 1:N + 1].reshape(N, valdim, T * HW),
                          (0, 2, 1))                 # (N, THW, valdim)

    mem = memory_read(m_in, m_out, q_in)             # (N, HW, valdim) f32
    v4e = jnp.broadcast_to(v4.reshape(1, HW, valdim), (N, HW, valdim))
    m4_in = jnp.concatenate([mem, v4e], axis=-1).reshape(N, Hr, Wr, 2 * valdim)

    r3_nhwc = jnp.transpose(r3, (0, 2, 3, 1))        # B=1, un-broadcast
    r2_nhwc = jnp.transpose(r2, (0, 2, 3, 1))

    p_up = decoder(params['Decoder'], m4_in, r3_nhwc, r2_nhwc)  # (N, Hf, Wf, 2)
    Hf, Wf = p_up.shape[1], p_up.shape[2]
    l0 = p_up[..., 0].reshape(N, Hf * Wf)
    l1 = p_up[..., 1].reshape(N, Hf * Wf)

    logit = soft_aggregation(l0, l1, num_objects=N, K=K)        # (K, Hf*Wf)
    return logit.reshape(1, K, Hf, Wf)


# ----------------------------------------------------------------------------
# Deterministic parameter initialization (shapes from the module __init__).
# ----------------------------------------------------------------------------
def init_conv(key, cin, cout):
    kw, kb = jax.random.split(key)
    w = jax.random.normal(kw, (cout, cin, 3, 3), jnp.float32) / math.sqrt(9 * cin)
    b = jax.random.normal(kb, (cout,), jnp.float32) * 0.01
    return w, b


def init_resblock(key, dim):
    k1, k2 = jax.random.split(key)
    w1, b1 = init_conv(k1, dim, dim)
    w2, b2 = init_conv(k2, dim, dim)
    return {'conv1_w': w1, 'conv1_b': b1, 'conv2_w': w2, 'conv2_b': b2}


def init_refine(key, inplanes, planes):
    k1, k2, k3 = jax.random.split(key, 3)
    wfs, bfs = init_conv(k1, inplanes, planes)
    return {'convFS_w': wfs, 'convFS_b': bfs,
            'ResFS': init_resblock(k2, planes),
            'ResMM': init_resblock(k3, planes)}


def init_params(key, mdim=256, keydim=128, valdim=512):
    ks = jax.random.split(key, 9)
    params = {
        'KV_M_key': init_conv(ks[0], 1024, keydim),
        'KV_M_val': init_conv(ks[1], 1024, valdim),
        'KV_Q_key': init_conv(ks[2], 1024, keydim),
        'KV_Q_val': init_conv(ks[3], 1024, valdim),
    }
    dec = {}
    dec['convFM_w'], dec['convFM_b'] = init_conv(ks[4], 1024, mdim)
    dec['ResMM'] = init_resblock(ks[5], mdim)
    dec['RF3'] = init_refine(ks[6], 512, mdim)
    dec['RF2'] = init_refine(ks[7], 256, mdim)
    dec['pred2_w'], dec['pred2_b'] = init_conv(ks[8], mdim, 2)
    params['Decoder'] = dec
    return params


if __name__ == "__main__":
    key = jax.random.PRNGKey(0)
    kp, k_m1, k_m2, k_r4, k_r3, k_r2 = jax.random.split(key, 6)

    params = init_params(kp)

    num_objects, K = 2, 4
    Hr = Wr = 8          # r4 resolution of a 128x128 frame (stride 16)

    # --- memorize path core (KeyValue + Pad_memory); T = 2 memory frames ---
    ks_list, vs_list = [], []
    for kk in (k_m1, k_m2):
        r4_mem = jax.random.normal(kk, (num_objects, 1024, Hr, Wr), jnp.float32)
        k4m, v4m = memorize_core(params, r4_mem, num_objects, K)
        ks_list.append(k4m)
        vs_list.append(v4m)
    keys_mem = jnp.concatenate(ks_list, axis=3)      # (1, K, keydim, T, Hr, Wr)
    values_mem = jnp.concatenate(vs_list, axis=3)    # (1, K, valdim, T, Hr, Wr)

    # --- segment path core (KeyValue + Memory + Decoder + Soft_aggregation) ---
    r4 = jax.random.normal(k_r4, (1, 1024, Hr, Wr), jnp.float32)
    r3 = jax.random.normal(k_r3, (1, 512, 2 * Hr, 2 * Wr), jnp.float32)
    r2 = jax.random.normal(k_r2, (1, 256, 4 * Hr, 4 * Wr), jnp.float32)

    logit = segment_core(params, keys_mem, values_mem, r4, r3, r2,
                         num_objects, K)
    jax.block_until_ready(logit)

    assert logit.shape == (1, K, 16 * Hr, 16 * Wr)
    assert bool(jnp.isfinite(logit).all())
    print("KERNEL_OK")
</pallas_src>

<mosaic_0001>
module attributes {stable_mosaic.version = 11 : i64} {
  func.func @_conv3x3_kernel(%arg0: i32, %arg1: i32, %arg2: memref<1x64x1024xbf16, #tpu.memory_space<vmem>>, %arg3: memref<9x1024x128xbf16, #tpu.memory_space<vmem>>, %arg4: memref<1x128xf32, #tpu.memory_space<vmem>>, %arg5: memref<1x64x128xf32, #tpu.memory_space<vmem>>, %arg6: memref<64x128xf32, #tpu.memory_space<vmem>>) attributes {dimension_semantics = [#tpu.dimension_semantics<parallel>, #tpu.dimension_semantics<parallel>], iteration_bounds = array<i64: 2, 1>, scalar_prefetch = 0 : i64, scratch_operands = 1 : i64, tpu.core_type = #tpu.core_type<tc>, window_params = [{transform_indices = @transform_0, window_bounds = array<i64: 1, 64, 1024>}, {transform_indices = @transform_1, window_bounds = array<i64: 9, 1024, 128>}, {transform_indices = @transform_2, window_bounds = array<i64: 1, 128>}, {transform_indices = @transform_3, window_bounds = array<i64: 1, 64, 128>}]} {
    %c0 = arith.constant 0 : index
    %c0_0 = arith.constant 0 : index
    %c0_1 = arith.constant 0 : index
    %0 = vector.load %arg2[%c0, %c0_0, %c0_1] : memref<1x64x1024xbf16, #tpu.memory_space<vmem>>, vector<1x64x1024xbf16>
    %1 = vector.shape_cast %0 : vector<1x64x1024xbf16> to vector<64x1024xbf16>
    %cst = arith.constant 0.000000e+00 : f32
    %2 = vector.broadcast %cst : f32 to vector<64x128xf32>
    %c0_2 = arith.constant 0 : index
    %c0_3 = arith.constant 0 : index
    %3 = vector.load %arg6[%c0_2, %c0_3] : memref<64x128xf32, #tpu.memory_space<vmem>>, vector<64x128xf32>
    tpu.vector_store %arg6[%c0_2, %c0_3], %2 {strides = array<i32>} : memref<64x128xf32, #tpu.memory_space<vmem>>, vector<64x128xf32>,
    %c0_4 = arith.constant 0 : index
    %c0_5 = arith.constant 0 : index
    %c0_6 = arith.constant 0 : index
    %4 = vector.load %arg3[%c0_4, %c0_5, %c0_6] : memref<9x1024x128xbf16, #tpu.memory_space<vmem>>, vector<1x1024x128xbf16>
    %5 = vector.shape_cast %4 : vector<1x1024x128xbf16> to vector<1024x128xbf16>
    %cst_7 = arith.constant dense<0.000000e+00> : vector<64x128xf32>
    %6 = tpu.matmul %1, %5, %cst_7 {dimension_numbers = #tpu.dot_dimension_numbers<[1], [0], [0], [1], [0, 0, 1, 1], [], []>} : vector<64x1024xbf16>, vector<1024x128xbf16>, vector<64x128xf32> -> vector<64x128xf32>
    %7 = vector.extract_strided_slice %6 {offsets = [0, 0], sizes = [55, 128], strides = [1, 1]} : vector<64x128xf32> to vector<55x128xf32>
    %8 = tpu.iota {dimensions = array<i32: 0>} : vector<55x1xi32>
    %c9_i32 = arith.constant 9 : i32
    %9 = vector.broadcast %c9_i32 : i32 to vector<55x1xi32>
    %10 = arith.addi %8, %9 : vector<55x1xi32>
    %c8_i32 = arith.constant 8 : i32
    %c0_i32 = arith.constant 0 : i32
    %11 = arith.cmpi eq, %c8_i32, %c0_i32 : i32
    %c1_i32 = arith.constant 1 : i32
    %12 = arith.select %11, %c1_i32, %c8_i32 : i32
    %13 = vector.broadcast %12 : i32 to vector<55x1xi32>
    %14 = arith.remsi %10, %13 : vector<55x1xi32>
    %c0_i32_8 = arith.constant 0 : i32
    %15 = vector.broadcast %c0_i32_8 : i32 to vector<55x1xi32>
    %16 = arith.cmpi ne, %14, %15 : vector<55x1xi32>
    %c0_i32_9 = arith.constant 0 : i32
    %17 = vector.broadcast %c0_i32_9 : i32 to vector<55x1xi32>
    %18 = arith.cmpi slt, %14, %17 : vector<55x1xi32>
    %c0_i32_10 = arith.constant 0 : i32
    %19 = arith.cmpi slt, %12, %c0_i32_10 : i32
    %20 = vector.broadcast %19 : i1 to vector<55x1xi1>
    %21 = vector.broadcast %20 : vector<55x1xi1> to vector<55x1xi1>
    %22 = arith.xori %18, %21 : vector<55x1xi1>
    %23 = arith.andi %22, %16 : vector<55x1xi1>
    %24 = vector.broadcast %12 : i32 to vector<55x1xi32>
    %25 = arith.addi %14, %24 : vector<55x1xi32>
    %26 = arith.select %23, %25, %14 : vector<55x1xi1>, vector<55x1xi32>
    %c-1_i32 = arith.constant -1 : i32
    %27 = vector.broadcast %c-1_i32 : i32 to vector<55x1xi32>
    %28 = arith.addi %26, %27 : vector<55x1xi32>
    %c0_i32_11 = arith.constant 0 : i32
    %29 = vector.broadcast %c0_i32_11 : i32 to vector<55x1xi32>
    %30 = arith.cmpi sge, %28, %29 : vector<55x1xi32>
    %c-1_i32_12 = arith.constant -1 : i32
    %31 = vector.broadcast %c-1_i32_12 : i32 to vector<55x1xi32>
    %32 = arith.addi %26, %31 : vector<55x1xi32>
    %c8_i32_13 = arith.constant 8 : i32
    %33 = vector.broadcast %c8_i32_13 : i32 to vector<55x1xi32>
    %34 = arith.cmpi slt, %32, %33 : vector<55x1xi32>
    %35 = arith.andi %30, %34 : vector<55x1xi1>
    %cst_14 = arith.constant 0.000000e+00 : f32
    %36 = vector.shape_cast %35 : vector<55x1xi1> to vector<55x1xi1>
    %37 = vector.broadcast %36 : vector<55x1xi1> to vector<55x128xi1>
    %38 = vector.broadcast %cst_14 : f32 to vector<55x128xf32>
    %39 = arith.select %37, %7, %38 : vector<55x128xi1>, vector<55x128xf32>
    %c9 = arith.constant 9 : index
    %c0_15 = arith.constant 0 : index
    %40 = vector.load %arg6[%c9, %c0_15] : memref<64x128xf32, #tpu.memory_space<vmem>>, vector<55x128xf32>
    %41 = arith.addf %40, %39 : vector<55x128xf32>
    %c9_16 = arith.constant 9 : index
    %c0_17 = arith.constant 0 : index
    %42 = vector.load %arg6[%c9_16, %c0_17] : memref<64x128xf32, #tpu.memory_space<vmem>>, vector<55x128xf32>
    tpu.vector_store %arg6[%c9_16, %c0_17], %41 {strides = array<i32>} : memref<64x128xf32, #tpu.memory_space<vmem>>, vector<55x128xf32>,
    %c1 = arith.constant 1 : index
    %c0_18 = arith.constant 0 : index
    %c0_19 = arith.constant 0 : index
    %43 = vector.load %arg3[%c1, %c0_18, %c0_19] : memref<9x1024x128xbf16, #tpu.memory_space<vmem>>, vector<1x1024x128xbf16>
    %44 = vector.shape_cast %43 : vector<1x1024x128xbf16> to vector<1024x128xbf16>
    %cst_20 = arith.constant dense<0.000000e+00> : vector<64x128xf32>
    %45 = tpu.matmul %1, %44, %cst_20 {dimension_numbers = #tpu.dot_dimension_numbers<[1], [0], [0], [1], [0, 0, 1, 1], [], []>} : vector<64x1024xbf16>, vector<1024x128xbf16>, vector<64x128xf32> -> vector<64x128xf32>
    %46 = vector.extract_strided_slice %45 {offsets = [0, 0], sizes = [56, 128], strides = [1, 1]} : vector<64x128xf32> to vector<56x128xf32>
    %c8 = arith.constant 8 : index
    %c0_21 = arith.constant 0 : index
    %47 = vector.load %arg6[%c8, %c0_21] : memref<64x128xf32, #tpu.memory_space<vmem>>, vector<56x128xf32>
    %48 = arith.addf %47, %46 : vector<56x128xf32>
    %c8_22 = arith.constant 8 : index
    %c0_23 = arith.constant 0 : index
    %49 = vector.load %arg6[%c8_22, %c0_23] : memref<64x128xf32, #tpu.memory_space<vmem>>, vector<56x128xf32>
    tpu.vector_store %arg6[%c8_22, %c0_23], %48 {strides = array<i32>} : memref<64x128xf32, #tpu.memory_space<vmem>>, vector<56x128xf32>,
    %c2 = arith.constant 2 : index
    %c0_24 = arith.constant 0 : index
    %c0_25 = arith.constant 0 : index
    %50 = vector.load %arg3[%c2, %c0_24, %c0_25] : memref<9x1024x128xbf16, #tpu.memory_space<vmem>>, vector<1x1024x128xbf16>
    %51 = vector.shape_cast %50 : vector<1x1024x128xbf16> to vector<1024x128xbf16>
    %cst_26 = arith.constant dense<0.000000e+00> : vector<64x128xf32>
    %52 = tpu.matmul %1, %51, %cst_26 {dimension_numbers = #tpu.dot_dimension_numbers<[1], [0], [0], [1], [0, 0, 1, 1], [], []>} : vector<64x1024xbf16>, vector<1024x128xbf16>, vector<64x128xf32> -> vector<64x128xf32>
    %53 = vector.extract_strided_slice %52 {offsets = [1, 0], sizes = [56, 128], strides = [1, 1]} : vector<64x128xf32> to vector<56x128xf32>
    %54 = tpu.iota {dimensions = array<i32: 0>} : vector<56x1xi32>
    %c8_i32_27 = arith.constant 8 : i32
    %55 = vector.broadcast %c8_i32_27 : i32 to vector<56x1xi32>
    %56 = arith.addi %54, %55 : vector<56x1xi32>
    %c8_i32_28 = arith.constant 8 : i32
    %c0_i32_29 = arith.constant 0 : i32
    %57 = arith.cmpi eq, %c8_i32_28, %c0_i32_29 : i32
    %c1_i32_30 = arith.constant 1 : i32
    %58 = arith.select %57, %c1_i32_30, %c8_i32_28 : i32
    %59 = vector.broadcast %58 : i32 to vector<56x1xi32>
    %60 = arith.remsi %56, %59 : vector<56x1xi32>
    %c0_i32_31 = arith.constant 0 : i32
    %61 = vector.broadcast %c0_i32_31 : i32 to vector<56x1xi32>
    %62 = arith.cmpi ne, %60, %61 : vector<56x1xi32>
    %c0_i32_32 = arith.constant 0 : i32
    %63 = vector.broadcast %c0_i32_32 : i32 to vector<56x1xi32>
    %64 = arith.cmpi slt, %60, %63 : vector<56x1xi32>
    %c0_i32_33 = arith.constant 0 : i32
    %65 = arith.cmpi slt, %58, %c0_i32_33 : i32
    %66 = vector.broadcast %65 : i1 to vector<56x1xi1>
    %67 = vector.broadcast %66 : vector<56x1xi1> to vector<56x1xi1>
    %68 = arith.xori %64, %67 : vector<56x1xi1>
    %69 = arith.andi %68, %62 : vector<56x1xi1>
    %70 = vector.broadcast %58 : i32 to vector<56x1xi32>
    %71 = arith.addi %60, %70 : vector<56x1xi32>
    %72 = arith.select %69, %71, %60 : vector<56x1xi1>, vector<56x1xi32>
    %c1_i32_34 = arith.constant 1 : i32
    %73 = vector.broadcast %c1_i32_34 : i32 to vector<56x1xi32>
    %74 = arith.addi %72, %73 : vector<56x1xi32>
    %c0_i32_35 = arith.constant 0 : i32
    %75 = vector.broadcast %c0_i32_35 : i32 to vector<56x1xi32>
    %76 = arith.cmpi sge, %74, %75 : vector<56x1xi32>
    %c1_i32_36 = arith.constant 1 : i32
    %77 = vector.broadcast %c1_i32_36 : i32 to vector<56x1xi32>
    %78 = arith.addi %72, %77 : vector<56x1xi32>
    %c8_i32_37 = arith.constant 8 : i32
    %79 = vector.broadcast %c8_i32_37 : i32 to vector<56x1xi32>
    %80 = arith.cmpi slt, %78, %79 : vector<56x1xi32>
    %81 = arith.andi %76, %80 : vector<56x1xi1>
    %cst_38 = arith.constant 0.000000e+00 : f32
    %82 = vector.shape_cast %81 : vector<56x1xi1> to vector<56x1xi1>
    %83 = vector.broadcast %82 : vector<56x1xi1> to vector<56x128xi1>
    %84 = vector.broadcast %cst_38 : f32 to vector<56x128xf32>
    %85 = arith.select %83, %53, %84 : vector<56x128xi1>, vector<56x128xf32>
    %c8_39 = arith.constant 8 : index
    %c0_40 = arith.constant 0 : index
    %86 = vector.load %arg6[%c8_39, %c0_40] : memref<64x128xf32, #tpu.memory_space<vmem>>, vector<56x128xf32>
    %87 = arith.addf %86, %85 : vector<56x128xf32>
    %c8_41 = arith.constant 8 : index
    %c0_42 = arith.constant 0 : index
    %88 = vector.load %arg6[%c8_41, %c0_42] : memref<64x128xf32, #tpu.memory_space<vmem>>, vector<56x128xf32>
    tpu.vector_store %arg6[%c8_41, %c0_42], %87 {strides = array<i32>} : memref<64x128xf32, #tpu.memory_space<vmem>>, vector<56x128xf32>,
    %c3 = arith.constant 3 : index
    %c0_43 = arith.constant 0 : index
    %c0_44 = arith.constant 0 : index
    %89 = vector.load %arg3[%c3, %c0_43, %c0_44] : memref<9x1024x128xbf16, #tpu.memory_space<vmem>>, vector<1x1024x128xbf16>
    %90 = vector.shape_cast %89 : vector<1x1024x128xbf16> to vector<1024x128xbf16>
    %cst_45 = arith.constant dense<0.000000e+00> : vector<64x128xf32>
    %91 = tpu.matmul %1, %90, %cst_45 {dimension_numbers = #tpu.dot_dimension_numbers<[1], [0], [0], [1], [0, 0, 1, 1], [], []>} : vector<64x1024xbf16>, vector<1024x128xbf16>, vector<64x128xf32> -> vector<64x128xf32>
    %92 = vector.extract_strided_slice %91 {offsets = [0, 0], sizes = [63, 128], strides = [1, 1]} : vector<64x128xf32> to vector<63x128xf32>
    %93 = tpu.iota {dimensions = array<i32: 0>} : vector<63x1xi32>
    %c1_i32_46 = arith.constant 1 : i32
    %94 = vector.broadcast %c1_i32_46 : i32 to vector<63x1xi32>
    %95 = arith.addi %93, %94 : vector<63x1xi32>
    %c8_i32_47 = arith.constant 8 : i32
    %c0_i32_48 = arith.constant 0 : i32
    %96 = arith.cmpi eq, %c8_i32_47, %c0_i32_48 : i32
    %c1_i32_49 = arith.constant 1 : i32
    %97 = arith.select %96, %c1_i32_49, %c8_i32_47 : i32
    %98 = vector.broadcast %97 : i32 to vector<63x1xi32>
    %99 = arith.remsi %95, %98 : vector<63x1xi32>
    %c0_i32_50 = arith.constant 0 : i32
    %100 = vector.broadcast %c0_i32_50 : i32 to vector<63x1xi32>
    %101 = arith.cmpi ne, %99, %100 : vector<63x1xi32>
    %c0_i32_51 = arith.constant 0 : i32
    %102 = vector.broadcast %c0_i32_51 : i32 to vector<63x1xi32>
    %103 = arith.cmpi slt, %99, %102 : vector<63x1xi32>
    %c0_i32_52 = arith.constant 0 : i32
    %104 = arith.cmpi slt, %97, %c0_i32_52 : i32
    %105 = vector.broadcast %104 : i1 to vector<63x1xi1>
    %106 = vector.broadcast %105 : vector<63x1xi1> to vector<63x1xi1>
    %107 = arith.xori %103, %106 : vector<63x1xi1>
    %108 = arith.andi %107, %101 : vector<63x1xi1>
    %109 = vector.broadcast %97 : i32 to vector<63x1xi32>
    %110 = arith.addi %99, %109 : vector<63x1xi32>
    %111 = arith.select %108, %110, %99 : vector<63x1xi1>, vector<63x1xi32>
    %c-1_i32_53 = arith.constant -1 : i32
    %112 = vector.broadcast %c-1_i32_53 : i32 to vector<63x1xi32>
    %113 = arith.addi %111, %112 : vector<63x1xi32>
    %c0_i32_54 = arith.constant 0 : i32
    %114 = vector.broadcast %c0_i32_54 : i32 to vector<63x1xi32>
    %115 = arith.cmpi sge, %113, %114 : vector<63x1xi32>
    %c-1_i32_55 = arith.constant -1 : i32
    %116 = vector.broadcast %c-1_i32_55 : i32 to vector<63x1xi32>
    %117 = arith.addi %111, %116 : vector<63x1xi32>
    %c8_i32_56 = arith.constant 8 : i32
    %118 = vector.broadcast %c8_i32_56 : i32 to vector<63x1xi32>
    %119 = arith.cmpi slt, %117, %118 : vector<63x1xi32>
    %120 = arith.andi %115, %119 : vector<63x1xi1>
    %cst_57 = arith.constant 0.000000e+00 : f32
    %121 = vector.shape_cast %120 : vector<63x1xi1> to vector<63x1xi1>
    %122 = vector.broadcast %121 : vector<63x1xi1> to vector<63x128xi1>
    %123 = vector.broadcast %cst_57 : f32 to vector<63x128xf32>
    %124 = arith.select %122, %92, %123 : vector<63x128xi1>, vector<63x128xf32>
    %c1_58 = arith.constant 1 : index
    %c0_59 = arith.constant 0 : index
    %125 = vector.load %arg6[%c1_58, %c0_59] : memref<64x128xf32, #tpu.memory_space<vmem>>, vector<63x128xf32>
    %126 = arith.addf %125, %124 : vector<63x128xf32>
    %c1_60 = arith.constant 1 : index
    %c0_61 = arith.constant 0 : index
    %127 = vector.load %arg6[%c1_60, %c0_61] : memref<64x128xf32, #tpu.memory_space<vmem>>, vector<63x128xf32>
    tpu.vector_store %arg6[%c1_60, %c0_61], %126 {strides = array<i32>} : memref<64x128xf32, #tpu.memory_space<vmem>>, vector<63x128xf32>,
    %c4 = arith.constant 4 : index
    %c0_62 = arith.constant 0 : index
    %c0_63 = arith.constant 0 : index
    %128 = vector.load %arg3[%c4, %c0_62, %c0_63] : memref<9x1024x128xbf16, #tpu.memory_space<vmem>>, vector<1x1024x128xbf16>
    %129 = vector.shape_cast %128 : vector<1x1024x128xbf16> to vector<1024x128xbf16>
    %cst_64 = arith.constant dense<0.000000e+00> : vector<64x128xf32>
    %130 = tpu.matmul %1, %129, %cst_64 {dimension_numbers = #tpu.dot_dimension_numbers<[1], [0], [0], [1], [0, 0, 1, 1], [], []>} : vector<64x1024xbf16>, vector<1024x128xbf16>, vector<64x128xf32> -> vector<64x128xf32>
    %c0_65 = arith.constant 0 : index
    %c0_66 = arith.constant 0 : index
    %131 = vector.load %arg6[%c0_65, %c0_66] : memref<64x128xf32, #tpu.memory_space<vmem>>, vector<64x128xf32>
    %132 = arith.addf %131, %130 : vector<64x128xf32>
    %c0_67 = arith.constant 0 : index
    %c0_68 = arith.constant 0 : index
    %133 = vector.load %arg6[%c0_67, %c0_68] : memref<64x128xf32, #tpu.memory_space<vmem>>, vector<64x128xf32>
    tpu.vector_store %arg6[%c0_67, %c0_68], %132 {strides = array<i32>} : memref<64x128xf32, #tpu.memory_space<vmem>>, vector<64x128xf32>,
    %c5 = arith.constant 5 : index
    %c0_69 = arith.constant 0 : index
    %c0_70 = arith.constant 0 : index
    %134 = vector.load %arg3[%c5, %c0_69, %c0_70] : memref<9x1024x128xbf16, #tpu.memory_space<vmem>>, vector<1x1024x128xbf16>
    %135 = vector.shape_cast %134 : vector<1x1024x128xbf16> to vector<1024x128xbf16>
    %cst_71 = arith.constant dense<0.000000e+00> : vector<64x128xf32>
    %136 = tpu.matmul %1, %135, %cst_71 {dimension_numbers = #tpu.dot_dimension_numbers<[1], [0], [0], [1], [0, 0, 1, 1], [], []>} : vector<64x1024xbf16>, vector<1024x128xbf16>, vector<64x128xf32> -> vector<64x128xf32>
    %137 = vector.extract_strided_slice %136 {offsets = [1, 0], sizes = [63, 128], strides = [1, 1]} : vector<64x128xf32> to vector<63x128xf32>
    %138 = tpu.iota {dimensions = array<i32: 0>} : vector<63x1xi32>
    %c0_i32_72 = arith.constant 0 : i32
    %139 = vector.broadcast %c0_i32_72 : i32 to vector<63x1xi32>
    %140 = arith.addi %138, %139 : vector<63x1xi32>
    %c8_i32_73 = arith.constant 8 : i32
    %c0_i32_74 = arith.constant 0 : i32
    %141 = arith.cmpi eq, %c8_i32_73, %c0_i32_74 : i32
    %c1_i32_75 = arith.constant 1 : i32
    %142 = arith.select %141, %c1_i32_75, %c8_i32_73 : i32
    %143 = vector.broadcast %142 : i32 to vector<63x1xi32>
    %144 = arith.remsi %140, %143 : vector<63x1xi32>
    %c0_i32_76 = arith.constant 0 : i32
    %145 = vector.broadcast %c0_i32_76 : i32 to vector<63x1xi32>
    %146 = arith.cmpi ne, %144, %145 : vector<63x1xi32>
    %c0_i32_77 = arith.constant 0 : i32
    %147 = vector.broadcast %c0_i32_77 : i32 to vector<63x1xi32>
    %148 = arith.cmpi slt, %144, %147 : vector<63x1xi32>
    %c0_i32_78 = arith.constant 0 : i32
    %149 = arith.cmpi slt, %142, %c0_i32_78 : i32
    %150 = vector.broadcast %149 : i1 to vector<63x1xi1>
    %151 = vector.broadcast %150 : vector<63x1xi1> to vector<63x1xi1>
    %152 = arith.xori %148, %151 : vector<63x1xi1>
    %153 = arith.andi %152, %146 : vector<63x1xi1>
    %154 = vector.broadcast %142 : i32 to vector<63x1xi32>
    %155 = arith.addi %144, %154 : vector<63x1xi32>
    %156 = arith.select %153, %155, %144 : vector<63x1xi1>, vector<63x1xi32>
    %c1_i32_79 = arith.constant 1 : i32
    %157 = vector.broadcast %c1_i32_79 : i32 to vector<63x1xi32>
    %158 = arith.addi %156, %157 : vector<63x1xi32>
    %c0_i32_80 = arith.constant 0 : i32
    %159 = vector.broadcast %c0_i32_80 : i32 to vector<63x1xi32>
    %160 = arith.cmpi sge, %158, %159 : vector<63x1xi32>
    %c1_i32_81 = arith.constant 1 : i32
    %161 = vector.broadcast %c1_i32_81 : i32 to vector<63x1xi32>
    %162 = arith.addi %156, %161 : vector<63x1xi32>
    %c8_i32_82 = arith.constant 8 : i32
    %163 = vector.broadcast %c8_i32_82 : i32 to vector<63x1xi32>
    %164 = arith.cmpi slt, %162, %163 : vector<63x1xi32>
    %165 = arith.andi %160, %164 : vector<63x1xi1>
    %cst_83 = arith.constant 0.000000e+00 : f32
    %166 = vector.shape_cast %165 : vector<63x1xi1> to vector<63x1xi1>
    %167 = vector.broadcast %166 : vector<63x1xi1> to vector<63x128xi1>
    %168 = vector.broadcast %cst_83 : f32 to vector<63x128xf32>
    %169 = arith.select %167, %137, %168 : vector<63x128xi1>, vector<63x128xf32>
    %c0_84 = arith.constant 0 : index
    %c0_85 = arith.constant 0 : index
    %170 = vector.load %arg6[%c0_84, %c0_85] : memref<64x128xf32, #tpu.memory_space<vmem>>, vector<63x128xf32>
    %171 = arith.addf %170, %169 : vector<63x128xf32>
    %c0_86 = arith.constant 0 : index
    %c0_87 = arith.constant 0 : index
    %172 = vector.load %arg6[%c0_86, %c0_87] : memref<64x128xf32, #tpu.memory_space<vmem>>, vector<63x128xf32>
    tpu.vector_store %arg6[%c0_86, %c0_87], %171 {strides = array<i32>} : memref<64x128xf32, #tpu.memory_space<vmem>>, vector<63x128xf32>,
    %c6 = arith.constant 6 : index
    %c0_88 = arith.constant 0 : index
    %c0_89 = arith.constant 0 : index
    %173 = vector.load %arg3[%c6, %c0_88, %c0_89] : memref<9x1024x128xbf16, #tpu.memory_space<vmem>>, vector<1x1024x128xbf16>
    %174 = vector.shape_cast %173 : vector<1x1024x128xbf16> to vector<1024x128xbf16>
    %cst_90 = arith.constant dense<0.000000e+00> : vector<64x128xf32>
    %175 = tpu.matmul %1, %174, %cst_90 {dimension_numbers = #tpu.dot_dimension_numbers<[1], [0], [0], [1], [0, 0, 1, 1], [], []>} : vector<64x1024xbf16>, vector<1024x128xbf16>, vector<64x128xf32> -> vector<64x128xf32>
    %176 = vector.extract_strided_slice %175 {offsets = [7, 0], sizes = [56, 128], strides = [1, 1]} : vector<64x128xf32> to vector<56x128xf32>
    %177 = tpu.iota {dimensions = array<i32: 0>} : vector<56x1xi32>
    %c0_i32_91 = arith.constant 0 : i32
    %178 = vector.broadcast %c0_i32_91 : i32 to vector<56x1xi32>
    %179 = arith.addi %177, %178 : vector<56x1xi32>
    %c8_i32_92 = arith.constant 8 : i32
    %c0_i32_93 = arith.constant 0 : i32
    %180 = arith.cmpi eq, %c8_i32_92, %c0_i32_93 : i32
    %c1_i32_94 = arith.constant 1 : i32
    %181 = arith.select %180, %c1_i32_94, %c8_i32_92 : i32
    %182 = vector.broadcast %181 : i32 to vector<56x1xi32>
    %183 = arith.remsi %179, %182 : vector<56x1xi32>
    %c0_i32_95 = arith.constant 0 : i32
    %184 = vector.broadcast %c0_i32_95 : i32 to vector<56x1xi32>
    %185 = arith.cmpi ne, %183, %184 : vector<56x1xi32>
    %c0_i32_96 = arith.constant 0 : i32
    %186 = vector.broadcast %c0_i32_96 : i32 to vector<56x1xi32>
    %187 = arith.cmpi slt, %183, %186 : vector<56x1xi32>
    %c0_i32_97 = arith.constant 0 : i32
    %188 = arith.cmpi slt, %181, %c0_i32_97 : i32
    %189 = vector.broadcast %188 : i1 to vector<56x1xi1>
    %190 = vector.broadcast %189 : vector<56x1xi1> to vector<56x1xi1>
    %191 = arith.xori %187, %190 : vector<56x1xi1>
    %192 = arith.andi %191, %185 : vector<56x1xi1>
    %193 = vector.broadcast %181 : i32 to vector<56x1xi32>
    %194 = arith.addi %183, %193 : vector<56x1xi32>
    %195 = arith.select %192, %194, %183 : vector<56x1xi1>, vector<56x1xi32>
    %c-1_i32_98 = arith.constant -1 : i32
    %196 = vector.broadcast %c-1_i32_98 : i32 to vector<56x1xi32>
    %197 = arith.addi %195, %196 : vector<56x1xi32>
    %c0_i32_99 = arith.constant 0 : i32
    %198 = vector.broadcast %c0_i32_99 : i32 to vector<56x1xi32>
    %199 = arith.cmpi sge, %197, %198 : vector<56x1xi32>
    %c-1_i32_100 = arith.constant -1 : i32
    %200 = vector.broadcast %c-1_i32_100 : i32 to vector<56x1xi32>
    %201 = arith.addi %195, %200 : vector<56x1xi32>
    %c8_i32_101 = arith.constant 8 : i32
    %202 = vector.broadcast %c8_i32_101 : i32 to vector<56x1xi32>
    %203 = arith.cmpi slt, %201, %202 : vector<56x1xi32>
    %204 = arith.andi %199, %203 : vector<56x1xi1>
    %cst_102 = arith.constant 0.000000e+00 : f32
    %205 = vector.shape_cast %204 : vector<56x1xi1> to vector<56x1xi1>
    %206 = vector.broadcast %205 : vector<56x1xi1> to vector<56x128xi1>
    %207 = vector.broadcast %cst_102 : f32 to vector<56x128xf32>
    %208 = arith.select %206, %176, %207 : vector<56x128xi1>, vector<56x128xf32>
    %c0_103 = arith.constant 0 : index
    %c0_104 = arith.constant 0 : index
    %209 = vector.load %arg6[%c0_103, %c0_104] : memref<64x128xf32, #tpu.memory_space<vmem>>, vector<56x128xf32>
    %210 = arith.addf %209, %208 : vector<56x128xf32>
    %c0_105 = arith.constant 0 : index
    %c0_106 = arith.constant 0 : index
    %211 = vector.load %arg6[%c0_105, %c0_106] : memref<64x128xf32, #tpu.memory_space<vmem>>, vector<56x128xf32>
    tpu.vector_store %arg6[%c0_105, %c0_106], %210 {strides = array<i32>} : memref<64x128xf32, #tpu.memory_space<vmem>>, vector<56x128xf32>,
    %c7 = arith.constant 7 : index
    %c0_107 = arith.constant 0 : index
    %c0_108 = arith.constant 0 : index
    %212 = vector.load %arg3[%c7, %c0_107, %c0_108] : memref<9x1024x128xbf16, #tpu.memory_space<vmem>>, vector<1x1024x128xbf16>
    %213 = vector.shape_cast %212 : vector<1x1024x128xbf16> to vector<1024x128xbf16>
    %cst_109 = arith.constant dense<0.000000e+00> : vector<64x128xf32>
    %214 = tpu.matmul %1, %213, %cst_109 {dimension_numbers = #tpu.dot_dimension_numbers<[1], [0], [0], [1], [0, 0, 1, 1], [], []>} : vector<64x1024xbf16>, vector<1024x128xbf16>, vector<64x128xf32> -> vector<64x128xf32>
    %215 = vector.extract_strided_slice %214 {offsets = [8, 0], sizes = [56, 128], strides = [1, 1]} : vector<64x128xf32> to vector<56x128xf32>
    %c0_110 = arith.constant 0 : index
    %c0_111 = arith.constant 0 : index
    %216 = vector.load %arg6[%c0_110, %c0_111] : memref<64x128xf32, #tpu.memory_space<vmem>>, vector<56x128xf32>
    %217 = arith.addf %216, %215 : vector<56x128xf32>
    %c0_112 = arith.constant 0 : index
    %c0_113 = arith.constant 0 : index
    %218 = vector.load %arg6[%c0_112, %c0_113] : memref<64x128xf32, #tpu.memory_space<vmem>>, vector<56x128xf32>
    tpu.vector_store %arg6[%c0_112, %c0_113], %217 {strides = array<i32>} : memref<64x128xf32, #tpu.memory_space<vmem>>, vector<56x128xf32>,
    %c8_114 = arith.constant 8 : index
    %c0_115 = arith.constant 0 : index
    %c0_116 = arith.constant 0 : index
    %219 = vector.load %arg3[%c8_114, %c0_115, %c0_116] : memref<9x1024x128xbf16, #tpu.memory_space<vmem>>, vector<1x1024x128xbf16>
    %220 = vector.shape_cast %219 : vector<1x1024x128xbf16> to vector<1024x128xbf16>
    %cst_117 = arith.constant dense<0.000000e+00> : vector<64x128xf32>
    %221 = tpu.matmul %1, %220, %cst_117 {dimension_numbers = #tpu.dot_dimension_numbers<[1], [0], [0], [1], [0, 0, 1, 1], [], []>} : vector<64x1024xbf16>, vector<1024x128xbf16>, vector<64x128xf32> -> vector<64x128xf32>
    %222 = vector.extract_strided_slice %221 {offsets = [9, 0], sizes = [55, 128], strides = [1, 1]} : vector<64x128xf32> to vector<55x128xf32>
    %223 = tpu.iota {dimensions = array<i32: 0>} : vector<55x1xi32>
    %c0_i32_118 = arith.constant 0 : i32
    %224 = vector.broadcast %c0_i32_118 : i32 to vector<55x1xi32>
    %225 = arith.addi %223, %224 : vector<55x1xi32>
    %c8_i32_119 = arith.constant 8 : i32
    %c0_i32_120 = arith.constant 0 : i32
    %226 = arith.cmpi eq, %c8_i32_119, %c0_i32_120 : i32
    %c1_i32_121 = arith.constant 1 : i32
    %227 = arith.select %226, %c1_i32_121, %c8_i32_119 : i32
    %228 = vector.broadcast %227 : i32 to vector<55x1xi32>
    %229 = arith.remsi %225, %228 : vector<55x1xi32>
    %c0_i32_122 = arith.constant 0 : i32
    %230 = vector.broadcast %c0_i32_122 : i32 to vector<55x1xi32>
    %231 = arith.cmpi ne, %229, %230 : vector<55x1xi32>
    %c0_i32_123 = arith.constant 0 : i32
    %232 = vector.broadcast %c0_i32_123 : i32 to vector<55x1xi32>
    %233 = arith.cmpi slt, %229, %232 : vector<55x1xi32>
    %c0_i32_124 = arith.constant 0 : i32
    %234 = arith.cmpi slt, %227, %c0_i32_124 : i32
    %235 = vector.broadcast %234 : i1 to vector<55x1xi1>
    %236 = vector.broadcast %235 : vector<55x1xi1> to vector<55x1xi1>
    %237 = arith.xori %233, %236 : vector<55x1xi1>
    %238 = arith.andi %237, %231 : vector<55x1xi1>
    %239 = vector.broadcast %227 : i32 to vector<55x1xi32>
    %240 = arith.addi %229, %239 : vector<55x1xi32>
    %241 = arith.select %238, %240, %229 : vector<55x1xi1>, vector<55x1xi32>
    %c1_i32_125 = arith.constant 1 : i32
    %242 = vector.broadcast %c1_i32_125 : i32 to vector<55x1xi32>
    %243 = arith.addi %241, %242 : vector<55x1xi32>
    %c0_i32_126 = arith.constant 0 : i32
    %244 = vector.broadcast %c0_i32_126 : i32 to vector<55x1xi32>
    %245 = arith.cmpi sge, %243, %244 : vector<55x1xi32>
    %c1_i32_127 = arith.constant 1 : i32
    %246 = vector.broadcast %c1_i32_127 : i32 to vector<55x1xi32>
    %247 = arith.addi %241, %246 : vector<55x1xi32>
    %c8_i32_128 = arith.constant 8 : i32
    %248 = vector.broadcast %c8_i32_128 : i32 to vector<55x1xi32>
    %249 = arith.cmpi slt, %247, %248 : vector<55x1xi32>
    %250 = arith.andi %245, %249 : vector<55x1xi1>
    %cst_129 = arith.constant 0.000000e+00 : f32
    %251 = vector.shape_cast %250 : vector<55x1xi1> to vector<55x1xi1>
    %252 = vector.broadcast %251 : vector<55x1xi1> to vector<55x128xi1>
    %253 = vector.broadcast %cst_129 : f32 to vector<55x128xf32>
    %254 = arith.select %252, %222, %253 : vector<55x128xi1>, vector<55x128xf32>
    %c0_130 = arith.constant 0 : index
    %c0_131 = arith.constant 0 : index
    %255 = vector.load %arg6[%c0_130, %c0_131] : memref<64x128xf32, #tpu.memory_space<vmem>>, vector<55x128xf32>
    %256 = arith.addf %255, %254 : vector<55x128xf32>
    %c0_132 = arith.constant 0 : index
    %c0_133 = arith.constant 0 : index
    %257 = vector.load %arg6[%c0_132, %c0_133] : memref<64x128xf32, #tpu.memory_space<vmem>>, vector<55x128xf32>
    tpu.vector_store %arg6[%c0_132, %c0_133], %256 {strides = array<i32>} : memref<64x128xf32, #tpu.memory_space<vmem>>, vector<55x128xf32>,
    %c0_134 = arith.constant 0 : index
    %c0_135 = arith.constant 0 : index
    %258 = vector.load %arg6[%c0_134, %c0_135] : memref<64x128xf32, #tpu.memory_space<vmem>>, vector<64x128xf32>
    %c0_136 = arith.constant 0 : index
    %c0_137 = arith.constant 0 : index
    %259 = vector.load %arg4[%c0_136, %c0_137] : memref<1x128xf32, #tpu.memory_space<vmem>>, vector<1x128xf32>
    %260 = vector.broadcast %259 : vector<1x128xf32> to vector<64x128xf32>
    %261 = arith.addf %258, %260 : vector<64x128xf32>
    %c0_138 = arith.constant 0 : index
    %c0_139 = arith.constant 0 : index
    %c0_140 = arith.constant 0 : index
    %262 = vector.load %arg5[%c0_138, %c0_139, %c0_140] : memref<1x64x128xf32, #tpu.memory_space<vmem>>, vector<1x64x128xf32>
    %263 = vector.shape_cast %262 : vector<1x64x128xf32> to vector<64x128xf32>
    %264 = vector.shape_cast %261 : vector<64x128xf32> to vector<1x64x128xf32>
    tpu.vector_store %arg5[%c0_138, %c0_139, %c0_140], %264 {strides = array<i32>} : memref<1x64x128xf32, #tpu.memory_space<vmem>>, vector<1x64x128xf32>,
    return
  }
  func.func @transform_0(%arg0: i32, %arg1: i32) -> (i32, i32, i32) {
    %c0_i32 = arith.constant 0 : i32
    %c0_i32_0 = arith.constant 0 : i32
    %c0_i32_1 = arith.constant 0 : i32
    return %arg0, %c0_i32, %c0_i32_0 : i32, i32, i32
  }
  func.func @transform_1(%arg0: i32, %arg1: i32) -> (i32, i32, i32) {
    %c0_i32 = arith.constant 0 : i32
    %c0_i32_0 = arith.constant 0 : i32
    %c0_i32_1 = arith.constant 0 : i32
    return %c0_i32, %c0_i32_0, %arg1 : i32, i32, i32
  }
  func.func @transform_2(%arg0: i32, %arg1: i32) -> (i32, i32) {
    %c0_i32 = arith.constant 0 : i32
    %c0_i32_0 = arith.constant 0 : i32
    return %c0_i32, %arg1 : i32, i32
  }
  func.func @transform_3(%arg0: i32, %arg1: i32) -> (i32, i32, i32) {
    %c0_i32 = arith.constant 0 : i32
    %c0_i32_0 = arith.constant 0 : i32
    return %arg0, %c0_i32, %arg1 : i32, i32, i32
  }
}

</mosaic_0001>

<bundles_post_ra>
// kernel: tpu_custom_call.1
= control target key start
LH: loop header
LB: loop body
LE: loop exit
PB: predicated region body
PF: predicated region fallthrough
CT: control target
= control target key end

     0   :  { %8 = vsyncpa [#allocation4], 0  ;;  %s12669_s0 = inlined_call_operand.hbm [shape: bf16[2,64,1024], index: 0, kind: input, shape index: {}]   ;;  %s12670_s1 = inlined_call_operand.hbm [shape: bf16[9,1024,128], index: 1, kind: input, shape index: {}]   ;;  %s12671_s2 = inlined_call_operand.hbm [shape: f32[1,128], index: 2, kind: input, shape index: {}]   ;;  %s12672_s3 = inlined_call_operand.hbm [shape: f32[2,64,128], index: 3, kind: output, shape index: {}]  }
   0x1   :  { %10 = vsyncpa [#allocation4 + $0x1], 0 }
   0x2   :  { %11 = vsyncpa [#allocation7], 0 }
   0x3   :  { %12 = vsyncpa [#allocation5], 0 }
   0x4   :  { %14 = vsyncpa [#allocation5 + $0x1], 0  ;;  %s11434_s12 = smov 0   ;;  %s11436_s13 = smov 0  }
   0x5   :  { %s11438_s14 = smov 0   ;;  %s11440_s15 = smov 0  }
   0x6   :  { %s11442_s16 = smov 0   ;;  %s11444_s17 = smov 0  }
   0x7 LB: > { %s8493_s18 = sadd.s32 4294967295, %s11401_s17   ;;  %s8494_s19 = sadd.s32 4294967294, %s11401_s17   ;;  %s11401_s17 = sphi %s11444_s17, %s20_s17   ;;  %s11397_s16 = sphi %s11442_s16, %s12778_s16   ;;  %s11393_s15 = sphi %s11440_s15, %s12777_s15   ;;  %s11389_s14 = sphi %s11438_s14, %s12776_s14   ;;  %s11385_s13 = sphi %s11436_s13, %s12775_s13   ;;  %s11381_s12 = sphi %s11434_s12, %s12774_s12  }
   0x8   : > { %p52_p0 = scmp.ne.s32.totalorder %s11385_s13, %s11381_s12  ;;  %p11468_p1 = scmp.eq.s32.totalorder %s8493_s18, 0 }
   0x9   : > { %p11472_p2 = scmp.eq.s32.totalorder %s8493_s18, 1  ;;  %p136_p3 = scmp.eq.s32.totalorder %s8494_s19, 1 }
   0xa   : > { %s12705_s20 = scalar_select %p11468_p1, 1, 0 }
   0xb   : > { %p11478_p4 = por %p11468_p1, %p52_p0  ;;  %p8495_p5 = scmp.ge.s32.totalorder %s11401_s17, 1 }
   0xc   : > { %p11483_p6 = por %p136_p3, %p52_p0  ;;  %p143_p7 = scmp.lt.s32.totalorder %s11401_s17, 3 }
   0xd   : > { %s12707_s22 = scalar_select %p11478_p4, 1, 0 }
   0xe   : > { %s12708_s23 = scalar_select %p11483_p6, 1, 0 }
   0xf   : > { %p11488_p8 = pnand %p8495_p5, %p143_p7  ;;  %s11403_s25 = smov [#allocation6]  }
  0x10   : > { %s157_s26 = sshll.u32 %s11403_s25, 4  ;;  %s11404_s28 = smov [#allocation8]   ;;  %s11492_s26 = int_to_ptr.vmem [resolvable:$true] %s157_s26 }
  0x11   : > { %p10575_p9 = pneg %p11488_p8  ;;  %s173_s29 = sshll.u32 %s11404_s28, 4  ;;  %s11503_s29 = int_to_ptr.vmem [resolvable:$true] %s173_s29 }
  0x12   : > { %s11229_s5 = scalar_lea.hbm %s12670_s1, 73728 }
  0x13   : > { %p11499_p11 = pnand %p10575_p9, %p11468_p1  ;;  %p11230_p12 = scmp.ne.s32.totalorder %s12670_s1, %s11229_s5 }
  0x14   : > { %p11236_p5 = scmp.lt.u32.totalorder %s11229_s5, %s12670_s1 }
  0x15   : > { %p11231_p13 = pneg %p11499_p11 }
  0x17   : > { %p11232_p0 = pnand %p11231_p13, %p11230_p12 }
  0x19   : > { %p11233_p3 = pneg %p11232_p0 }
  0x1b   : > { %p11238_p7 = pnand %p11236_p5, %p11233_p3 }
  0x1d   : > { %11241 = shalt.err (!%p11238_p7)
}
  0x1e   : > { %s11242_s10 = scalar_lea.vmem %s11492_s26, 73728  ;;  %p11250_p1 = scmp.lt.s32.totalorder %s11492_s26, %s11492_s26 }
  0x1f   : > { %p11243_p9 = scmp.ne.s32.totalorder %s11492_s26, %s11242_s10  ;;  %p11251_p12 = scmp.lt.s32.totalorder %s11242_s10, %s11242_s10 }
  0x21   : > { %p11245_p10 = pnand %p11243_p9, %p11231_p13  ;;  %p11252_p0 = por %p11251_p12, %p11250_p1 }
  0x23   : > { %p11246_p6 = pneg %p11245_p10 }
  0x25   : > { %p11253_p4 = pnand %p11252_p0, %p11246_p6 }
  0x27   : > { %11256 = shalt.err (!%p11253_p4)
}
  0x28   : > { %s11405_s11 = smov 64   ;;  %s11406_s18 = smov 4  }
  0x29   : > { %10578 = dma.hbm_to_vmem [thread:$0]  (!%p11499_p11), %s12670_s1, 73728, %s11492_s26, [#allocation7], %s11405_s11, %s11405_s11, %s11406_s18  }
  0x2a   : > { %s11257_s4 = scalar_lea.hbm %s12671_s2, 16 }
  0x2b   : > { %p11258_p1 = scmp.ne.s32.totalorder %s12671_s2, %s11257_s4  ;;  %p11264_p10 = scmp.lt.u32.totalorder %s11257_s4, %s12671_s2 }
  0x2d   : > { %p11260_p4 = pnand %p11258_p1, %p11231_p13 }
  0x2f   : > { %p11261_p6 = pneg %p11260_p4 }
  0x31   : > { %p11266_p3 = pnand %p11264_p10, %p11261_p6 }
  0x33   : > { %11269 = shalt.err (!%p11266_p3)
}
  0x34   : > { %s11270_s26 = scalar_lea.vmem %s11503_s29, 16  ;;  %s11277_s9 = scalar_lea.vmem %s11503_s29, 32 }
  0x35   : > { %p11271_p5 = scmp.ne.s32.totalorder %s11503_s29, %s11270_s26  ;;  %p11278_p12 = scmp.lt.s32.totalorder %s11503_s29, %s11503_s29 }
  0x36   : > { %p11279_p0 = scmp.lt.s32.totalorder %s11277_s9, %s11270_s26 }
  0x37   : > { %p11273_p7 = pnand %p11271_p5, %p11231_p13 }
  0x38   : > { %p11280_p1 = por %p11279_p0, %p11278_p12 }
  0x39   : > { %p11274_p9 = pneg %p11273_p7 }
  0x3b   : > { %p11281_p4 = pnand %p11280_p1, %p11274_p9 }
  0x3d   : > { %11284 = shalt.err (!%p11281_p4)
}
  0x3e   : > { %10581 = dma.hbm_to_vmem [thread:$0]  (!%p11499_p11), %s12671_s2, 16, %s11503_s29, [#allocation7]  }
  0x3f   : > { %s32_s18 = sadd.s32 1, %s11397_s16  ;;  %s39_s19 = sadd.s32 1, %s11389_s14 }
  0x40   : > { %p34_p13 = scmp.ge.s32.totalorder %s32_s18, 2  ;;  %p46_p6 = scmp.ne.s32.totalorder %s11389_s14, %s11385_s13 }
  0x41   : > { %p47_p10 = scmp.eq.s32.totalorder %s11401_s17, 0  ;;  %p10592_p3 = scmp.lt.s32.totalorder %s11401_s17, 2 }
  0x42   : > { %s12780_s18 = smov (%p34_p13, %s32_s18), 0  ;;  %p11568_p7 = por %p11472_p2, %p46_p6 }
  0x43   : > { %p48_p5 = por %p47_p10, %p46_p6  ;;  %s36_s25 = ssub.s32 %s11397_s16, %s12780_s18 }
  0x44   : > { %s12711_s27 = scalar_select %p11568_p7, 1, 0 }
  0x45   : > { %s184_s28 = sand.u32 1, %s11389_s14   ;;  %p37_p9 = scmp.eq.s32.totalorder %s36_s25, 0 }
  0x46   : > { %s8499_s29 = sshll.u32 %s184_s28, 8  ;;  %s9121_s30 = sshll.u32 %s11397_s16, 12 }
  0x47   : > { %s11577_s4 = scalar_select %p37_p9, %s11389_s14, %s39_s19  }
  0x48   : > { %s11582_s7 = scalar_lea.hbm %s12669_s0, %s9121_s30  ;;  %s188_s21 = scalar_lea.vmem [#allocation3], %s8499_s29 }
  0x49   : > { %s195_s8 = sshll.u32 %s188_s21, 4  ;;  %p11586_p2 = pnand %p10592_p3, %p48_p5  ;;  %s11590_s8 = int_to_ptr.vmem [resolvable:$true] %s195_s8 }
  0x4a   : > { %s11592_s9 = scalar_lea.sflag [#allocation4], %s184_s28  ;;  %s11285_s10 = scalar_lea.hbm %s11582_s7, 4096 }
  0x4b   : > { %p11286_p11 = scmp.ne.s32.totalorder %s11582_s7, %s11285_s10  ;;  %p11287_p12 = pneg %p11586_p2 }
  0x4c   : > { %s11290_s25 = scalar_lea.hbm %s12669_s0, 8192  ;;  %p11291_p4 = scmp.lt.u32.totalorder %s11582_s7, %s12669_s0 }
  0x4d   : > { %p11288_p0 = pnand %p11287_p12, %p11286_p11  ;;  %p11292_p13 = scmp.lt.u32.totalorder %s11290_s25, %s11285_s10 }
  0x4e   : > { %p11294_p10 = scmp.lt.u32.totalorder %s11285_s10, %s11582_s7 }
  0x4f   : > { %p11289_p1 = pneg %p11288_p0  ;;  %p11293_p6 = por %p11292_p13, %p11291_p4 }
  0x51   : > { %p11295_p3 = por %p11294_p10, %p11293_p6 }
  0x53   : > { %p11296_p5 = pnand %p11295_p3, %p11289_p1 }
  0x55   : > { %11299 = shalt.err (!%p11296_p5)
}
  0x56   : > { %s11300_s28 = scalar_lea.vmem %s11590_s8, 4096  ;;  %s11407_s5 = smov [#allocation3]  }
  0x57   : > { %p11301_p9 = scmp.ne.s32.totalorder %s11590_s8, %s11300_s28  ;;  %s11305_s6 = sshll.u32 %s11407_s5, 4  ;;  %s11306_s6 = int_to_ptr.vmem [resolvable:$false] %s11305_s6 }
  0x58   : > { %s11307_s21 = scalar_lea.vmem %s11306_s6, 8192  ;;  %p11308_p7 = scmp.lt.s32.totalorder %s11590_s8, %s11306_s6 }
  0x59   : > { %p11303_p11 = pnand %p11301_p9, %p11287_p12  ;;  %p11309_p4 = scmp.lt.s32.totalorder %s11307_s21, %s11300_s28 }
  0x5b   : > { %p11304_p0 = pneg %p11303_p11  ;;  %p11310_p13 = por %p11309_p4, %p11308_p7 }
  0x5d   : > { %p11311_p6 = pnand %p11310_p13, %p11304_p0 }
  0x5f   : > { %11314 = shalt.err (!%p11311_p6)
}
  0x60   : > { %s11408_s10 = smov 512   ;;  %s11409_s11 = smov 32  }
  0x61   : > { %10585 = dma.hbm_to_vmem [thread:$0]  (!%p11586_p2), %s11582_s7, 4096, %s11590_s8, %s11592_s9, %s11408_s10, %s11408_s10, %s11409_s11  }
  0x62   : > { %207 = sbr.rel (%p11488_p8) target bundleno = 972 (0x3cc), region = 32 }
  0x69   : > { %s11623_s19 = sand.u32 1, %s11385_s13   ;;  %p12713_p7 = scmp.ne.s32.totalorder %s12707_s22, 0 }
  0x6a   : > { %s8503_s25 = sshll.u32 %s11623_s19, 8  ;;  %s210_s29 = scalar_lea.sflag [#allocation4], %s11623_s19 }
  0x6b   : > { %s11627_s30 = scalar_lea.vmem [#allocation3], %s8503_s25 }
  0x6c   : > { %11368 = dma.done.wait (%p12713_p7), %s210_s29, 4096  }
  0x6d   : > { %11370 = vsyncadd (%p12713_p7), %s210_s29, 4294963200  ;;  %p12714_p2 = scmp.ne.s32.totalorder %s12705_s20, 0 }
  0x6f   : > { %11372 = dma.done.wait (%p12714_p2), [#allocation7], 73744  }
  0x70   : > { %11374 = vsyncadd (%p12714_p2), [#allocation7], 4294893552  ;;  %v10653_v0 = vld [vmem:[#allocation6 + $0x40] sm:$0xff]   ;;  %v10657_v4 = vld [vmem:[#allocation6 + $0x48] sm:$0xff]   ;;  %s8506_s20 = sshll.u32 %s11623_s19, 6  ;;  %s9122_s24 = sshll.u32 %s11393_s15, 10 }
  0x71   : > { %v10654_v1 = vld [vmem:[#allocation6 + $0xc0] sm:$0xff]   ;;  %9123 = vmatprep.subr.bf16.mxu0 %v10653_v0  ;;  %v10658_v5 = vld [vmem:[#allocation6 + $0xc8] sm:$0xff]   ;;  %v10661_v8 = vld [vmem:[#allocation6 + $0x50] sm:$0xff]   ;;  %s12482_s22 = scalar_lea.vmem [#allocation9], %s8506_s20  ;;  %s12616_s9 = scalar_lea.hbm %s12672_s3, %s9122_s24 }
  0x72   : > { %v10655_v2 = vld [vmem:[#allocation6] sm:$0xff]   ;;  %9163 = vmatprep.subr.bf16.mxu1 %v10654_v1  ;;  %v10659_v6 = vld [vmem:[#allocation6 + $0x8] sm:$0xff]   ;;  %v10662_v9 = vld [vmem:[#allocation6 + $0xd0] sm:$0xff]   ;;  %s8387_s7 = sshll.u32 %s12482_s22, 4  ;;  %s8373_s28 = scalar_lea.sflag [#allocation5], %s11623_s19  ;;  %s12618_s7 = int_to_ptr.vmem [resolvable:$true] %s8387_s7 }
  0x73   : > { %v10656_v3 = vld [vmem:[#allocation6 + $0x80] sm:$0xff]   ;;  %9124 = vmatpush3.bf16.msra.mxu0 %v10655_v2  ;;  %v10660_v7 = vld [vmem:[#allocation6 + $0x88] sm:$0xff]   ;;  %v10663_v10 = vld [vmem:[#allocation6 + $0x10] sm:$0xff]   ;;  %s11315_s5 = scalar_lea.vmem %s12618_s7, 1024  ;;  %p12771_p12 = scmp.ne.s32.totalorder %s12711_s27, 0 }
  0x74   : > { %9164 = vmatpush3.bf16.msra.mxu1 %v10656_v3  ;;  %9125 = vmatprep.subr.bf16.mxu0 %v10657_v4  ;;  %v10664_v11 = vld [vmem:[#allocation6 + $0x90] sm:$0xff]   ;;  %v10665_v12 = vld [vmem:[#allocation6 + $0x58] sm:$0xff]   ;;  %v10669_v16 = vld [vmem:[#allocation6 + $0x60] sm:$0xff]   ;;  %p11316_p8 = scmp.ne.s32.totalorder %s12618_s7, %s11315_s5  ;;  %s11411_s15 = smov [#allocation9]  }
  0x75   : > { %9165 = vmatprep.subr.bf16.mxu1 %v10658_v5  ;;  %v10666_v13 = vld [vmem:[#allocation6 + $0xd8] sm:$0xff]   ;;  %v10670_v17 = vld [vmem:[#allocation6 + $0xe0] sm:$0xff]   ;;  %v10673_v20 = vld [vmem:[#allocation6 + $0x68] sm:$0xff]   ;;  %s11319_s6 = sshll.u32 %s11411_s15, 4  ;;  %s11320_s6 = int_to_ptr.vmem [resolvable:$false] %s11319_s6 }
  0x76   : > { %v10667_v14 = vld [vmem:[#allocation6 + $0x18] sm:$0xff]   ;;  %v10671_v18 = vld [vmem:[#allocation6 + $0x20] sm:$0xff]   ;;  %v10674_v21 = vld [vmem:[#allocation6 + $0xe8] sm:$0xff]   ;;  %p11317_p1 = pnand %p11316_p8, %p12771_p12  ;;  %s11321_s21 = scalar_lea.vmem %s11320_s6, 2048 }
  0x77   : > { %9126 = vmatpush3.bf16.msra.mxu0 %v10659_v6  ;;  %v10668_v15 = vld [vmem:[#allocation6 + $0x98] sm:$0xff]   ;;  %v10672_v19 = vld [vmem:[#allocation6 + $0xa0] sm:$0xff]   ;;  %v10675_v22 = vld [vmem:[#allocation6 + $0x28] sm:$0xff]   ;;  %p11322_p3 = scmp.lt.s32.totalorder %s12618_s7, %s11320_s6  ;;  %p11323_p5 = scmp.lt.s32.totalorder %s11321_s21, %s11315_s5 }
  0x78   : > { %9166 = vmatpush3.bf16.msra.mxu1 %v10660_v7  ;;  %9127 = vmatprep.subr.bf16.mxu0 %v10661_v8  ;;  %v10676_v23 = vld [vmem:[#allocation6 + $0xa8] sm:$0xff]   ;;  %v10677_v24 = vld [vmem:[#allocation6 + $0x70] sm:$0xff]   ;;  %v10681_v28 = vld [vmem:[#allocation6 + $0x78] sm:$0xff]   ;;  %p11318_p10 = pneg %p11317_p1 }
  0x79   : > { %9167 = vmatprep.subr.bf16.mxu1 %v10662_v9  ;;  %v10678_v25 = vld [vmem:[#allocation6 + $0xf0] sm:$0xff]   ;;  %v10682_v29 = vld [vmem:[#allocation6 + $0xf8] sm:$0xff]   ;;  %v245_v32 = vld [vmem:[%s11627_s30] sm:$0xff]  ;;  %p11324_p9 = por %p11323_p5, %p11322_p3 }
  0x7a   : > { %v10679_v26 = vld [vmem:[#allocation6 + $0x30] sm:$0xff]   ;;  %v10683_v30 = vld [vmem:[#allocation6 + $0x38] sm:$0xff]   ;;  %v249_v33 = vld [vmem:[%s11627_s30 + $0x20] sm:$0xff] }
  0x7b   : > { %9128 = vmatpush3.bf16.msra.mxu0 %v10663_v10  ;;  %v10680_v27 = vld [vmem:[#allocation6 + $0xb0] sm:$0xff]   ;;  %v10684_v31 = vld [vmem:[#allocation6 + $0xb8] sm:$0xff]   ;;  %v246_v34 = vld [vmem:[%s11627_s30 + $0x8] sm:$0xff]  ;;  %v11640_v35 = vcombine.high %v245_v32, %v249_v33  ;;  %v11643_v37 = vcombine.low %v245_v32, %v249_v33  ;;  %p11325_p11 = pnand %p11324_p9, %p11318_p10 }
  0x7c   : > { %9168 = vmatpush3.bf16.msra.mxu1 %v10664_v11  ;;  %9129 = vmatprep.subr.bf16.mxu0 %v10665_v12  ;;  %v250_v36 = vld [vmem:[%s11627_s30 + $0x28] sm:$0xff]  ;;  %v10685_v40 = vld [vmem:[#allocation6 + $0x140] sm:$0xff]   ;;  %v10693_v56 = vld [vmem:[#allocation6 + $0x150] sm:$0xff]  }
  0x7d   : > { %9169 = vmatprep.subr.bf16.mxu1 %v10666_v13  ;;  %v11645_v38 = vcombine.high %v246_v34, %v250_v36  ;;  %v11647_v39 = vcombine.low %v246_v34, %v250_v36  ;;  %989 = vmatprep.mubr.bf16.mxu0 %v11640_v35  ;;  %v10686_v41 = vld [vmem:[#allocation6 + $0x1c0] sm:$0xff]   ;;  %v10689_v44 = vld [vmem:[#allocation6 + $0x148] sm:$0xff]   ;;  %v10694_v57 = vld [vmem:[#allocation6 + $0x1d0] sm:$0xff]  }
  0x7e   : > { %v10687_v42 = vld [vmem:[#allocation6 + $0x100] sm:$0xff]   ;;  %v10690_v45 = vld [vmem:[#allocation6 + $0x1c8] sm:$0xff]   ;;  %v10695_v58 = vld [vmem:[#allocation6 + $0x110] sm:$0xff]  }
  0x7f   : > { %9130 = vmatpush3.bf16.msra.mxu0 %v10667_v14  ;;  %1053 = vmatprep.mubr.bf16.mxu1 %v11645_v38  ;;  %v10688_v43 = vld [vmem:[#allocation6 + $0x180] sm:$0xff]   ;;  %v10691_v46 = vld [vmem:[#allocation6 + $0x108] sm:$0xff]   ;;  %v10696_v59 = vld [vmem:[#allocation6 + $0x190] sm:$0xff]  }
  0x80   : > { %9170 = vmatpush3.bf16.msra.mxu1 %v10668_v15  ;;  %9131 = vmatprep.subr.bf16.mxu0 %v10669_v16  ;;  %v10692_v47 = vld [vmem:[#allocation6 + $0x188] sm:$0xff]   ;;  %v253_v48 = vld [vmem:[%s11627_s30 + $0x40] sm:$0xff]  ;;  %v10697_v60 = vld [vmem:[#allocation6 + $0x158] sm:$0xff]  }
  0x81   : > { %9171 = vmatprep.subr.bf16.mxu1 %v10670_v17  ;;  %v257_v49 = vld [vmem:[%s11627_s30 + $0x60] sm:$0xff]  ;;  %v254_v51 = vld [vmem:[%s11627_s30 + $0x48] sm:$0xff]  ;;  %v10698_v61 = vld [vmem:[#allocation6 + $0x1d8] sm:$0xff]  }
  0x82   : > { %v11655_v50 = vcombine.high %v253_v48, %v257_v49  ;;  %v258_v52 = vld [vmem:[%s11627_s30 + $0x68] sm:$0xff]  ;;  %v11659_v53 = vcombine.low %v253_v48, %v257_v49  ;;  %v10699_v62 = vld [vmem:[#allocation6 + $0x118] sm:$0xff]   ;;  %v261_v0 = vld [vmem:[%s11627_s30 + $0x80] sm:$0xff] }
  0x83   : > { %9132 = vmatpush3.bf16.msra.mxu0 %v10671_v18  ;;  %v11661_v54 = vcombine.high %v254_v51, %v258_v52  ;;  %v11663_v55 = vcombine.low %v254_v51, %v258_v52  ;;  %v10700_v63 = vld [vmem:[#allocation6 + $0x198] sm:$0xff]   ;;  %v265_v1 = vld [vmem:[%s11627_s30 + $0xa0] sm:$0xff]  ;;  %v262_v2 = vld [vmem:[%s11627_s30 + $0x88] sm:$0xff] }
  0x84   : > { %9172 = vmatpush3.bf16.msra.mxu1 %v10672_v19  ;;  %9133 = vmatprep.subr.bf16.mxu0 %v10673_v20  ;;  %v266_v3 = vld [vmem:[%s11627_s30 + $0xa8] sm:$0xff]  ;;  %v11673_v4 = vcombine.high %v261_v0, %v265_v1  ;;  %v11677_v6 = vcombine.low %v261_v0, %v265_v1  ;;  %v10701_v8 = vld [vmem:[#allocation6 + $0x160] sm:$0xff]   ;;  %v247_v32 = vld [vmem:[%s11627_s30 + $0x10] sm:$0xff] }
  0x85   : > { %9173 = vmatprep.subr.bf16.mxu1 %v10674_v21  ;;  %v11675_v5 = vcombine.high %v262_v2, %v266_v3  ;;  %v11679_v7 = vcombine.low %v262_v2, %v266_v3  ;;  %v10702_v9 = vld [vmem:[#allocation6 + $0x1e0] sm:$0xff]   ;;  %v10705_v12 = vld [vmem:[#allocation6 + $0x168] sm:$0xff]   ;;  %v251_v33 = vld [vmem:[%s11627_s30 + $0x30] sm:$0xff] }
  0x86   : > { %v10703_v10 = vld [vmem:[#allocation6 + $0x120] sm:$0xff]   ;;  %v10706_v13 = vld [vmem:[#allocation6 + $0x1e8] sm:$0xff]   ;;  %v11703_v34 = vcombine.high %v247_v32, %v251_v33  ;;  %v248_v36 = vld [vmem:[%s11627_s30 + $0x18] sm:$0xff] }
  0x87   : > { %9134 = vmatpush3.bf16.msra.mxu0 %v10675_v22  ;;  %v10704_v11 = vld [vmem:[#allocation6 + $0x1a0] sm:$0xff]   ;;  %v10707_v14 = vld [vmem:[#allocation6 + $0x128] sm:$0xff]   ;;  %v10725_v0 = vld [vmem:[#allocation6 + $0x250] sm:$0xff]  }
  0x88   : > { %9174 = vmatpush3.bf16.msra.mxu1 %v10676_v23  ;;  %9135 = vmatprep.subr.bf16.mxu0 %v10677_v24  ;;  %v10708_v15 = vld [vmem:[#allocation6 + $0x1a8] sm:$0xff]   ;;  %v269_v16 = vld [vmem:[%s11627_s30 + $0xc0] sm:$0xff]  ;;  %v10709_v24 = vld [vmem:[#allocation6 + $0x170] sm:$0xff]   ;;  %12715 = vst [vmem:[#allocation13_spill] sm:$0xff] %v11703_v34 }
  0x89   : > { %9175 = vmatprep.subr.bf16.mxu1 %v10678_v25  ;;  %v273_v17 = vld [vmem:[%s11627_s30 + $0xe0] sm:$0xff]  ;;  %v270_v18 = vld [vmem:[%s11627_s30 + $0xc8] sm:$0xff]  ;;  %v10710_v25 = vld [vmem:[#allocation6 + $0x1f0] sm:$0xff]  }
  0x8a   : > { %v11688_v19 = vcombine.high %v269_v16, %v273_v17  ;;  %v274_v20 = vld [vmem:[%s11627_s30 + $0xe8] sm:$0xff]  ;;  %v11691_v21 = vcombine.low %v269_v16, %v273_v17  ;;  %v10726_v1 = vld [vmem:[#allocation6 + $0x2d0] sm:$0xff]   ;;  %v268_v16 = vld [vmem:[%s11627_s30 + $0xb8] sm:$0xff] }
  0x8b   : > { %9136 = vmatpush3.bf16.msra.mxu0 %v10679_v26  ;;  %v11693_v22 = vcombine.high %v270_v18, %v274_v20  ;;  %v11695_v23 = vcombine.low %v270_v18, %v274_v20  ;;  %v10711_v26 = vld [vmem:[#allocation6 + $0x130] sm:$0xff]   ;;  %v10721_v48 = vld [vmem:[#allocation6 + $0x248] sm:$0xff]  }
  0x8c   : > { %9176 = vmatpush3.bf16.msra.mxu1 %v10680_v27  ;;  %9137 = vmatprep.subr.bf16.mxu0 %v10681_v28  ;;  %v10712_v27 = vld [vmem:[#allocation6 + $0x1b0] sm:$0xff]   ;;  %v10713_v28 = vld [vmem:[#allocation6 + $0x178] sm:$0xff]   ;;  %v10722_v49 = vld [vmem:[#allocation6 + $0x2c8] sm:$0xff]  }
  0x8d   : > { %9177 = vmatprep.subr.bf16.mxu1 %v10682_v29  ;;  %v10714_v29 = vld [vmem:[#allocation6 + $0x1f8] sm:$0xff]   ;;  %v10723_v51 = vld [vmem:[#allocation6 + $0x208] sm:$0xff]   ;;  %v10727_v2 = vld [vmem:[#allocation6 + $0x210] sm:$0xff]  }
  0x8e   : > { %v10724_v52 = vld [vmem:[#allocation6 + $0x288] sm:$0xff]   ;;  %v10728_v3 = vld [vmem:[#allocation6 + $0x290] sm:$0xff]  }
  0x8f   : > { %9138 = vmatpush3.bf16.msra.mxu0 %v10683_v30  ;;  %v10715_v30 = vld [vmem:[#allocation6 + $0x138] sm:$0xff]  }
  0x90   : > { %9178 = vmatpush3.bf16.msra.mxu1 %v10684_v31  ;;  %9203 = vmatprep.subr.bf16.mxu0 %v10685_v40  ;;  %v10716_v31 = vld [vmem:[#allocation6 + $0x1b8] sm:$0xff]  }
  0x91   : > { %9243 = vmatprep.subr.bf16.mxu1 %v10686_v41  ;;  %v252_v40 = vld [vmem:[%s11627_s30 + $0x38] sm:$0xff]  ;;  %v11707_v41 = vcombine.low %v247_v32, %v251_v33  ;;  %v271_v32 = vld [vmem:[%s11627_s30 + $0xd0] sm:$0xff] }
  0x92   : > { %990 = vmatmul.mubr.bf16.vlgmr.msra.gmra.mrb[0].mxu0 %v11643_v37  ;;  %v275_v33 = vld [vmem:[%s11627_s30 + $0xf0] sm:$0xff] }
  0x93   : > { %1054 = vmatmul.mubr.bf16.vlgmr.msra.gmra.mrb[0].mxu1 %v11647_v39  ;;  %9204 = vmatpush3.bf16.msra.mxu0 %v10687_v42  ;;  %v11709_v42 = vcombine.high %v248_v36, %v252_v40 }
  0x94   : > { %9244 = vmatpush3.bf16.msra.mxu1 %v10688_v43  ;;  %9205 = vmatprep.subr.bf16.mxu0 %v10689_v44  ;;  %v11711_v43 = vcombine.low %v248_v36, %v252_v40  ;;  %v10717_v44 = vld [vmem:[#allocation6 + $0x240] sm:$0xff]   ;;  %v11751_v36 = vcombine.high %v271_v32, %v275_v33  ;;  %v272_v40 = vld [vmem:[%s11627_s30 + $0xd8] sm:$0xff] }
  0x95   : > { %9245 = vmatprep.subr.bf16.mxu1 %v10690_v45  ;;  %997 = vmatprep.mubr.bf16.mxu0 %v11655_v50  ;;  %12716 = vst [vmem:[#allocation14_spill] sm:$0xff] %v11709_v42  ;;  %v10718_v45 = vld [vmem:[#allocation6 + $0x2c0] sm:$0xff]  }
  0x96   : > { %1061 = vmatprep.mubr.bf16.mxu1 %v11661_v54 }
  0x97   : > { %9206 = vmatpush3.bf16.msra.mxu0 %v10691_v46  ;;  %v10719_v46 = vld [vmem:[#allocation6 + $0x200] sm:$0xff]  }
  0x98   : > { %9246 = vmatpush3.bf16.msra.mxu1 %v10692_v47  ;;  %9207 = vmatprep.subr.bf16.mxu0 %v10693_v56  ;;  %v10720_v47 = vld [vmem:[#allocation6 + $0x280] sm:$0xff]   ;;  %v255_v56 = vld [vmem:[%s11627_s30 + $0x50] sm:$0xff] }
  0x99   : > { %9247 = vmatprep.subr.bf16.mxu1 %v10694_v57  ;;  %v259_v57 = vld [vmem:[%s11627_s30 + $0x70] sm:$0xff] }
  0x9a   : > { %998 = vmatmul.mubr.bf16.gmra.mrb[4].mxu0 %v11659_v53 }
  0x9b   : > { %1062 = vmatmul.mubr.bf16.gmra.mrb[4].mxu1 %v11663_v55  ;;  %9208 = vmatpush3.bf16.msra.mxu0 %v10695_v58  ;;  %v256_v58 = vld [vmem:[%s11627_s30 + $0x58] sm:$0xff] }
  0x9c   : > { %9248 = vmatpush3.bf16.msra.mxu1 %v10696_v59  ;;  %9209 = vmatprep.subr.bf16.mxu0 %v10697_v60  ;;  %v260_v59 = vld [vmem:[%s11627_s30 + $0x78] sm:$0xff]  ;;  %v11721_v60 = vcombine.high %v255_v56, %v259_v57 }
  0x9d   : > { %9249 = vmatprep.subr.bf16.mxu1 %v10698_v61  ;;  %1005 = vmatprep.mubr.bf16.mxu0 %v11673_v4  ;;  %v11723_v61 = vcombine.high %v256_v58, %v260_v59 }
  0x9e   : > { %1069 = vmatprep.mubr.bf16.mxu1 %v11675_v5  ;;  %12717 = vst [vmem:[#allocation15_spill] sm:$0xff] %v11721_v60 }
  0x9f   : > { %9210 = vmatpush3.bf16.msra.mxu0 %v10699_v62  ;;  %v11725_v62 = vcombine.low %v255_v56, %v259_v57  ;;  %v10745_v56 = vld [vmem:[#allocation6 + $0x278] sm:$0xff]  }
  0xa0   : > { %9250 = vmatpush3.bf16.msra.mxu1 %v10700_v63  ;;  %9211 = vmatprep.subr.bf16.mxu0 %v10701_v8  ;;  %v11727_v63 = vcombine.low %v256_v58, %v260_v59  ;;  %v10729_v8 = vld [vmem:[#allocation6 + $0x258] sm:$0xff]  }
  0xa1   : > { %9251 = vmatprep.subr.bf16.mxu1 %v10702_v9  ;;  %v10730_v9 = vld [vmem:[#allocation6 + $0x2d8] sm:$0xff]  }
  0xa2   : > { %1006 = vmatmul.mubr.bf16.gmra.mrb[8].mxu0 %v11677_v6  ;;  %12718 = vst [vmem:[#allocation16_spill] sm:$0xff] %v11727_v63  ;;  %v10746_v57 = vld [vmem:[#allocation6 + $0x2f8] sm:$0xff]  }
  0xa3   : > { %1070 = vmatmul.mubr.bf16.gmra.mrb[8].mxu1 %v11679_v7  ;;  %9212 = vmatpush3.bf16.msra.mxu0 %v10703_v10  ;;  %v10731_v10 = vld [vmem:[#allocation6 + $0x218] sm:$0xff]  }
  0xa4   : > { %9252 = vmatpush3.bf16.msra.mxu1 %v10704_v11  ;;  %9213 = vmatprep.subr.bf16.mxu0 %v10705_v12  ;;  %v10732_v11 = vld [vmem:[#allocation6 + $0x298] sm:$0xff]   ;;  %v263_v12 = vld [vmem:[%s11627_s30 + $0x90] sm:$0xff] }
  0xa5   : > { %9253 = vmatprep.subr.bf16.mxu1 %v10706_v13  ;;  %1013 = vmatprep.mubr.bf16.mxu0 %v11688_v19  ;;  %v267_v13 = vld [vmem:[%s11627_s30 + $0xb0] sm:$0xff]  ;;  %v10747_v58 = vld [vmem:[#allocation6 + $0x238] sm:$0xff]  }
  0xa6   : > { %1077 = vmatprep.mubr.bf16.mxu1 %v11693_v22  ;;  %v11739_v17 = vcombine.low %v263_v12, %v267_v13  ;;  %v10748_v59 = vld [vmem:[#allocation6 + $0x2b8] sm:$0xff]  }
  0xa7   : > { %9214 = vmatpush3.bf16.msra.mxu0 %v10707_v14  ;;  %v264_v14 = vld [vmem:[%s11627_s30 + $0x98] sm:$0xff] }
  0xa8   : > { %9254 = vmatpush3.bf16.msra.mxu1 %v10708_v15  ;;  %9215 = vmatprep.subr.bf16.mxu0 %v10709_v24  ;;  %v11736_v15 = vcombine.high %v263_v12, %v267_v13  ;;  %v11741_v18 = vcombine.high %v264_v14, %v268_v16  ;;  %v11743_v20 = vcombine.low %v264_v14, %v268_v16  ;;  %v10733_v24 = vld [vmem:[#allocation6 + $0x260] sm:$0xff]   ;;  %v10757_v12 = vld [vmem:[#allocation6 + $0x350] sm:$0xff]  }
  0xa9   : > { %9255 = vmatprep.subr.bf16.mxu1 %v10710_v25  ;;  %v10734_v25 = vld [vmem:[#allocation6 + $0x2e0] sm:$0xff]   ;;  %v10758_v13 = vld [vmem:[#allocation6 + $0x3d0] sm:$0xff]  }
  0xaa   : > { %1014 = vmatmul.mubr.bf16.gmra.mrb[12].mxu0 %v11691_v21  ;;  %12719 = vst [vmem:[#allocation17_spill] sm:$0xff] %v11736_v15  ;;  %v10759_v14 = vld [vmem:[#allocation6 + $0x310] sm:$0xff]  }
  0xab   : > { %1078 = vmatmul.mubr.bf16.gmra.mrb[12].mxu1 %v11695_v23  ;;  %9216 = vmatpush3.bf16.msra.mxu0 %v10711_v26  ;;  %v10735_v26 = vld [vmem:[#allocation6 + $0x220] sm:$0xff]   ;;  %v10760_v16 = vld [vmem:[#allocation6 + $0x390] sm:$0xff]  }
  0xac   : > { %9256 = vmatpush3.bf16.msra.mxu1 %v10712_v27  ;;  %9217 = vmatprep.subr.bf16.mxu0 %v10713_v28  ;;  %v10736_v27 = vld [vmem:[#allocation6 + $0x2a0] sm:$0xff]   ;;  %v10737_v28 = vld [vmem:[#allocation6 + $0x268] sm:$0xff]  }
  0xad   : > { %9257 = vmatprep.subr.bf16.mxu1 %v10714_v29  ;;  %1117 = vmatprep.mubr.bf16.mxu0 %v11703_v34  ;;  %v10738_v29 = vld [vmem:[#allocation6 + $0x2e8] sm:$0xff]  }
  0xae   : > { %1181 = vmatprep.mubr.bf16.mxu1 %v11709_v42 }
  0xaf   : > { %9218 = vmatpush3.bf16.msra.mxu0 %v10715_v30  ;;  %v10739_v30 = vld [vmem:[#allocation6 + $0x228] sm:$0xff]  }
  0xb0   : > { %9258 = vmatpush3.bf16.msra.mxu1 %v10716_v31  ;;  %9283 = vmatprep.subr.bf16.mxu0 %v10717_v44  ;;  %v10740_v31 = vld [vmem:[#allocation6 + $0x2a8] sm:$0xff]   ;;  %v276_v44 = vld [vmem:[%s11627_s30 + $0xf8] sm:$0xff] }
  0xb1   : > { %9323 = vmatprep.subr.bf16.mxu1 %v10718_v45  ;;  %v11755_v45 = vcombine.low %v271_v32, %v275_v33  ;;  %v10769_v32 = vld [vmem:[#allocation6 + $0x368] sm:$0xff]  }
  0xb2   : > { %1118 = vmatmul.mubr.bf16.vlgmr.msra.gmra.mrb[16].mxu0 %v11707_v41  ;;  %v10770_v33 = vld [vmem:[#allocation6 + $0x3e8] sm:$0xff]  }
  0xb3   : > { %1182 = vmatmul.mubr.bf16.vlgmr.msra.gmra.mrb[16].mxu1 %v11711_v43  ;;  %9284 = vmatpush3.bf16.msra.mxu0 %v10719_v46  ;;  %v11757_v46 = vcombine.high %v272_v40, %v276_v44 }
  0xb4   : > { %9324 = vmatpush3.bf16.msra.mxu1 %v10720_v47  ;;  %9285 = vmatprep.subr.bf16.mxu0 %v10721_v48  ;;  %v11759_v47 = vcombine.low %v272_v40, %v276_v44  ;;  %v10741_v48 = vld [vmem:[#allocation6 + $0x270] sm:$0xff]   ;;  %v10771_v40 = vld [vmem:[#allocation6 + $0x328] sm:$0xff]  }
  0xb5   : > { %9325 = vmatprep.subr.bf16.mxu1 %v10722_v49  ;;  %1125 = vmatprep.mubr.bf16.mxu0 %v11721_v60  ;;  %12720 = vst [vmem:[#allocation18_spill] sm:$0xff] %v11757_v46  ;;  %v10742_v49 = vld [vmem:[#allocation6 + $0x2f0] sm:$0xff]   ;;  %v10772_v44 = vld [vmem:[#allocation6 + $0x3a8] sm:$0xff]  }
  0xb6   : > { %1189 = vmatprep.mubr.bf16.mxu1 %v11723_v61 }
  0xb7   : > { %9286 = vmatpush3.bf16.msra.mxu0 %v10723_v51  ;;  %v10743_v51 = vld [vmem:[#allocation6 + $0x230] sm:$0xff]  }
  0xb8   : > { %9326 = vmatpush3.bf16.msra.mxu1 %v10724_v52  ;;  %9287 = vmatprep.subr.bf16.mxu0 %v10725_v0  ;;  %v10744_v52 = vld [vmem:[#allocation6 + $0x2b0] sm:$0xff]   ;;  %v10749_v0 = vld [vmem:[#allocation6 + $0x340] sm:$0xff]  }
  0xb9   : > { %9327 = vmatprep.subr.bf16.mxu1 %v10726_v1  ;;  %v10750_v1 = vld [vmem:[#allocation6 + $0x3c0] sm:$0xff]  }
  0xba   : > { %1126 = vmatmul.mubr.bf16.gmra.mrb[20].mxu0 %v11725_v62 }
  0xbb   : > { %1190 = vmatmul.mubr.bf16.gmra.mrb[20].mxu1 %v11727_v63  ;;  %9288 = vmatpush3.bf16.msra.mxu0 %v10727_v2  ;;  %v10751_v2 = vld [vmem:[#allocation6 + $0x300] sm:$0xff]  }
  0xbc   : > { %9328 = vmatpush3.bf16.msra.mxu1 %v10728_v3  ;;  %9289 = vmatprep.subr.bf16.mxu0 %v10729_v8  ;;  %v10752_v3 = vld [vmem:[#allocation6 + $0x380] sm:$0xff]   ;;  %v10753_v8 = vld [vmem:[#allocation6 + $0x348] sm:$0xff]  }
  0xbd   : > { %9329 = vmatprep.subr.bf16.mxu1 %v10730_v9  ;;  %1133 = vmatprep.mubr.bf16.mxu0 %v11736_v15  ;;  %v10754_v9 = vld [vmem:[#allocation6 + $0x3c8] sm:$0xff]  }
  0xbe   : > { %1197 = vmatprep.mubr.bf16.mxu1 %v11741_v18 }
  0xbf   : > { %9290 = vmatpush3.bf16.msra.mxu0 %v10731_v10  ;;  %v10755_v10 = vld [vmem:[#allocation6 + $0x308] sm:$0xff]  }
  0xc0   : > { %9330 = vmatpush3.bf16.msra.mxu1 %v10732_v11  ;;  %9291 = vmatprep.subr.bf16.mxu0 %v10733_v24  ;;  %v10756_v11 = vld [vmem:[#allocation6 + $0x388] sm:$0xff]   ;;  %v10761_v24 = vld [vmem:[#allocation6 + $0x358] sm:$0xff]  }
  0xc1   : > { %9331 = vmatprep.subr.bf16.mxu1 %v10734_v25  ;;  %v10762_v25 = vld [vmem:[#allocation6 + $0x3d8] sm:$0xff]  }
  0xc2   : > { %1134 = vmatmul.mubr.bf16.gmra.mrb[24].mxu0 %v11739_v17 }
  0xc3   : > { %1198 = vmatmul.mubr.bf16.gmra.mrb[24].mxu1 %v11743_v20  ;;  %9292 = vmatpush3.bf16.msra.mxu0 %v10735_v26  ;;  %v10763_v26 = vld [vmem:[#allocation6 + $0x318] sm:$0xff]  }
  0xc4   : > { %9332 = vmatpush3.bf16.msra.mxu1 %v10736_v27  ;;  %9293 = vmatprep.subr.bf16.mxu0 %v10737_v28  ;;  %v10764_v27 = vld [vmem:[#allocation6 + $0x398] sm:$0xff]   ;;  %v10765_v28 = vld [vmem:[#allocation6 + $0x360] sm:$0xff]  }
  0xc5   : > { %9333 = vmatprep.subr.bf16.mxu1 %v10738_v29  ;;  %1141 = vmatprep.mubr.bf16.mxu0 %v11751_v36  ;;  %v10766_v29 = vld [vmem:[#allocation6 + $0x3e0] sm:$0xff]  }
  0xc6   : > { %1205 = vmatprep.mubr.bf16.mxu1 %v11757_v46 }
  0xc7   : > { %9294 = vmatpush3.bf16.msra.mxu0 %v10739_v30  ;;  %v10767_v30 = vld [vmem:[#allocation6 + $0x320] sm:$0xff]  }
  0xc8   : > { %9334 = vmatpush3.bf16.msra.mxu1 %v10740_v31  ;;  %9295 = vmatprep.subr.bf16.mxu0 %v10741_v48  ;;  %v10768_v31 = vld [vmem:[#allocation6 + $0x3a0] sm:$0xff]   ;;  %v10773_v48 = vld [vmem:[#allocation6 + $0x370] sm:$0xff]  }
  0xc9   : > { %9335 = vmatprep.subr.bf16.mxu1 %v10742_v49  ;;  %v10774_v49 = vld [vmem:[#allocation6 + $0x3f0] sm:$0xff]  }
  0xca   : > { %1142 = vmatmul.mubr.bf16.gmra.mrb[28].mxu0 %v11755_v45 }
  0xcb   : > { %1206 = vmatmul.mubr.bf16.gmra.mrb[28].mxu1 %v11759_v47  ;;  %9296 = vmatpush3.bf16.msra.mxu0 %v10743_v51  ;;  %v10775_v51 = vld [vmem:[#allocation6 + $0x330] sm:$0xff]  }
  0xcc   : > { %9336 = vmatpush3.bf16.msra.mxu1 %v10744_v52  ;;  %1927 = vmatprep.mubr.bf16.mxu0 %v11640_v35  ;;  %v10776_v52 = vld [vmem:[#allocation6 + $0x3b0] sm:$0xff]  }
  0xcd   : > { %9297 = vmatprep.subr.bf16.mxu0 %v10745_v56  ;;  %1991 = vmatprep.mubr.bf16.mxu1 %v11645_v38  ;;  %v10777_v56 = vld [vmem:[#allocation6 + $0x378] sm:$0xff]  }
  0xce   : > { %9337 = vmatprep.subr.bf16.mxu1 %v10746_v57  ;;  %v10778_v57 = vld [vmem:[#allocation6 + $0x3f8] sm:$0xff]  }
  0xcf   : > { %9298 = vmatpush3.bf16.msra.mxu0 %v10747_v58  ;;  %v10779_v58 = vld [vmem:[#allocation6 + $0x338] sm:$0xff]  }
  0xd0   : > { %9338 = vmatpush3.bf16.msra.mxu1 %v10748_v59  ;;  %9363 = vmatprep.subr.bf16.mxu0 %v10749_v0  ;;  %v10780_v59 = vld [vmem:[#allocation6 + $0x3b8] sm:$0xff]   ;;  %v10781_v0 = vld [vmem:[#allocation6 + $0x440] sm:$0xff]  }
  0xd1   : > { %9403 = vmatprep.subr.bf16.mxu1 %v10750_v1  ;;  %v10782_v1 = vld [vmem:[#allocation6 + $0x4c0] sm:$0xff]  }
  0xd2   : > { %1928 = vmatmul.mubr.bf16.vlgmr.msra.gmra.mrb[32].mxu0 %v11643_v37 }
  0xd3   : > { %1992 = vmatmul.mubr.bf16.vlgmr.msra.gmra.mrb[32].mxu1 %v11647_v39  ;;  %9364 = vmatpush3.bf16.msra.mxu0 %v10751_v2  ;;  %v10783_v2 = vld [vmem:[#allocation6 + $0x400] sm:$0xff]  }
  0xd4   : > { %9404 = vmatpush3.bf16.msra.mxu1 %v10752_v3  ;;  %1935 = vmatprep.mubr.bf16.mxu0 %v11655_v50  ;;  %v10784_v3 = vld [vmem:[#allocation6 + $0x480] sm:$0xff]  }
  0xd5   : > { %9365 = vmatprep.subr.bf16.mxu0 %v10753_v8  ;;  %1999 = vmatprep.mubr.bf16.mxu1 %v11661_v54  ;;  %v10785_v8 = vld [vmem:[#allocation6 + $0x448] sm:$0xff]  }
  0xd6   : > { %9405 = vmatprep.subr.bf16.mxu1 %v10754_v9  ;;  %v10786_v9 = vld [vmem:[#allocation6 + $0x4c8] sm:$0xff]  }
  0xd7   : > { %9366 = vmatpush3.bf16.msra.mxu0 %v10755_v10  ;;  %v10787_v10 = vld [vmem:[#allocation6 + $0x408] sm:$0xff]  }
  0xd8   : > { %9406 = vmatpush3.bf16.msra.mxu1 %v10756_v11  ;;  %9367 = vmatprep.subr.bf16.mxu0 %v10757_v12  ;;  %v10788_v11 = vld [vmem:[#allocation6 + $0x488] sm:$0xff]   ;;  %v10789_v12 = vld [vmem:[#allocation6 + $0x450] sm:$0xff]  }
  0xd9   : > { %9407 = vmatprep.subr.bf16.mxu1 %v10758_v13  ;;  %v10790_v13 = vld [vmem:[#allocation6 + $0x4d0] sm:$0xff]  }
  0xda   : > { %1936 = vmatmul.mubr.bf16.gmra.mrb[36].mxu0 %v11659_v53 }
  0xdb   : > { %2000 = vmatmul.mubr.bf16.gmra.mrb[36].mxu1 %v11663_v55  ;;  %9368 = vmatpush3.bf16.msra.mxu0 %v10759_v14  ;;  %v10791_v14 = vld [vmem:[#allocation6 + $0x410] sm:$0xff]  }
  0xdc   : > { %9408 = vmatpush3.bf16.msra.mxu1 %v10760_v16  ;;  %1943 = vmatprep.mubr.bf16.mxu0 %v11673_v4  ;;  %v10792_v16 = vld [vmem:[#allocation6 + $0x490] sm:$0xff]  }
  0xdd   : > { %9369 = vmatprep.subr.bf16.mxu0 %v10761_v24  ;;  %2007 = vmatprep.mubr.bf16.mxu1 %v11675_v5  ;;  %v10793_v24 = vld [vmem:[#allocation6 + $0x458] sm:$0xff]  }
  0xde   : > { %9409 = vmatprep.subr.bf16.mxu1 %v10762_v25  ;;  %v10794_v25 = vld [vmem:[#allocation6 + $0x4d8] sm:$0xff]  }
  0xdf   : > { %9370 = vmatpush3.bf16.msra.mxu0 %v10763_v26  ;;  %v10795_v26 = vld [vmem:[#allocation6 + $0x418] sm:$0xff]  }
  0xe0   : > { %9410 = vmatpush3.bf16.msra.mxu1 %v10764_v27  ;;  %9371 = vmatprep.subr.bf16.mxu0 %v10765_v28  ;;  %v10796_v27 = vld [vmem:[#allocation6 + $0x498] sm:$0xff]   ;;  %v10797_v28 = vld [vmem:[#allocation6 + $0x460] sm:$0xff]  }
  0xe1   : > { %9411 = vmatprep.subr.bf16.mxu1 %v10766_v29  ;;  %v10798_v29 = vld [vmem:[#allocation6 + $0x4e0] sm:$0xff]  }
  0xe2   : > { %1944 = vmatmul.mubr.bf16.gmra.mrb[40].mxu0 %v11677_v6 }
  0xe3   : > { %2008 = vmatmul.mubr.bf16.gmra.mrb[40].mxu1 %v11679_v7  ;;  %9372 = vmatpush3.bf16.msra.mxu0 %v10767_v30  ;;  %v10799_v30 = vld [vmem:[#allocation6 + $0x420] sm:$0xff]  }
  0xe4   : > { %9412 = vmatpush3.bf16.msra.mxu1 %v10768_v31  ;;  %1951 = vmatprep.mubr.bf16.mxu0 %v11688_v19  ;;  %v10800_v31 = vld [vmem:[#allocation6 + $0x4a0] sm:$0xff]  }
  0xe5   : > { %9373 = vmatprep.subr.bf16.mxu0 %v10769_v32  ;;  %2015 = vmatprep.mubr.bf16.mxu1 %v11693_v22  ;;  %v10801_v32 = vld [vmem:[#allocation6 + $0x468] sm:$0xff]  }
  0xe6   : > { %9413 = vmatprep.subr.bf16.mxu1 %v10770_v33  ;;  %v10802_v33 = vld [vmem:[#allocation6 + $0x4e8] sm:$0xff]  }
  0xe7   : > { %9374 = vmatpush3.bf16.msra.mxu0 %v10771_v40  ;;  %v10803_v40 = vld [vmem:[#allocation6 + $0x428] sm:$0xff]  }
  0xe8   : > { %9414 = vmatpush3.bf16.msra.mxu1 %v10772_v44  ;;  %9375 = vmatprep.subr.bf16.mxu0 %v10773_v48  ;;  %v10804_v44 = vld [vmem:[#allocation6 + $0x4a8] sm:$0xff]   ;;  %v11410_v48 = vmov 0.0  }
  0xe9   : > { %9415 = vmatprep.subr.bf16.mxu1 %v10774_v49  ;;  %278 = vst [vmem:[#allocation2 + $0x8] sm:$0xff] %v11410_v48  ;;  %279 = vst [vmem:[#allocation2 + $0x10] sm:$0xff] %v11410_v48  ;;  %v10805_v49 = vld [vmem:[#allocation6 + $0x470] sm:$0xff]  }
  0xea   : > { %1952 = vmatmul.mubr.bf16.gmra.mrb[44].mxu0 %v11691_v21  ;;  %277 = vst [vmem:[#allocation2] sm:$0xff] %v11410_v48  ;;  %280 = vst [vmem:[#allocation2 + $0x18] sm:$0xff] %v11410_v48 }
  0xeb   : > { %2016 = vmatmul.mubr.bf16.gmra.mrb[44].mxu1 %v11695_v23  ;;  %9376 = vmatpush3.bf16.msra.mxu0 %v10775_v51  ;;  %281 = vst [vmem:[#allocation2 + $0x20] sm:$0xff] %v11410_v48  ;;  %282 = vst [vmem:[#allocation2 + $0x28] sm:$0xff] %v11410_v48  ;;  %v10806_v51 = vld [vmem:[#allocation6 + $0x4f0] sm:$0xff]  }
  0xec   : > { %9416 = vmatpush3.bf16.msra.mxu1 %v10776_v52  ;;  %2055 = vmatprep.mubr.bf16.mxu0 %v11703_v34  ;;  %283 = vst [vmem:[#allocation2 + $0x30] sm:$0xff] %v11410_v48  ;;  %284 = vst [vmem:[#allocation2 + $0x38] sm:$0xff] %v11410_v48  ;;  %v10807_v52 = vld [vmem:[#allocation6 + $0x430] sm:$0xff]   ;;  %v10836_v48 = vld [vmem:[#allocation6 + $0x5a8] sm:$0xff]  }
  0xed   : > { %9377 = vmatprep.subr.bf16.mxu0 %v10777_v56  ;;  %2119 = vmatprep.mubr.bf16.mxu1 %v11709_v42  ;;  %v10808_v56 = vld [vmem:[#allocation6 + $0x4b0] sm:$0xff]  }
  0xee   : > { %9417 = vmatprep.subr.bf16.mxu1 %v10778_v57  ;;  %v10809_v57 = vld [vmem:[#allocation6 + $0x478] sm:$0xff]  }
  0xef   : > { %9378 = vmatpush3.bf16.msra.mxu0 %v10779_v58  ;;  %v10810_v58 = vld [vmem:[#allocation6 + $0x4f8] sm:$0xff]  }
  0xf0   : > { %9418 = vmatpush3.bf16.msra.mxu1 %v10780_v59  ;;  %9443 = vmatprep.subr.bf16.mxu0 %v10781_v0  ;;  %v10811_v59 = vld [vmem:[#allocation6 + $0x438] sm:$0xff]  }
  0xf1   : > { %9483 = vmatprep.subr.bf16.mxu1 %v10782_v1  ;;  %v10812_v0 = vld [vmem:[#allocation6 + $0x4b8] sm:$0xff]   ;;  %v10813_v1 = vld [vmem:[#allocation6 + $0x540] sm:$0xff]  }
  0xf2   : > { %2056 = vmatmul.mubr.bf16.vlgmr.msra.gmra.mrb[48].mxu0 %v11707_v41 }
  0xf3   : > { %2120 = vmatmul.mubr.bf16.vlgmr.msra.gmra.mrb[48].mxu1 %v11711_v43  ;;  %9444 = vmatpush3.bf16.msra.mxu0 %v10783_v2  ;;  %v10814_v2 = vld [vmem:[#allocation6 + $0x5c0] sm:$0xff]  }
  0xf4   : > { %9484 = vmatpush3.bf16.msra.mxu1 %v10784_v3  ;;  %2063 = vmatprep.mubr.bf16.mxu0 %v11721_v60  ;;  %v10815_v3 = vld [vmem:[#allocation6 + $0x500] sm:$0xff]  }
  0xf5   : > { %9445 = vmatprep.subr.bf16.mxu0 %v10785_v8  ;;  %2127 = vmatprep.mubr.bf16.mxu1 %v11723_v61  ;;  %v10816_v8 = vld [vmem:[#allocation6 + $0x580] sm:$0xff]  }
  0xf6   : > { %9485 = vmatprep.subr.bf16.mxu1 %v10786_v9  ;;  %v10817_v9 = vld [vmem:[#allocation6 + $0x548] sm:$0xff]  }
  0xf7   : > { %9446 = vmatpush3.bf16.msra.mxu0 %v10787_v10  ;;  %v10818_v10 = vld [vmem:[#allocation6 + $0x5c8] sm:$0xff]  }
  0xf8   : > { %9486 = vmatpush3.bf16.msra.mxu1 %v10788_v11  ;;  %9447 = vmatprep.subr.bf16.mxu0 %v10789_v12  ;;  %v10819_v11 = vld [vmem:[#allocation6 + $0x508] sm:$0xff]  }
  0xf9   : > { %9487 = vmatprep.subr.bf16.mxu1 %v10790_v13  ;;  %v10820_v12 = vld [vmem:[#allocation6 + $0x588] sm:$0xff]   ;;  %v10821_v13 = vld [vmem:[#allocation6 + $0x550] sm:$0xff]  }
  0xfa   : > { %2064 = vmatmul.mubr.bf16.gmra.mrb[52].mxu0 %v11725_v62 }
  0xfb   : > { %2128 = vmatmul.mubr.bf16.gmra.mrb[52].mxu1 %v11727_v63  ;;  %9448 = vmatpush3.bf16.msra.mxu0 %v10791_v14  ;;  %v10822_v14 = vld [vmem:[#allocation6 + $0x5d0] sm:$0xff]  }
  0xfc   : > { %9488 = vmatpush3.bf16.msra.mxu1 %v10792_v16  ;;  %2071 = vmatprep.mubr.bf16.mxu0 %v11736_v15  ;;  %v10823_v16 = vld [vmem:[#allocation6 + $0x510] sm:$0xff]  }
  0xfd   : > { %9449 = vmatprep.subr.bf16.mxu0 %v10793_v24  ;;  %2135 = vmatprep.mubr.bf16.mxu1 %v11741_v18  ;;  %v10824_v24 = vld [vmem:[#allocation6 + $0x590] sm:$0xff]  }
  0xfe   : > { %9489 = vmatprep.subr.bf16.mxu1 %v10794_v25  ;;  %v10825_v25 = vld [vmem:[#allocation6 + $0x558] sm:$0xff]  }
  0xff   : > { %9450 = vmatpush3.bf16.msra.mxu0 %v10795_v26  ;;  %v10826_v26 = vld [vmem:[#allocation6 + $0x5d8] sm:$0xff]  }
 0x100   : > { %9490 = vmatpush3.bf16.msra.mxu1 %v10796_v27  ;;  %9451 = vmatprep.subr.bf16.mxu0 %v10797_v28  ;;  %v10827_v27 = vld [vmem:[#allocation6 + $0x518] sm:$0xff]  }
 0x101   : > { %9491 = vmatprep.subr.bf16.mxu1 %v10798_v29  ;;  %v10828_v28 = vld [vmem:[#allocation6 + $0x598] sm:$0xff]   ;;  %v10829_v29 = vld [vmem:[#allocation6 + $0x560] sm:$0xff]  }
 0x102   : > { %2072 = vmatmul.mubr.bf16.gmra.mrb[56].mxu0 %v11739_v17 }
 0x103   : > { %2136 = vmatmul.mubr.bf16.gmra.mrb[56].mxu1 %v11743_v20  ;;  %9452 = vmatpush3.bf16.msra.mxu0 %v10799_v30  ;;  %v10830_v30 = vld [vmem:[#allocation6 + $0x5e0] sm:$0xff]  }
 0x104   : > { %9492 = vmatpush3.bf16.msra.mxu1 %v10800_v31  ;;  %2079 = vmatprep.mubr.bf16.mxu0 %v11751_v36  ;;  %v10831_v31 = vld [vmem:[#allocation6 + $0x520] sm:$0xff]  }
 0x105   : > { %9453 = vmatprep.subr.bf16.mxu0 %v10801_v32  ;;  %2143 = vmatprep.mubr.bf16.mxu1 %v11757_v46  ;;  %v10832_v32 = vld [vmem:[#allocation6 + $0x5a0] sm:$0xff]  }
 0x106   : > { %9493 = vmatprep.subr.bf16.mxu1 %v10802_v33  ;;  %v10833_v33 = vld [vmem:[#allocation6 + $0x568] sm:$0xff]  }
 0x107   : > { %9454 = vmatpush3.bf16.msra.mxu0 %v10803_v40  ;;  %v10834_v40 = vld [vmem:[#allocation6 + $0x5e8] sm:$0xff]  }
 0x108   : > { %9494 = vmatpush3.bf16.msra.mxu1 %v10804_v44  ;;  %9455 = vmatprep.subr.bf16.mxu0 %v10805_v49  ;;  %v10835_v44 = vld [vmem:[#allocation6 + $0x528] sm:$0xff]   ;;  %v10837_v49 = vld [vmem:[#allocation6 + $0x570] sm:$0xff]  }
 0x109   : > { %9495 = vmatprep.subr.bf16.mxu1 %v10806_v51  ;;  %v10838_v51 = vld [vmem:[#allocation6 + $0x5f0] sm:$0xff]  }
 0x10a   : > { %2080 = vmatmul.mubr.bf16.gmra.mrb[60].mxu0 %v11755_v45 }
 0x10b   : > { %2144 = vmatmul.mubr.bf16.gmra.mrb[60].mxu1 %v11759_v47  ;;  %9456 = vmatpush3.bf16.msra.mxu0 %v10807_v52  ;;  %v10839_v52 = vld [vmem:[#allocation6 + $0x530] sm:$0xff]  }
 0x10c   : > { %9496 = vmatpush3.bf16.msra.mxu1 %v10808_v56  ;;  %2717 = vmatprep.mubr.bf16.mxu0 %v11640_v35  ;;  %v10840_v56 = vld [vmem:[#allocation6 + $0x5b0] sm:$0xff]  }
 0x10d   : > { %9457 = vmatprep.subr.bf16.mxu0 %v10809_v57  ;;  %2782 = vmatprep.mubr.bf16.mxu1 %v11645_v38  ;;  %v10841_v57 = vld [vmem:[#allocation6 + $0x578] sm:$0xff]  }
 0x10e   : > { %9497 = vmatprep.subr.bf16.mxu1 %v10810_v58  ;;  %v10842_v58 = vld [vmem:[#allocation6 + $0x5f8] sm:$0xff]  }
 0x10f   : > { %9458 = vmatpush3.bf16.msra.mxu0 %v10811_v59  ;;  %v10843_v59 = vld [vmem:[#allocation6 + $0x538] sm:$0xff]  }
 0x110   : > { %9498 = vmatpush3.bf16.msra.mxu1 %v10812_v0  ;;  %9523 = vmatprep.subr.bf16.mxu0 %v10813_v1  ;;  %v10844_v0 = vld [vmem:[#allocation6 + $0x5b8] sm:$0xff]   ;;  %v10845_v1 = vld [vmem:[#allocation6 + $0x640] sm:$0xff]  }
 0x111   : > { %9563 = vmatprep.subr.bf16.mxu1 %v10814_v2  ;;  %v10846_v2 = vld [vmem:[#allocation6 + $0x6c0] sm:$0xff]  }
 0x112   : > { %2718 = vmatmul.mubr.bf16.vlgmr.msra.gmra.mrb[64].mxu0 %v11643_v37 }
 0x113   : > { %2783 = vmatmul.mubr.bf16.vlgmr.msra.gmra.mrb[64].mxu1 %v11647_v39  ;;  %9524 = vmatpush3.bf16.msra.mxu0 %v10815_v3  ;;  %v10847_v3 = vld [vmem:[#allocation6 + $0x600] sm:$0xff]  }
 0x114   : > { %9564 = vmatpush3.bf16.msra.mxu1 %v10816_v8  ;;  %2725 = vmatprep.mubr.bf16.mxu0 %v11655_v50  ;;  %v10848_v8 = vld [vmem:[#allocation6 + $0x680] sm:$0xff]  }
 0x115   : > { %9525 = vmatprep.subr.bf16.mxu0 %v10817_v9  ;;  %2790 = vmatprep.mubr.bf16.mxu1 %v11661_v54  ;;  %v10849_v9 = vld [vmem:[#allocation6 + $0x648] sm:$0xff]  }
 0x116   : > { %9565 = vmatprep.subr.bf16.mxu1 %v10818_v10  ;;  %v10850_v10 = vld [vmem:[#allocation6 + $0x6c8] sm:$0xff]  }
 0x117   : > { %9526 = vmatpush3.bf16.msra.mxu0 %v10819_v11  ;;  %v10851_v11 = vld [vmem:[#allocation6 + $0x608] sm:$0xff]  }
 0x118   : > { %9566 = vmatpush3.bf16.msra.mxu1 %v10820_v12  ;;  %9527 = vmatprep.subr.bf16.mxu0 %v10821_v13  ;;  %v10852_v12 = vld [vmem:[#allocation6 + $0x688] sm:$0xff]   ;;  %v10853_v13 = vld [vmem:[#allocation6 + $0x650] sm:$0xff]  }
 0x119   : > { %9567 = vmatprep.subr.bf16.mxu1 %v10822_v14  ;;  %v10854_v14 = vld [vmem:[#allocation6 + $0x6d0] sm:$0xff]  }
 0x11a   : > { %2726 = vmatmul.mubr.bf16.gmra.mrb[68].mxu0 %v11659_v53 }
 0x11b   : > { %2791 = vmatmul.mubr.bf16.gmra.mrb[68].mxu1 %v11663_v55  ;;  %9528 = vmatpush3.bf16.msra.mxu0 %v10823_v16  ;;  %v10855_v16 = vld [vmem:[#allocation6 + $0x610] sm:$0xff]  }
 0x11c   : > { %9568 = vmatpush3.bf16.msra.mxu1 %v10824_v24  ;;  %2733 = vmatprep.mubr.bf16.mxu0 %v11673_v4  ;;  %v10856_v24 = vld [vmem:[#allocation6 + $0x690] sm:$0xff]  }
 0x11d   : > { %9529 = vmatprep.subr.bf16.mxu0 %v10825_v25  ;;  %2798 = vmatprep.mubr.bf16.mxu1 %v11675_v5  ;;  %v10857_v25 = vld [vmem:[#allocation6 + $0x658] sm:$0xff]  }
 0x11e   : > { %9569 = vmatprep.subr.bf16.mxu1 %v10826_v26  ;;  %v10858_v26 = vld [vmem:[#allocation6 + $0x6d8] sm:$0xff]  }
 0x11f   : > { %9530 = vmatpush3.bf16.msra.mxu0 %v10827_v27  ;;  %v10859_v27 = vld [vmem:[#allocation6 + $0x618] sm:$0xff]  }
 0x120   : > { %9570 = vmatpush3.bf16.msra.mxu1 %v10828_v28  ;;  %9531 = vmatprep.subr.bf16.mxu0 %v10829_v29  ;;  %v10860_v28 = vld [vmem:[#allocation6 + $0x698] sm:$0xff]   ;;  %v10861_v29 = vld [vmem:[#allocation6 + $0x660] sm:$0xff]  }
 0x121   : > { %9571 = vmatprep.subr.bf16.mxu1 %v10830_v30  ;;  %v10862_v30 = vld [vmem:[#allocation6 + $0x6e0] sm:$0xff]  }
 0x122   : > { %2734 = vmatmul.mubr.bf16.gmra.mrb[72].mxu0 %v11677_v6 }
 0x123   : > { %2799 = vmatmul.mubr.bf16.gmra.mrb[72].mxu1 %v11679_v7  ;;  %9532 = vmatpush3.bf16.msra.mxu0 %v10831_v31  ;;  %v10863_v31 = vld [vmem:[#allocation6 + $0x620] sm:$0xff]  }
 0x124   : > { %9572 = vmatpush3.bf16.msra.mxu1 %v10832_v32  ;;  %2741 = vmatprep.mubr.bf16.mxu0 %v11688_v19  ;;  %v10864_v32 = vld [vmem:[#allocation6 + $0x6a0] sm:$0xff]  }
 0x125   : > { %9533 = vmatprep.subr.bf16.mxu0 %v10833_v33  ;;  %2806 = vmatprep.mubr.bf16.mxu1 %v11693_v22  ;;  %v10865_v33 = vld [vmem:[#allocation6 + $0x668] sm:$0xff]  }
 0x126   : > { %9573 = vmatprep.subr.bf16.mxu1 %v10834_v40  ;;  %v1213_v40 = vlaneseq }
 0x127   : > { %9534 = vmatpush3.bf16.msra.mxu0 %v10835_v44  ;;  %v10866_v44 = vld [vmem:[#allocation6 + $0x6e8] sm:$0xff]  }
 0x128   : > { %9574 = vmatpush3.bf16.msra.mxu1 %v10836_v48  ;;  %9535 = vmatprep.subr.bf16.mxu0 %v10837_v49  ;;  %v10867_v48 = vld [vmem:[#allocation6 + $0x628] sm:$0xff]  }
 0x129   : > { %9575 = vmatprep.subr.bf16.mxu1 %v10838_v51  ;;  %v10868_v49 = vld [vmem:[#allocation6 + $0x6a8] sm:$0xff]   ;;  %v10869_v51 = vld [vmem:[#allocation6 + $0x670] sm:$0xff]  }
 0x12a   : > { %2742 = vmatmul.mubr.bf16.gmra.mrb[76].mxu0 %v11691_v21 }
 0x12b   : > { %2807 = vmatmul.mubr.bf16.gmra.mrb[76].mxu1 %v11695_v23  ;;  %9536 = vmatpush3.bf16.msra.mxu0 %v10839_v52  ;;  %v11827_v52 = vshrl.u32 %v1213_v40, 7 }
 0x12c   : > { %9576 = vmatpush3.bf16.msra.mxu1 %v10840_v56  ;;  %2847 = vmatprep.mubr.bf16.mxu0 %v11703_v34  ;;  %v10870_v56 = vld [vmem:[#allocation6 + $0x6f0] sm:$0xff]  }
 0x12d   : > { %9537 = vmatprep.subr.bf16.mxu0 %v10841_v57  ;;  %2912 = vmatprep.mubr.bf16.mxu1 %v11709_v42  ;;  %12721 = vst [vmem:[#allocation19_spill] sm:$0xff] %v11827_v52  ;;  %v10871_v57 = vld [vmem:[#allocation6 + $0x630] sm:$0xff]  }
 0x12e   : > { %9577 = vmatprep.subr.bf16.mxu1 %v10842_v58  ;;  %v10872_v58 = vld [vmem:[#allocation6 + $0x6b0] sm:$0xff]  }
 0x12f   : > { %9538 = vmatpush3.bf16.msra.mxu0 %v10843_v59  ;;  %v10873_v59 = vld [vmem:[#allocation6 + $0x678] sm:$0xff]  }
 0x130   : > { %9578 = vmatpush3.bf16.msra.mxu1 %v10844_v0  ;;  %9603 = vmatprep.subr.bf16.mxu0 %v10845_v1  ;;  %v11832_v0 = vadd.s32 8, %v11827_v52  ;;  %v10874_v1 = vld [vmem:[#allocation6 + $0x6f8] sm:$0xff]  }
 0x131   : > { %9643 = vmatprep.subr.bf16.mxu1 %v10846_v2  ;;  %v11836_v2 = vadd.s32 16, %v11827_v52 }
 0x132   : > { %2848 = vmatmul.mubr.bf16.vlgmr.msra.gmra.mrb[80].mxu0 %v11707_v41  ;;  %12722 = vst [vmem:[#allocation20_spill] sm:$0xff] %v11832_v0 }
 0x133   : > { %2913 = vmatmul.mubr.bf16.vlgmr.msra.gmra.mrb[80].mxu1 %v11711_v43  ;;  %9604 = vmatpush3.bf16.msra.mxu0 %v10847_v3  ;;  %12723 = vst [vmem:[#allocation21_spill] sm:$0xff] %v11836_v2  ;;  %v10875_v3 = vld [vmem:[#allocation6 + $0x638] sm:$0xff]  }
 0x134   : > { %9644 = vmatpush3.bf16.msra.mxu1 %v10848_v8  ;;  %2855 = vmatprep.mubr.bf16.mxu0 %v11721_v60  ;;  %v11840_v8 = vadd.s32 24, %v11827_v52 }
 0x135   : > { %9605 = vmatprep.subr.bf16.mxu0 %v10849_v9  ;;  %2920 = vmatprep.mubr.bf16.mxu1 %v11723_v61  ;;  %v10876_v9 = vld [vmem:[#allocation6 + $0x6b8] sm:$0xff]  }
 0x136   : > { %9645 = vmatprep.subr.bf16.mxu1 %v10850_v10  ;;  %12724 = vst [vmem:[#allocation22_spill] sm:$0xff] %v11840_v8  ;;  %v1221_v10 = vadd.s32 9, %v11827_v52 }
 0x137   : > { %9606 = vmatpush3.bf16.msra.mxu0 %v10851_v11  ;;  %v10877_v11 = vld [vmem:[#allocation6 + $0x740] sm:$0xff]  }
 0x138   : > { %9646 = vmatpush3.bf16.msra.mxu1 %v10852_v12  ;;  %9607 = vmatprep.subr.bf16.mxu0 %v10853_v13  ;;  %v1222_v12 = vadd.s32 9, %v11832_v0  ;;  %v10878_v13 = vld [vmem:[#allocation6 + $0x7c0] sm:$0xff]  }
 0x139   : > { %9647 = vmatprep.subr.bf16.mxu1 %v10854_v14  ;;  %v1223_v14 = vadd.s32 9, %v11836_v2 }
 0x13a   : > { %2856 = vmatmul.mubr.bf16.gmra.mrb[84].mxu0 %v11725_v62 }
 0x13b   : > { %2921 = vmatmul.mubr.bf16.gmra.mrb[84].mxu1 %v11727_v63  ;;  %9608 = vmatpush3.bf16.msra.mxu0 %v10855_v16  ;;  %v10879_v16 = vld [vmem:[#allocation6 + $0x700] sm:$0xff]  }
 0x13c   : > { %9648 = vmatpush3.bf16.msra.mxu1 %v10856_v24  ;;  %2863 = vmatprep.mubr.bf16.mxu0 %v11736_v15  ;;  %v1224_v24 = vadd.s32 9, %v11840_v8 }
 0x13d   : > { %9609 = vmatprep.subr.bf16.mxu0 %v10857_v25  ;;  %2928 = vmatprep.mubr.bf16.mxu1 %v11741_v18  ;;  %v10880_v25 = vld [vmem:[#allocation6 + $0x780] sm:$0xff]  }
 0x13e   : > { %9649 = vmatprep.subr.bf16.mxu1 %v10858_v26  ;;  %v1232_v26 = vand.u32 7, %v1221_v10 }
 0x13f   : > { %9610 = vmatpush3.bf16.msra.mxu0 %v10859_v27  ;;  %v10881_v27 = vld [vmem:[#allocation6 + $0x748] sm:$0xff]  }
 0x140   : > { %9650 = vmatpush3.bf16.msra.mxu1 %v10860_v28  ;;  %9611 = vmatprep.subr.bf16.mxu0 %v10861_v29  ;;  %v1239_v28 = vand.u32 7, %v1222_v12  ;;  %v10882_v29 = vld [vmem:[#allocation6 + $0x7c8] sm:$0xff]   ;;  %v11850_v40 = vadd.s32 4294967295, %v1232_v26 }
 0x141   : > { %9651 = vmatprep.subr.bf16.mxu1 %v10862_v30  ;;  %v1246_v30 = vand.u32 7, %v1223_v14 }
 0x142   : > { %2864 = vmatmul.mubr.bf16.gmra.mrb[88].mxu0 %v11739_v17  ;;  %vm1319_vm2 = vcmp.ge.s32.totalorder %v11850_v40, 0 }
 0x143   : > { %2929 = vmatmul.mubr.bf16.gmra.mrb[88].mxu1 %v11743_v20  ;;  %9612 = vmatpush3.bf16.msra.mxu0 %v10863_v31  ;;  %v10883_v31 = vld [vmem:[#allocation6 + $0x708] sm:$0xff]  }
 0x144   : > { %9652 = vmatpush3.bf16.msra.mxu1 %v10864_v32  ;;  %2871 = vmatprep.mubr.bf16.mxu0 %v11751_v36  ;;  %v1253_v32 = vand.u32 7, %v1224_v24  ;;  %v10893_v24 = vld [vmem:[#allocation6 + $0x760] sm:$0xff]  }
 0x145   : > { %9613 = vmatprep.subr.bf16.mxu0 %v10865_v33  ;;  %2936 = vmatprep.mubr.bf16.mxu1 %v11757_v46  ;;  %v10884_v33 = vld [vmem:[#allocation6 + $0x788] sm:$0xff]  }
 0x146   : > { %9653 = vmatprep.subr.bf16.mxu1 %v10866_v44  ;;  %v10885_v44 = vld [vmem:[#allocation6 + $0x750] sm:$0xff]  }
 0x147   : > { %9614 = vmatpush3.bf16.msra.mxu0 %v10867_v48  ;;  %v11852_v48 = vadd.s32 4294967295, %v1239_v28 }
 0x148   : > { %9654 = vmatpush3.bf16.msra.mxu1 %v10868_v49  ;;  %9615 = vmatprep.subr.bf16.mxu0 %v10869_v51  ;;  %v10886_v49 = vld [vmem:[#allocation6 + $0x7d0] sm:$0xff]   ;;  %v11854_v51 = vadd.s32 4294967295, %v1246_v30 }
 0x149   : > { %9655 = vmatprep.subr.bf16.mxu1 %v10870_v56  ;;  %v10887_v56 = vld [vmem:[#allocation6 + $0x710] sm:$0xff]   ;;  %vm1320_vm0 = vcmp.ge.s32.totalorder %v11852_v48, 0  ;;  %vm1327_vm1 = vcmp.lt.s32.totalorder %v11852_v48, 8 }
 0x14a   : > { %2872 = vmatmul.mubr.bf16.gmra.mrb[92].mxu0 %v11755_v45  ;;  %vm1321_vm3 = vcmp.ge.s32.totalorder %v11854_v51, 0  ;;  %vm1328_vm4 = vcmp.lt.s32.totalorder %v11854_v51, 8  ;;  %vm11922_vm5 = vmand %vm1320_vm0, %vm1327_vm1 }
 0x14b   : > { %2937 = vmatmul.mubr.bf16.gmra.mrb[92].mxu1 %v11759_v47  ;;  %9616 = vmatpush3.bf16.msra.mxu0 %v10871_v57  ;;  %v11856_v57 = vadd.s32 4294967295, %v1253_v32  ;;  %v10896_v32 = vld [vmem:[#allocation6 + $0x7a0] sm:$0xff]   ;;  %vm11943_vm10 = vmand %vm1321_vm3, %vm1328_vm4  ;;  %vm3085_vm3 = vcmask 1046528  }
 0x14c   : > { %9656 = vmatpush3.bf16.msra.mxu1 %v10872_v58  ;;  %3681 = vmatprep.mubr.bf16.mxu0 %v11640_v35  ;;  %v10888_v58 = vld [vmem:[#allocation6 + $0x790] sm:$0xff]  }
 0x14d   : > { %9617 = vmatprep.subr.bf16.mxu0 %v10873_v59  ;;  %3746 = vmatprep.mubr.bf16.mxu1 %v11645_v38  ;;  %v11860_v59 = vadd.s32 32, %v11827_v52  ;;  %vm1322_vm6 = vcmp.ge.s32.totalorder %v11856_v57, 0  ;;  %vm1329_vm7 = vcmp.lt.s32.totalorder %v11856_v57, 8 }
 0x14e   : > { %9657 = vmatprep.subr.bf16.mxu1 %v10874_v1  ;;  %v10889_v1 = vld [vmem:[#allocation6 + $0x758] sm:$0xff]   ;;  %vm11957_vm11 = vmand %vm1322_vm6, %vm1329_vm7 }
 0x14f   : > { %9618 = vmatpush3.bf16.msra.mxu0 %v10875_v3  ;;  %12725 = vst [vmem:[#allocation23_spill] sm:$0xff] %v11860_v59 }
 0x150   : > { %9658 = vmatpush3.bf16.msra.mxu1 %v10876_v9  ;;  %9683 = vmatprep.subr.bf16.mxu0 %v10877_v11  ;;  %v10890_v9 = vld [vmem:[#allocation6 + $0x7d8] sm:$0xff]  }
 0x151   : > { %9723 = vmatprep.subr.bf16.mxu1 %v10878_v13  ;;  %v10891_v11 = vld [vmem:[#allocation6 + $0x718] sm:$0xff]  }
 0x152   : > { %3682 = vmatmul.mubr.bf16.vlgmr.msra.gmra.mrb[96].mxu0 %v11643_v37  ;;  %v10892_v13 = vld [vmem:[#allocation6 + $0x798] sm:$0xff]  }
 0x153   : > { %3747 = vmatmul.mubr.bf16.vlgmr.msra.gmra.mrb[96].mxu1 %v11647_v39  ;;  %9684 = vmatpush3.bf16.msra.mxu0 %v10879_v16 }
 0x154   : > { %9724 = vmatpush3.bf16.msra.mxu1 %v10880_v25  ;;  %3689 = vmatprep.mubr.bf16.mxu0 %v11655_v50 }
 0x155   : > { %9685 = vmatprep.subr.bf16.mxu0 %v10881_v27  ;;  %3754 = vmatprep.mubr.bf16.mxu1 %v11661_v54  ;;  %v10894_v27 = vld [vmem:[#allocation6 + $0x7e0] sm:$0xff]  }
 0x156   : > { %9725 = vmatprep.subr.bf16.mxu1 %v10882_v29  ;;  %v10895_v29 = vld [vmem:[#allocation6 + $0x720] sm:$0xff]  }
 0x157   : > { %9686 = vmatpush3.bf16.msra.mxu0 %v10883_v31 }
 0x158   : > { %9726 = vmatpush3.bf16.msra.mxu1 %v10884_v33  ;;  %9687 = vmatprep.subr.bf16.mxu0 %v10885_v44 }
 0x159   : > { %9727 = vmatprep.subr.bf16.mxu1 %v10886_v49  ;;  %v10897_v49 = vld [vmem:[#allocation6 + $0x768] sm:$0xff]  }
 0x15a   : > { %3690 = vmatmul.mubr.bf16.gmra.mrb[100].mxu0 %v11659_v53 }
 0x15b   : > { %3755 = vmatmul.mubr.bf16.gmra.mrb[100].mxu1 %v11663_v55  ;;  %9688 = vmatpush3.bf16.msra.mxu0 %v10887_v56 }
 0x15c   : > { %9728 = vmatpush3.bf16.msra.mxu1 %v10888_v58  ;;  %3697 = vmatprep.mubr.bf16.mxu0 %v11673_v4  ;;  %v11870_v58 = vadd.s32 40, %v11827_v52 }
 0x15d   : > { %9689 = vmatprep.subr.bf16.mxu0 %v10889_v1  ;;  %3762 = vmatprep.mubr.bf16.mxu1 %v11675_v5  ;;  %v10898_v1 = vld [vmem:[#allocation6 + $0x7e8] sm:$0xff]  }
 0x15e   : > { %9729 = vmatprep.subr.bf16.mxu1 %v10890_v9  ;;  %12726 = vst [vmem:[#allocation24_spill] sm:$0xff] %v11870_v58  ;;  %v10899_v9 = vld [vmem:[#allocation6 + $0x728] sm:$0xff]  }
 0x15f   : > { %9690 = vmatpush3.bf16.msra.mxu0 %v10891_v11 }
 0x160   : > { %9730 = vmatpush3.bf16.msra.mxu1 %v10892_v13  ;;  %9691 = vmatprep.subr.bf16.mxu0 %v10893_v24 }
 0x161   : > { %9731 = vmatprep.subr.bf16.mxu1 %v10894_v27 }
 0x162   : > { %3698 = vmatmul.mubr.bf16.gmra.mrb[104].mxu0 %v11677_v6 }
 0x163   : > { %3763 = vmatmul.mubr.bf16.gmra.mrb[104].mxu1 %v11679_v7  ;;  %9692 = vmatpush3.bf16.msra.mxu0 %v10895_v29 }
 0x164   : > { %9732 = vmatpush3.bf16.msra.mxu1 %v10896_v32  ;;  %3705 = vmatprep.mubr.bf16.mxu0 %v11688_v19 }
 0x165   : > { %v9139_v3 = vpop.f32.mrb[0].mxu0  ;;  %9693 = vmatprep.subr.bf16.mxu0 %v10897_v49  ;;  %3770 = vmatprep.mubr.bf16.mxu1 %v11693_v22 }
 0x166   : > { %v9179_v10 = vpop.f32.mrb[0].mxu1  ;;  %v9140_v12 = vpop.f32.mrb[1].mxu0  ;;  %9733 = vmatprep.subr.bf16.mxu1 %v10898_v1  ;;  %v10906_v1 = vld [vmem:[#allocation6 + $0x7f8] sm:$0xff]  }
 0x167   : > { %v9141_v14 = vadd.f32 %v9140_v12, %v9139_v3  ;;  %v9180_v16 = vpop.f32.mrb[1].mxu1  ;;  %v9142_v26 = vpop.f32.mrb[2].mxu0  ;;  %v10900_v12 = vld [vmem:[#allocation6 + $0x7a8] sm:$0xff]   ;;  %9694 = vmatpush3.bf16.msra.mxu0 %v10899_v9  ;;  %v11882_v9 = vadd.s32 9, %v11860_v59 }
 0x168   : > { %v9181_v25 = vadd.f32 %v9180_v16, %v9179_v10  ;;  %v9182_v28 = vpop.f32.mrb[2].mxu1  ;;  %v9143_v31 = vpop.f32.mrb[3].mxu0  ;;  %9734 = vmatpush3.bf16.msra.mxu1 %v10900_v12  ;;  %v11886_v12 = vadd.s32 9, %v11870_v58 }
 0x169   : > { %v9144_v33 = vadd.f32 %v9143_v31, %v9142_v26  ;;  %v9183_v44 = vpop.f32.mrb[3].mxu1  ;;  %v10904_v31 = vld [vmem:[#allocation6 + $0x7b0] sm:$0xff]  }
 0x16a   : > { %v11865_v30 = vadd.f32 %v9181_v25, %v9141_v14  ;;  %v9184_v56 = vadd.f32 %v9183_v44, %v9182_v28  ;;  %v10901_v14 = vld [vmem:[#allocation6 + $0x770] sm:$0xff]   ;;  %3706 = vmatmul.mubr.bf16.gmra.mrb[108].mxu0 %v11691_v21  ;;  %v10905_v44 = vld [vmem:[#allocation6 + $0x778] sm:$0xff]  }
 0x16b   : > { %v10902_v25 = vld [vmem:[#allocation6 + $0x7f0] sm:$0xff]   ;;  %9695 = vmatprep.subr.bf16.mxu0 %v10901_v14  ;;  %3771 = vmatmul.mubr.bf16.gmra.mrb[108].mxu1 %v11695_v23 }
 0x16c   : > { %v11873_v10 = vadd.f32 %v9184_v56, %v9144_v33  ;;  %v10903_v28 = vld [vmem:[#allocation6 + $0x730] sm:$0xff]   ;;  %9735 = vmatprep.subr.bf16.mxu1 %v10902_v25  ;;  %3811 = vmatprep.mubr.bf16.mxu0 %v11703_v34 }
 0x16d   : > { %v9145_v3 = vpop.f32.mrb[4].mxu0  ;;  %9696 = vmatpush3.bf16.msra.mxu0 %v10903_v28  ;;  %9736 = vmatpush3.bf16.msra.mxu1 %v10904_v31  ;;  %v10911_v28 = vld [vmem:[#allocation6 + $0x800] sm:$0xff]  }
 0x16e   : > { %v9185_v11 = vpop.f32.mrb[4].mxu1  ;;  %v9146_v13 = vpop.f32.mrb[5].mxu0  ;;  %9697 = vmatprep.subr.bf16.mxu0 %v10905_v44  ;;  %3876 = vmatprep.mubr.bf16.mxu1 %v11709_v42 }
 0x16f   : > { %v9147_v16 = vadd.f32 %v9146_v13, %v9145_v3  ;;  %v9186_v24 = vpop.f32.mrb[5].mxu1  ;;  %v9148_v27 = vpop.f32.mrb[6].mxu0  ;;  %9737 = vmatprep.subr.bf16.mxu1 %v10906_v1  ;;  %v10908_v13 = vld [vmem:[#allocation6 + $0x7b8] sm:$0xff]  }
 0x170   : > { %v9187_v26 = vadd.f32 %v9186_v24, %v9185_v11  ;;  %v9188_v29 = vpop.f32.mrb[6].mxu1  ;;  %v9149_v33 = vpop.f32.mrb[7].mxu0  ;;  %v10907_v11 = vld [vmem:[#allocation6 + $0x738] sm:$0xff]   ;;  %v10909_v24 = vld [vmem:[#allocation6 + $0x840] sm:$0xff]  }
 0x171   : > { %v9150_v49 = vadd.f32 %v9149_v33, %v9148_v27  ;;  %v9189_v56 = vpop.f32.mrb[7].mxu1  ;;  %9698 = vmatpush3.bf16.msra.mxu0 %v10907_v11  ;;  %9738 = vmatpush3.bf16.msra.mxu1 %v10908_v13  ;;  %v10912_v33 = vld [vmem:[#allocation6 + $0x880] sm:$0xff]   ;;  %v10914_v11 = vld [vmem:[#allocation6 + $0x8c8] sm:$0xff]  }
 0x172   : > { %v11877_v32 = vadd.f32 %v9187_v26, %v9147_v16  ;;  %v9190_v3 = vadd.f32 %v9189_v56, %v9188_v29  ;;  %v10910_v26 = vld [vmem:[#allocation6 + $0x8c0] sm:$0xff]   ;;  %9763 = vmatprep.subr.bf16.mxu0 %v10909_v24 }
 0x173   : > { %9803 = vmatprep.subr.bf16.mxu1 %v10910_v26 }
 0x174   : > { %v11888_v14 = vadd.f32 %v9190_v3, %v9150_v49  ;;  %3812 = vmatmul.mubr.bf16.vlgmr.msra.gmra.mrb[112].mxu0 %v11707_v41  ;;  %3877 = vmatmul.mubr.bf16.vlgmr.msra.gmra.mrb[112].mxu1 %v11711_v43  ;;  %v10913_v49 = vld [vmem:[#allocation6 + $0x848] sm:$0xff]  }
 0x175   : > { %v9151_v16 = vpop.f32.mrb[8].mxu0  ;;  %9764 = vmatpush3.bf16.msra.mxu0 %v10911_v28  ;;  %9804 = vmatpush3.bf16.msra.mxu1 %v10912_v33  ;;  %v1260_v28 = vand.u32 7, %v11882_v9 }
 0x176   : > { %v9191_v25 = vpop.f32.mrb[8].mxu1  ;;  %v9152_v27 = vpop.f32.mrb[9].mxu0  ;;  %3819 = vmatprep.mubr.bf16.mxu0 %v11721_v60  ;;  %9765 = vmatprep.subr.bf16.mxu0 %v10913_v49  ;;  %v10919_v49 = vld [vmem:[#allocation6 + $0x810] sm:$0xff]  }
 0x177   : > { %v9153_v29 = vadd.f32 %v9152_v27, %v9151_v16  ;;  %v9192_v31 = vpop.f32.mrb[9].mxu1  ;;  %v9154_v56 = vpop.f32.mrb[10].mxu0  ;;  %v10915_v16 = vld [vmem:[#allocation6 + $0x808] sm:$0xff]   ;;  %3884 = vmatprep.mubr.bf16.mxu1 %v11723_v61  ;;  %9805 = vmatprep.subr.bf16.mxu1 %v10914_v11 }
 0x178   : > { %v9193_v44 = vadd.f32 %v9192_v31, %v9191_v25  ;;  %v9194_v1 = vpop.f32.mrb[10].mxu1  ;;  %v9155_v13 = vpop.f32.mrb[11].mxu0  ;;  %v10916_v25 = vld [vmem:[#allocation6 + $0x888] sm:$0xff]   ;;  %v10917_v31 = vld [vmem:[#allocation6 + $0x850] sm:$0xff]  }
 0x179   : > { %v9156_v24 = vadd.f32 %v9155_v13, %v9154_v56  ;;  %v9195_v27 = vpop.f32.mrb[11].mxu1  ;;  %9766 = vmatpush3.bf16.msra.mxu0 %v10915_v16  ;;  %9806 = vmatpush3.bf16.msra.mxu1 %v10916_v25  ;;  %v10920_v56 = vld [vmem:[#allocation6 + $0x890] sm:$0xff]  }
 0x17a   : > { %v11892_v3 = vadd.f32 %v9193_v44, %v9153_v29  ;;  %v9196_v26 = vadd.f32 %v9195_v27, %v9194_v1  ;;  %v10918_v44 = vld [vmem:[#allocation6 + $0x8d0] sm:$0xff]   ;;  %9767 = vmatprep.subr.bf16.mxu0 %v10917_v31  ;;  %v10921_v1 = vld [vmem:[#allocation6 + $0x858] sm:$0xff]  }
 0x17b   : > { %9807 = vmatprep.subr.bf16.mxu1 %v10918_v44  ;;  %v1267_v44 = vand.u32 7, %v11886_v12 }
 0x17c   : > { %v11897_v29 = vadd.f32 %v9196_v26, %v9156_v24  ;;  %3820 = vmatmul.mubr.bf16.gmra.mrb[116].mxu0 %v11725_v62  ;;  %3885 = vmatmul.mubr.bf16.gmra.mrb[116].mxu1 %v11727_v63  ;;  %v10922_v24 = vld [vmem:[#allocation6 + $0x8d8] sm:$0xff]  }
 0x17d   : > { %v9157_v33 = vpop.f32.mrb[12].mxu0  ;;  %9768 = vmatpush3.bf16.msra.mxu0 %v10919_v49  ;;  %9808 = vmatpush3.bf16.msra.mxu1 %v10920_v56  ;;  %v10926_v49 = vld [vmem:[#allocation6 + $0x8e0] sm:$0xff]  }
 0x17e   : > { %v9197_v58 = vpop.f32.mrb[12].mxu1  ;;  %v9158_v59 = vpop.f32.mrb[13].mxu0  ;;  %3827 = vmatprep.mubr.bf16.mxu0 %v11736_v15  ;;  %9769 = vmatprep.subr.bf16.mxu0 %v10921_v1 }
 0x17f   : > { %v9159_v11 = vadd.f32 %v9158_v59, %v9157_v33  ;;  %v9198_v13 = vpop.f32.mrb[13].mxu1  ;;  %v9160_v16 = vpop.f32.mrb[14].mxu0  ;;  %v10923_v59 = vld [vmem:[#allocation6 + $0x818] sm:$0xff]   ;;  %3892 = vmatprep.mubr.bf16.mxu1 %v11741_v18  ;;  %9809 = vmatprep.subr.bf16.mxu1 %v10922_v24  ;;  %v10925_v33 = vld [vmem:[#allocation6 + $0x860] sm:$0xff]   ;;  %v11912_v24 = vadd.s32 4294967295, %v1260_v28  ;;  %v10932_v28 = vld [vmem:[#allocation6 + $0x8a8] sm:$0xff]  }
 0x180   : > { %v9199_v9 = vadd.f32 %v9198_v13, %v9197_v58  ;;  %v9200_v27 = vpop.f32.mrb[14].mxu1  ;;  %v9161_v26 = vpop.f32.mrb[15].mxu0  ;;  %v10924_v58 = vld [vmem:[#allocation6 + $0x898] sm:$0xff]  }
 0x181   : > { %v9201_v31 = vpop.f32.mrb[15].mxu1  ;;  %9770 = vmatpush3.bf16.msra.mxu0 %v10923_v59  ;;  %9810 = vmatpush3.bf16.msra.mxu1 %v10924_v58  ;;  %v10929_v59 = vld [vmem:[#allocation6 + $0x868] sm:$0xff]   ;;  %vm1323_vm8 = vcmp.ge.s32.totalorder %v11912_v24, 0  ;;  %vm1330_vm9 = vcmp.lt.s32.totalorder %v11912_v24, 8 }
 0x182   : > { %v11904_v25 = vadd.f32 %v9199_v9, %v9159_v11  ;;  %9771 = vmatprep.subr.bf16.mxu0 %v10925_v33  ;;  %v10927_v11 = vld [vmem:[#allocation6 + $0x820] sm:$0xff]   ;;  %9811 = vmatprep.subr.bf16.mxu1 %v10926_v49  ;;  %v10930_v58 = vld [vmem:[#allocation6 + $0x8e8] sm:$0xff]   ;;  %vm11974_vm14 = vmand %vm1323_vm8, %vm1330_vm9 }
 0x183   : > { %v10928_v9 = vld [vmem:[#allocation6 + $0x8a0] sm:$0xff]   ;;  %v10931_v49 = vld [vmem:[#allocation6 + $0x828] sm:$0xff]  }
 0x184   : > { %3828 = vmatmul.mubr.bf16.gmra.mrb[120].mxu0 %v11739_v17  ;;  %3893 = vmatmul.mubr.bf16.gmra.mrb[120].mxu1 %v11743_v20 }
 0x185   : > { %v9219_v56 = vpop.f32.mrb[16].mxu0  ;;  %9772 = vmatpush3.bf16.msra.mxu0 %v10927_v11  ;;  %9812 = vmatpush3.bf16.msra.mxu1 %v10928_v9 }
 0x186   : > { %v9259_v13 = vpop.f32.mrb[16].mxu1  ;;  %v9220_v1 = vpop.f32.mrb[17].mxu0  ;;  %3835 = vmatprep.mubr.bf16.mxu0 %v11751_v36  ;;  %9773 = vmatprep.subr.bf16.mxu0 %v10929_v59  ;;  %v10934_v59 = vld [vmem:[#allocation6 + $0x8f0] sm:$0xff]  }
 0x187   : > { %v9260_v16 = vpop.f32.mrb[17].mxu1  ;;  %v9221_v12 = vadd.f32 %v9220_v1, %v9219_v56  ;;  %v9222_v26 = vpop.f32.mrb[18].mxu0  ;;  %3900 = vmatprep.mubr.bf16.mxu1 %v11757_v46  ;;  %9813 = vmatprep.subr.bf16.mxu1 %v10930_v58  ;;  %v10935_v58 = vld [vmem:[#allocation6 + $0x830] sm:$0xff]  }
 0x188   : > { %v9261_v27 = vadd.f32 %v9260_v16, %v9259_v13  ;;  %v9262_v31 = vpop.f32.mrb[18].mxu1  ;;  %v9223_v8 = vpop.f32.mrb[19].mxu0  ;;  %v1361_v13 = vld [vmem:[#allocation2 + $0x9] sm:$0xff] }
 0x189   : > { %v1120_v33 = vadd.f32 %v9221_v12, %v11865_v30  ;;  %v9224_v2 = vadd.f32 %v9223_v8, %v9222_v26  ;;  %v9263_v11 = vpop.f32.mrb[19].mxu1  ;;  %9774 = vmatpush3.bf16.msra.mxu0 %v10931_v49  ;;  %9814 = vmatpush3.bf16.msra.mxu1 %v10932_v28  ;;  %v1362_v30 = vld [vmem:[#allocation2 + $0x11] sm:$0xff]  ;;  %v11929_v12 = vadd.s32 4294967295, %v1267_v44 }
 0x18a   : > { %v9264_v1 = vadd.f32 %v9263_v11, %v9262_v31  ;;  %v10933_v16 = vld [vmem:[#allocation6 + $0x870] sm:$0xff]   ;;  %9815 = vmatprep.subr.bf16.mxu1 %v10934_v59  ;;  %v10937_v11 = vld [vmem:[#allocation6 + $0x878] sm:$0xff]  }
 0x18b   : > { %v1184_v56 = vadd.f32 %v9261_v27, %v1120_v33  ;;  %v1123_v8 = vadd.f32 %v9224_v2, %v11873_v10  ;;  %9775 = vmatprep.subr.bf16.mxu0 %v10933_v16  ;;  %v10936_v2 = vld [vmem:[#allocation6 + $0x8b0] sm:$0xff]   ;;  %vm1324_vm12 = vcmp.ge.s32.totalorder %v11929_v12, 0  ;;  %vm1331_vm13 = vcmp.lt.s32.totalorder %v11929_v12, 8 }
 0x18c   : > { %3836 = vmatmul.mubr.bf16.gmra.mrb[124].mxu0 %v11755_v45  ;;  %3901 = vmatmul.mubr.bf16.gmra.mrb[124].mxu1 %v11759_v47  ;;  %vm11986_vm15 = vmand %vm1324_vm12, %vm1331_vm13  ;;  %v10951_v12 = vld [vmem:[#allocation6 + $0x910] sm:$0xff]  }
 0x18d   : > { %v1354_v27 = vsel %vm1319_vm2, %v1184_v56, 0.0  ;;  %v1187_v26 = vadd.f32 %v9264_v1, %v1123_v8  ;;  %v9225_v31 = vpop.f32.mrb[20].mxu0  ;;  %9776 = vmatpush3.bf16.msra.mxu0 %v10935_v58  ;;  %4639 = vmatprep.mubr.bf16.mxu0 %v11640_v35  ;;  %v11949_v56 = vadd.s32 48, %v11827_v52  ;;  %v10938_v8 = vld [vmem:[#allocation6 + $0x8f8] sm:$0xff]  }
 0x18e   : > { %v1368_v48 = vadd.f32 %v1361_v13, %v1354_v27  ;;  %v9265_v10 = vpop.f32.mrb[20].mxu1  ;;  %v9226_v44 = vpop.f32.mrb[21].mxu0  ;;  %9816 = vmatpush3.bf16.msra.mxu1 %v10936_v2  ;;  %4704 = vmatprep.mubr.bf16.mxu1 %v11645_v38  ;;  %v10939_v27 = vld [vmem:[#allocation6 + $0x838] sm:$0xff]  }
 0x18f   : > { %v1355_v40 = vsel %vm11922_vm5, %v1187_v26, 0.0  ;;  %v9227_v33 = vadd.f32 %v9226_v44, %v9225_v31  ;;  %v9266_v49 = vpop.f32.mrb[21].mxu1  ;;  %9777 = vmatprep.subr.bf16.mxu0 %v10937_v11  ;;  %v9228_v51 = vpop.f32.mrb[22].mxu0  ;;  %9817 = vmatprep.subr.bf16.mxu1 %v10938_v8  ;;  %v10940_v26 = vld [vmem:[#allocation6 + $0x8b8] sm:$0xff]   ;;  %v1227_v44 = vadd.s32 9, %v11949_v56  ;;  %v10943_v11 = vld [vmem:[#allocation6 + $0x900] sm:$0xff]  }
 0x190   : > { %1375 = vst [vmem:[#allocation2 + $0x9] sm:$0xff] %v1368_v48  ;;  %v1369_v13 = vadd.f32 %v1362_v30, %v1355_v40  ;;  %v9267_v1 = vadd.f32 %v9266_v49, %v9265_v10  ;;  %v9268_v16 = vpop.f32.mrb[22].mxu1  ;;  %v1363_v48 = vld [vmem:[#allocation2 + $0x19] sm:$0xff]  ;;  %v9229_v58 = vpop.f32.mrb[23].mxu0 }
 0x191   : > { %v1128_v9 = vadd.f32 %v9227_v33, %v11877_v32  ;;  %9778 = vmatpush3.bf16.msra.mxu0 %v10939_v27  ;;  %v9269_v31 = vpop.f32.mrb[23].mxu1  ;;  %v9230_v32 = vadd.f32 %v9229_v58, %v9228_v51  ;;  %v10941_v10 = vld [vmem:[#allocation6 + $0x940] sm:$0xff]   ;;  %v1274_v27 = vand.u32 7, %v1227_v44  ;;  %v10948_v44 = vld [vmem:[#allocation6 + $0x988] sm:$0xff]  }
 0x192   : > { %1376 = vst [vmem:[#allocation2 + $0x11] sm:$0xff] %v1369_v13  ;;  %v9270_v2 = vadd.f32 %v9269_v31, %v9268_v16  ;;  %9818 = vmatpush3.bf16.msra.mxu1 %v10940_v26  ;;  %v10942_v33 = vld [vmem:[#allocation6 + $0x9c0] sm:$0xff]   ;;  %9843 = vmatprep.subr.bf16.mxu0 %v10941_v10  ;;  %v10945_v26 = vld [vmem:[#allocation6 + $0x948] sm:$0xff]  }
 0x193   : > { %v1192_v59 = vadd.f32 %v9267_v1, %v1128_v9  ;;  %v1131_v57 = vadd.f32 %v9230_v32, %v11888_v14  ;;  %9883 = vmatprep.subr.bf16.mxu1 %v10942_v33  ;;  %v10944_v1 = vld [vmem:[#allocation6 + $0x980] sm:$0xff]   ;;  %v10946_v32 = vld [vmem:[#allocation6 + $0x9c8] sm:$0xff]  }
 0x194   : > { %4640 = vmatmul.mubr.bf16.vlgmr.msra.gmra.mrb[128].mxu0 %v11643_v37  ;;  %v1364_v51 = vld [vmem:[#allocation2 + $0x21] sm:$0xff]  ;;  %v1365_v33 = vld [vmem:[#allocation2 + $0x29] sm:$0xff] }
 0x195   : > { %v1356_v40 = vsel %vm11943_vm10, %v1192_v59, 0.0  ;;  %v9231_v13 = vpop.f32.mrb[24].mxu0  ;;  %4647 = vmatprep.mubr.bf16.mxu0 %v11655_v50  ;;  %v1195_v8 = vadd.f32 %v9270_v2, %v1131_v57  ;;  %4705 = vmatmul.mubr.bf16.vlgmr.msra.gmra.mrb[128].mxu1 %v11647_v39  ;;  %v10947_v10 = vld [vmem:[#allocation6 + $0x908] sm:$0xff]  }
 0x196   : > { %v1370_v49 = vadd.f32 %v1363_v48, %v1356_v40  ;;  %v9271_v9 = vpop.f32.mrb[24].mxu1  ;;  %9844 = vmatpush3.bf16.msra.mxu0 %v10943_v11  ;;  %v9232_v28 = vpop.f32.mrb[25].mxu0  ;;  %9884 = vmatpush3.bf16.msra.mxu1 %v10944_v1 }
 0x197   : > { %v9272_v16 = vpop.f32.mrb[25].mxu1  ;;  %v9233_v59 = vadd.f32 %v9232_v28, %v9231_v13  ;;  %v9234_v58 = vpop.f32.mrb[26].mxu0  ;;  %4712 = vmatprep.mubr.bf16.mxu1 %v11661_v54  ;;  %v1357_v31 = vsel %vm11957_vm11, %v1195_v8, 0.0  ;;  %9845 = vmatprep.subr.bf16.mxu0 %v10945_v26  ;;  %v10950_v28 = vld [vmem:[#allocation6 + $0x9d0] sm:$0xff]  }
 0x198   : > { %1377 = vst [vmem:[#allocation2 + $0x19] sm:$0xff] %v1370_v49  ;;  %v9273_v48 = vadd.f32 %v9272_v16, %v9271_v9  ;;  %v9274_v2 = vpop.f32.mrb[26].mxu1  ;;  %v1371_v40 = vadd.f32 %v1364_v51, %v1357_v31  ;;  %9885 = vmatprep.subr.bf16.mxu1 %v10946_v32  ;;  %v9235_v49 = vpop.f32.mrb[27].mxu0  ;;  %v10949_v9 = vld [vmem:[#allocation6 + $0x950] sm:$0xff]   ;;  %v10953_v32 = vld [vmem:[#allocation6 + $0x958] sm:$0xff]  }
 0x199   : > { %v1136_v24 = vadd.f32 %v9233_v59, %v11892_v3  ;;  %v9275_v57 = vpop.f32.mrb[27].mxu1  ;;  %v9236_v13 = vadd.f32 %v9235_v49, %v9234_v58  ;;  %v1318_v3 = vadd.s32 4294967295, %v1274_v27  ;;  %v1366_v27 = vld [vmem:[#allocation2 + $0x31] sm:$0xff]  ;;  %v1367_v49 = vld [vmem:[#allocation2 + $0x39] sm:$0x7f] }
 0x19a   : > { %9846 = vmatpush3.bf16.msra.mxu0 %v10947_v10  ;;  %1378 = vst [vmem:[#allocation2 + $0x21] sm:$0xff] %v1371_v40  ;;  %v9276_v1 = vadd.f32 %v9275_v57, %v9274_v2  ;;  %9886 = vmatpush3.bf16.msra.mxu1 %v10948_v44  ;;  %v10952_v26 = vld [vmem:[#allocation6 + $0x990] sm:$0xff]   ;;  %v10954_v40 = vld [vmem:[#allocation6 + $0x9d8] sm:$0xff]  }
 0x19b   : > { %v1200_v11 = vadd.f32 %v9273_v48, %v1136_v24  ;;  %v1139_v51 = vadd.f32 %v9236_v13, %v11897_v29  ;;  %9847 = vmatprep.subr.bf16.mxu0 %v10949_v9  ;;  %9887 = vmatprep.subr.bf16.mxu1 %v10950_v28  ;;  %vm1325_vm0 = vcmp.ge.s32.totalorder %v1318_v3, 0  ;;  %vm1332_vm1 = vcmp.lt.s32.totalorder %v1318_v3, 8  ;;  %v10955_v13 = vld [vmem:[#allocation6 + $0x918] sm:$0xff]  }
 0x19c   : > { %4648 = vmatmul.mubr.bf16.gmra.mrb[132].mxu0 %v11659_v53  ;;  %vm12000_vm2 = vmand %vm1325_vm0, %vm1332_vm1  ;;  %v10956_v3 = vld [vmem:[#allocation6 + $0x998] sm:$0xff]  }
 0x19d   : > { %v1358_v8 = vsel %vm11974_vm14, %v1200_v11, 0.0  ;;  %4655 = vmatprep.mubr.bf16.mxu0 %v11673_v4  ;;  %4713 = vmatmul.mubr.bf16.gmra.mrb[132].mxu1 %v11663_v55  ;;  %v9237_v59 = vpop.f32.mrb[28].mxu0  ;;  %v1203_v48 = vadd.f32 %v9276_v1, %v1139_v51  ;;  %v10958_v51 = vld [vmem:[#allocation6 + $0x9e0] sm:$0xff]  }
 0x19e   : > { %v1372_v16 = vadd.f32 %v1365_v33, %v1358_v8  ;;  %v9277_v58 = vpop.f32.mrb[28].mxu1  ;;  %v9238_v31 = vpop.f32.mrb[29].mxu0  ;;  %4720 = vmatprep.mubr.bf16.mxu1 %v11675_v5  ;;  %9848 = vmatpush3.bf16.msra.mxu0 %v10951_v12  ;;  %v10957_v8 = vld [vmem:[#allocation6 + $0x960] sm:$0xff]  }
 0x19f   : > { %v9239_v29 = vadd.f32 %v9238_v31, %v9237_v59  ;;  %v9278_v14 = vpop.f32.mrb[29].mxu1  ;;  %v1359_v2 = vsel %vm11986_vm15, %v1203_v48, 0.0  ;;  %9888 = vmatpush3.bf16.msra.mxu1 %v10952_v26  ;;  %9849 = vmatprep.subr.bf16.mxu0 %v10953_v32  ;;  %v9240_v57 = vpop.f32.mrb[30].mxu0  ;;  %v10960_v59 = vld [vmem:[#allocation6 + $0x9a0] sm:$0xff]   ;;  %v10961_v26 = vld [vmem:[#allocation6 + $0x968] sm:$0xff]  }
 0x1a0   : > { %1379 = vst [vmem:[#allocation2 + $0x29] sm:$0xff] %v1372_v16  ;;  %v9279_v10 = vadd.f32 %v9278_v14, %v9277_v58  ;;  %v1373_v24 = vadd.f32 %v1366_v27, %v1359_v2  ;;  %v9280_v11 = vpop.f32.mrb[30].mxu1  ;;  %9889 = vmatprep.subr.bf16.mxu1 %v10954_v40  ;;  %v9241_v1 = vpop.f32.mrb[31].mxu0  ;;  %v10959_v16 = vld [vmem:[#allocation6 + $0x920] sm:$0xff]  }
 0x1a1   : > { %v1144_v33 = vadd.f32 %v9239_v29, %v11904_v25  ;;  %v9281_v9 = vpop.f32.mrb[31].mxu1  ;;  %v10962_v29 = vld [vmem:[#allocation6 + $0x9e8] sm:$0xff]   ;;  %v10965_v11 = vld [vmem:[#allocation6 + $0x970] sm:$0xff]  }
 0x1a2   : > { %1380 = vst [vmem:[#allocation2 + $0x31] sm:$0xff] %v1373_v24  ;;  %9850 = vmatpush3.bf16.msra.mxu0 %v10955_v13  ;;  %v10966_v13 = vld [vmem:[#allocation6 + $0x9f0] sm:$0xff]  }
 0x1a3   : > { %v1208_v30 = vadd.f32 %v9279_v10, %v1144_v33  ;;  %9890 = vmatpush3.bf16.msra.mxu1 %v10956_v3  ;;  %9851 = vmatprep.subr.bf16.mxu0 %v10957_v8  ;;  %v10963_v10 = vld [vmem:[#allocation6 + $0x928] sm:$0xff]   ;;  %v10967_v3 = vld [vmem:[#allocation6 + $0x930] sm:$0xff]  }
 0x1a4   : > { %4656 = vmatmul.mubr.bf16.gmra.mrb[136].mxu0 %v11677_v6  ;;  %9891 = vmatprep.subr.bf16.mxu1 %v10958_v51  ;;  %v10964_v33 = vld [vmem:[#allocation6 + $0x9a8] sm:$0xff]   ;;  %v10968_v8 = vld [vmem:[#allocation6 + $0x9b0] sm:$0xff]  }
 0x1a5   : > { %4663 = vmatprep.mubr.bf16.mxu0 %v11688_v19  ;;  %v1360_v25 = vsel %vm12000_vm2, %v1208_v30, 0.0  ;;  %4721 = vmatmul.mubr.bf16.gmra.mrb[136].mxu1 %v11679_v7  ;;  %v9299_v12 = vpop.f32.mrb[32].mxu0 }
 0x1a6   : > { %v1374_v28 = vadd.f32 %v1367_v49, %v1360_v25  ;;  %v9339_v48 = vpop.f32.mrb[32].mxu1  ;;  %v9300_v27 = vpop.f32.mrb[33].mxu0  ;;  %4728 = vmatprep.mubr.bf16.mxu1 %v11693_v22  ;;  %9852 = vmatpush3.bf16.msra.mxu0 %v10959_v16 }
 0x1a7   : > { %v9301_v58 = vadd.f32 %v9300_v27, %v9299_v12  ;;  %v9340_v31 = vpop.f32.mrb[33].mxu1  ;;  %9892 = vmatpush3.bf16.msra.mxu1 %v10960_v59  ;;  %9853 = vmatprep.subr.bf16.mxu0 %v10961_v26  ;;  %v9302_v32 = vpop.f32.mrb[34].mxu0  ;;  %v10970_v59 = vld [vmem:[#allocation6 + $0x9f8] sm:$0xff]  }
 0x1a8   : > { %1381 = vst [vmem:[#allocation2 + $0x39] sm:$0x7f] %v1374_v28  ;;  %v9341_v14 = vadd.f32 %v9340_v31, %v9339_v48  ;;  %v9342_v2 = vpop.f32.mrb[34].mxu1  ;;  %9893 = vmatprep.subr.bf16.mxu1 %v10962_v29  ;;  %v9303_v40 = vpop.f32.mrb[35].mxu0  ;;  %v10969_v28 = vld [vmem:[#allocation6 + $0x978] sm:$0xff]  }
 0x1a9   : > { %v9304_v44 = vadd.f32 %v9303_v40, %v9302_v32  ;;  %v9343_v49 = vpop.f32.mrb[35].mxu1  ;;  %v10971_v26 = vld [vmem:[#allocation6 + $0x938] sm:$0xff]   ;;  %v10973_v32 = vld [vmem:[#allocation6 + $0xa40] sm:$0xff]  }
 0x1aa   : > { %v12010_v24 = vadd.f32 %v9341_v14, %v9301_v58  ;;  %9854 = vmatpush3.bf16.msra.mxu0 %v10963_v10  ;;  %v9344_v57 = vadd.f32 %v9343_v49, %v9342_v2  ;;  %v10972_v31 = vld [vmem:[#allocation6 + $0x9b8] sm:$0xff]   ;;  %v10974_v40 = vld [vmem:[#allocation6 + $0xac0] sm:$0xff]  }
 0x1ab   : > { %9894 = vmatpush3.bf16.msra.mxu1 %v10964_v33  ;;  %9855 = vmatprep.subr.bf16.mxu0 %v10965_v11  ;;  %v10975_v49 = vld [vmem:[#allocation6 + $0xa00] sm:$0xff]  }
 0x1ac   : > { %4664 = vmatmul.mubr.bf16.gmra.mrb[140].mxu0 %v11691_v21  ;;  %v12014_v30 = vadd.f32 %v9344_v57, %v9304_v44  ;;  %9895 = vmatprep.subr.bf16.mxu1 %v10966_v13  ;;  %v10976_v11 = vld [vmem:[#allocation6 + $0xa80] sm:$0xff]  }
 0x1ad   : > { %4769 = vmatprep.mubr.bf16.mxu0 %v11703_v34  ;;  %v9305_v1 = vpop.f32.mrb[36].mxu0  ;;  %4729 = vmatmul.mubr.bf16.gmra.mrb[140].mxu1 %v11695_v23 }
 0x1ae   : > { %v9345_v9 = vpop.f32.mrb[36].mxu1  ;;  %v9306_v25 = vpop.f32.mrb[37].mxu0  ;;  %4834 = vmatprep.mubr.bf16.mxu1 %v11709_v42  ;;  %9856 = vmatpush3.bf16.msra.mxu0 %v10967_v3  ;;  %v10977_v3 = vld [vmem:[#allocation6 + $0xa48] sm:$0xff]  }
 0x1af   : > { %v9346_v51 = vpop.f32.mrb[37].mxu1  ;;  %v9307_v16 = vadd.f32 %v9306_v25, %v9305_v1  ;;  %9896 = vmatpush3.bf16.msra.mxu1 %v10968_v8  ;;  %9857 = vmatprep.subr.bf16.mxu0 %v10969_v28  ;;  %v9308_v48 = vpop.f32.mrb[38].mxu0  ;;  %v10978_v25 = vld [vmem:[#allocation6 + $0xac8] sm:$0xff]  }
 0x1b0   : > { %v9347_v12 = vadd.f32 %v9346_v51, %v9345_v9  ;;  %v9348_v27 = vpop.f32.mrb[38].mxu1  ;;  %9897 = vmatprep.subr.bf16.mxu1 %v10970_v59  ;;  %v9309_v29 = vpop.f32.mrb[39].mxu0  ;;  %v10980_v59 = vld [vmem:[#allocation6 + $0xa88] sm:$0xff]  }
 0x1b1   : > { %v9349_v14 = vpop.f32.mrb[39].mxu1  ;;  %v9310_v2 = vadd.f32 %v9309_v29, %v9308_v48 }
 0x1b2   : > { %v12018_v58 = vadd.f32 %v9347_v12, %v9307_v16  ;;  %9858 = vmatpush3.bf16.msra.mxu0 %v10971_v26  ;;  %v9350_v10 = vadd.f32 %v9349_v14, %v9348_v27  ;;  %v10979_v16 = vld [vmem:[#allocation6 + $0xa08] sm:$0xff]   ;;  %v10981_v26 = vld [vmem:[#allocation6 + $0xa50] sm:$0xff]  }
 0x1b3   : > { %9898 = vmatpush3.bf16.msra.mxu1 %v10972_v31  ;;  %9923 = vmatprep.subr.bf16.mxu0 %v10973_v32  ;;  %v10982_v14 = vld [vmem:[#allocation6 + $0xad0] sm:$0xff]  }
 0x1b4   : > { %v12020_v44 = vadd.f32 %v9350_v10, %v9310_v2  ;;  %9963 = vmatprep.subr.bf16.mxu1 %v10974_v40  ;;  %v10983_v10 = vld [vmem:[#allocation6 + $0xa10] sm:$0xff]  }
 0x1b5   : > { %v9311_v33 = vpop.f32.mrb[40].mxu0  ;;  %4770 = vmatmul.mubr.bf16.vlgmr.msra.gmra.mrb[144].mxu0 %v11707_v41 }
 0x1b6   : > { %v9351_v57 = vpop.f32.mrb[40].mxu1  ;;  %v9312_v13 = vpop.f32.mrb[41].mxu0  ;;  %4835 = vmatmul.mubr.bf16.vlgmr.msra.gmra.mrb[144].mxu1 %v11711_v43  ;;  %9924 = vmatpush3.bf16.msra.mxu0 %v10975_v49 }
 0x1b7   : > { %v9352_v1 = vpop.f32.mrb[41].mxu1  ;;  %v9313_v9 = vadd.f32 %v9312_v13, %v9311_v33  ;;  %9964 = vmatpush3.bf16.msra.mxu1 %v10976_v11  ;;  %9925 = vmatprep.subr.bf16.mxu0 %v10977_v3  ;;  %v9314_v51 = vpop.f32.mrb[42].mxu0  ;;  %v10984_v33 = vld [vmem:[#allocation6 + $0xa90] sm:$0xff]   ;;  %v10985_v11 = vld [vmem:[#allocation6 + $0xa58] sm:$0xff]  }
 0x1b8   : > { %v9353_v8 = vadd.f32 %v9352_v1, %v9351_v57  ;;  %v9354_v28 = vpop.f32.mrb[42].mxu1  ;;  %4777 = vmatprep.mubr.bf16.mxu0 %v11721_v60  ;;  %4842 = vmatprep.mubr.bf16.mxu1 %v11723_v61  ;;  %v9315_v48 = vpop.f32.mrb[43].mxu0  ;;  %v10986_v3 = vld [vmem:[#allocation6 + $0xad8] sm:$0xff]  }
 0x1b9   : > { %9965 = vmatprep.subr.bf16.mxu1 %v10978_v25  ;;  %v9355_v27 = vpop.f32.mrb[43].mxu1  ;;  %v9316_v31 = vadd.f32 %v9315_v48, %v9314_v51  ;;  %v10987_v25 = vld [vmem:[#allocation6 + $0xa18] sm:$0xff]   ;;  %v10989_v48 = vld [vmem:[#allocation6 + $0xa60] sm:$0xff]  }
 0x1ba   : > { %v12024_v12 = vadd.f32 %v9353_v8, %v9313_v9  ;;  %9926 = vmatpush3.bf16.msra.mxu0 %v10979_v16  ;;  %v9356_v29 = vadd.f32 %v9355_v27, %v9354_v28  ;;  %v10988_v28 = vld [vmem:[#allocation6 + $0xa98] sm:$0xff]   ;;  %v10990_v27 = vld [vmem:[#allocation6 + $0xae0] sm:$0xff]  }
 0x1bb   : > { %9966 = vmatpush3.bf16.msra.mxu1 %v10980_v59  ;;  %9927 = vmatprep.subr.bf16.mxu0 %v10981_v26 }
 0x1bc   : > { %v12028_v2 = vadd.f32 %v9356_v29, %v9316_v31  ;;  %9967 = vmatprep.subr.bf16.mxu1 %v10982_v14  ;;  %v10991_v31 = vld [vmem:[#allocation6 + $0xa20] sm:$0xff]  }
 0x1bd   : > { %v9317_v32 = vpop.f32.mrb[44].mxu0  ;;  %4778 = vmatmul.mubr.bf16.gmra.mrb[148].mxu0 %v11725_v62  ;;  %v10992_v14 = vld [vmem:[#allocation6 + $0xaa0] sm:$0xff]  }
 0x1be   : > { %v9357_v40 = vpop.f32.mrb[44].mxu1  ;;  %v9318_v49 = vpop.f32.mrb[45].mxu0  ;;  %4843 = vmatmul.mubr.bf16.gmra.mrb[148].mxu1 %v11727_v63  ;;  %9928 = vmatpush3.bf16.msra.mxu0 %v10983_v10 }
 0x1bf   : > { %v9358_v57 = vpop.f32.mrb[45].mxu1  ;;  %v9319_v13 = vadd.f32 %v9318_v49, %v9317_v32  ;;  %9968 = vmatpush3.bf16.msra.mxu1 %v10984_v33  ;;  %9929 = vmatprep.subr.bf16.mxu0 %v10985_v11  ;;  %v9320_v9 = vpop.f32.mrb[46].mxu0  ;;  %v10993_v49 = vld [vmem:[#allocation6 + $0xa68] sm:$0xff]  }
 0x1c0   : > { %v9359_v1 = vadd.f32 %v9358_v57, %v9357_v40  ;;  %v9360_v8 = vpop.f32.mrb[46].mxu1  ;;  %4785 = vmatprep.mubr.bf16.mxu0 %v11736_v15  ;;  %4850 = vmatprep.mubr.bf16.mxu1 %v11741_v18  ;;  %v9321_v16 = vpop.f32.mrb[47].mxu0  ;;  %v10994_v11 = vld [vmem:[#allocation6 + $0xae8] sm:$0xff]  }
 0x1c1   : > { %9969 = vmatprep.subr.bf16.mxu1 %v10986_v3  ;;  %v9361_v59 = vpop.f32.mrb[47].mxu1  ;;  %v10995_v3 = vld [vmem:[#allocation6 + $0xa28] sm:$0xff]  }
 0x1c2   : > { %v12032_v51 = vadd.f32 %v9359_v1, %v9319_v13  ;;  %9930 = vmatpush3.bf16.msra.mxu0 %v10987_v25  ;;  %v10996_v8 = vld [vmem:[#allocation6 + $0xaa8] sm:$0xff]  }
 0x1c3   : > { %9970 = vmatpush3.bf16.msra.mxu1 %v10988_v28  ;;  %9931 = vmatprep.subr.bf16.mxu0 %v10989_v48  ;;  %v12685_v48 = vand.u32 7, %v11832_v0 }
 0x1c4   : > { %9971 = vmatprep.subr.bf16.mxu1 %v10990_v27 }
 0x1c5   : > { %v9379_v26 = vpop.f32.mrb[48].mxu0  ;;  %4786 = vmatmul.mubr.bf16.gmra.mrb[152].mxu0 %v11739_v17 }
 0x1c6   : > { %v9419_v29 = vpop.f32.mrb[48].mxu1  ;;  %v9380_v32 = vpop.f32.mrb[49].mxu0  ;;  %4851 = vmatmul.mubr.bf16.gmra.mrb[152].mxu1 %v11743_v20  ;;  %9932 = vmatpush3.bf16.msra.mxu0 %v10991_v31  ;;  %v10998_v31 = vld [vmem:[#allocation6 + $0xaf0] sm:$0xff]  }
 0x1c7   : > { %v9420_v10 = vpop.f32.mrb[49].mxu1  ;;  %v9381_v40 = vadd.f32 %v9380_v32, %v9379_v26  ;;  %v9382_v57 = vpop.f32.mrb[50].mxu0  ;;  %9972 = vmatpush3.bf16.msra.mxu1 %v10992_v14  ;;  %4793 = vmatprep.mubr.bf16.mxu0 %v11751_v36  ;;  %v10997_v26 = vld [vmem:[#allocation6 + $0xa70] sm:$0xff]  }
 0x1c8   : > { %v9421_v33 = vadd.f32 %v9420_v10, %v9419_v29  ;;  %v9422_v13 = vpop.f32.mrb[50].mxu1  ;;  %9933 = vmatprep.subr.bf16.mxu0 %v10993_v49  ;;  %v9383_v9 = vpop.f32.mrb[51].mxu0  ;;  %4858 = vmatprep.mubr.bf16.mxu1 %v11757_v46  ;;  %v10999_v32 = vld [vmem:[#allocation6 + $0xa30] sm:$0xff]  }
 0x1c9   : > { %v2058_v1 = vadd.f32 %v9381_v40, %v12010_v24  ;;  %9973 = vmatprep.subr.bf16.mxu1 %v10994_v11  ;;  %v9384_v25 = vadd.f32 %v9383_v9, %v9382_v57  ;;  %v9423_v28 = vpop.f32.mrb[51].mxu1  ;;  %v11000_v40 = vld [vmem:[#allocation6 + $0xab0] sm:$0xff]   ;;  %v11002_v9 = vld [vmem:[#allocation6 + $0xaf8] sm:$0xff]  }
 0x1ca   : > { %9934 = vmatpush3.bf16.msra.mxu0 %v10995_v3  ;;  %v9424_v59 = vadd.f32 %v9423_v28, %v9422_v13  ;;  %v11001_v13 = vld [vmem:[#allocation6 + $0xa78] sm:$0xff]  }
 0x1cb   : > { %v12041_v16 = vadd.f32 %v9421_v33, %v2058_v1  ;;  %9974 = vmatpush3.bf16.msra.mxu1 %v10996_v8  ;;  %v2061_v27 = vadd.f32 %v9384_v25, %v12014_v30  ;;  %9935 = vmatprep.subr.bf16.mxu0 %v10997_v26  ;;  %v2945_v30 = vadd.s32 8, %v11832_v0  ;;  %v11003_v25 = vld [vmem:[#allocation6 + $0xa38] sm:$0xff]  }
 0x1cc   : > { %9975 = vmatprep.subr.bf16.mxu1 %v10998_v31  ;;  %v11004_v26 = vld [vmem:[#allocation6 + $0xab8] sm:$0xff]   ;;  %v12057_v31 = vadd.s32 1, %v12685_v48 }
 0x1cd   : > { %v9385_v24 = vpop.f32.mrb[52].mxu0  ;;  %v12045_v14 = vadd.f32 %v9424_v59, %v2061_v27  ;;  %4794 = vmatmul.mubr.bf16.gmra.mrb[156].mxu0 %v11755_v45 }
 0x1ce   : > { %v9425_v29 = vpop.f32.mrb[52].mxu1  ;;  %v9386_v10 = vpop.f32.mrb[53].mxu0  ;;  %4859 = vmatmul.mubr.bf16.gmra.mrb[156].mxu1 %v11759_v47  ;;  %9936 = vmatpush3.bf16.msra.mxu0 %v10999_v32  ;;  %12739 = vst [vmem:[#allocation25_spill] sm:$0xff] %v12057_v31  ;;  %v11005_v32 = vld [vmem:[#allocation6 + $0xb40] sm:$0xff]   ;;  %vm3049_vm4 = vcmp.lt.s32.totalorder %v12057_v31, 8 }
 0x1cf   : > { %v9387_v33 = vadd.f32 %v9386_v10, %v9385_v24  ;;  %v9426_v49 = vpop.f32.mrb[53].mxu1  ;;  %v9388_v57 = vpop.f32.mrb[54].mxu0  ;;  %5436 = vmatprep.mubr.bf16.mxu0 %v11640_v35  ;;  %9976 = vmatpush3.bf16.msra.mxu1 %v11000_v40  ;;  %v11006_v40 = vld [vmem:[#allocation6 + $0xbc0] sm:$0xff]  }
 0x1d0   : > { %v9427_v11 = vadd.f32 %v9426_v49, %v9425_v29  ;;  %v9428_v1 = vpop.f32.mrb[54].mxu1  ;;  %v9389_v8 = vpop.f32.mrb[55].mxu0  ;;  %5501 = vmatprep.mubr.bf16.mxu1 %v11645_v38  ;;  %9937 = vmatprep.subr.bf16.mxu0 %v11001_v13  ;;  %v2962_v29 = vand.u32 7, %v2945_v30  ;;  %v11008_v13 = vld [vmem:[#allocation6 + $0xb80] sm:$0xff]  }
 0x1d1   : > { %v2066_v3 = vadd.f32 %v9387_v33, %v12018_v58  ;;  %v9390_v28 = vadd.f32 %v9389_v8, %v9388_v57  ;;  %v9429_v59 = vpop.f32.mrb[55].mxu1  ;;  %9977 = vmatprep.subr.bf16.mxu1 %v11002_v9  ;;  %v11007_v57 = vld [vmem:[#allocation6 + $0xb00] sm:$0xff]  }
 0x1d2   : > { %v9430_v24 = vadd.f32 %v9429_v59, %v9428_v1  ;;  %9938 = vmatpush3.bf16.msra.mxu0 %v11003_v25  ;;  %v12740_v9 = vld [vmem:[#allocation21_spill] sm:$0xff] }
 0x1d3   : > { %v12053_v27 = vadd.f32 %v9427_v11, %v2066_v3  ;;  %v2069_v58 = vadd.f32 %v9390_v28, %v12020_v44  ;;  %9978 = vmatpush3.bf16.msra.mxu1 %v11004_v26  ;;  %10003 = vmatprep.subr.bf16.mxu0 %v11005_v32  ;;  %v2946_v8 = vadd.s32 8, %v12740_v9  ;;  %v11009_v28 = vld [vmem:[#allocation6 + $0xb48] sm:$0xff]   ;;  %v11014_v9 = vld [vmem:[#allocation6 + $0xbd0] sm:$0xff]  }
 0x1d4   : > { %10043 = vmatprep.subr.bf16.mxu1 %v11006_v40  ;;  %v11010_v26 = vld [vmem:[#allocation6 + $0xbc8] sm:$0xff]  }
 0x1d5   : > { %v9391_v10 = vpop.f32.mrb[56].mxu0  ;;  %v12060_v49 = vadd.f32 %v9430_v24, %v2069_v58  ;;  %5437 = vmatmul.mubr.bf16.vlgmr.msra.gmra.mrb[160].mxu0 %v11643_v37  ;;  %v11011_v32 = vld [vmem:[#allocation6 + $0xb08] sm:$0xff]  }
 0x1d6   : > { %v9431_v33 = vpop.f32.mrb[56].mxu1  ;;  %v9392_v11 = vpop.f32.mrb[57].mxu0  ;;  %5502 = vmatmul.mubr.bf16.vlgmr.msra.gmra.mrb[160].mxu1 %v11647_v39  ;;  %10004 = vmatpush3.bf16.msra.mxu0 %v11007_v57 }
 0x1d7   : > { %v9393_v1 = vadd.f32 %v9392_v11, %v9391_v10  ;;  %v9432_v3 = vpop.f32.mrb[57].mxu1  ;;  %v9394_v30 = vpop.f32.mrb[58].mxu0  ;;  %10044 = vmatpush3.bf16.msra.mxu1 %v11008_v13  ;;  %5444 = vmatprep.mubr.bf16.mxu0 %v11655_v50  ;;  %v12070_v13 = vadd.s32 1, %v2962_v29  ;;  %v11016_v29 = vld [vmem:[#allocation6 + $0xb90] sm:$0xff]  }
 0x1d8   : > { %v9433_v44 = vadd.f32 %v9432_v3, %v9431_v33  ;;  %v9434_v59 = vpop.f32.mrb[58].mxu1  ;;  %v9395_v24 = vpop.f32.mrb[59].mxu0  ;;  %5509 = vmatprep.mubr.bf16.mxu1 %v11661_v54  ;;  %10005 = vmatprep.subr.bf16.mxu0 %v11009_v28  ;;  %v11012_v33 = vld [vmem:[#allocation6 + $0xb88] sm:$0xff]   ;;  %v11013_v3 = vld [vmem:[#allocation6 + $0xb50] sm:$0xff]  }
 0x1d9   : > { %v2074_v25 = vadd.f32 %v9393_v1, %v12024_v12  ;;  %v9396_v10 = vadd.f32 %v9395_v24, %v9394_v30  ;;  %v9435_v40 = vpop.f32.mrb[59].mxu1  ;;  %10045 = vmatprep.subr.bf16.mxu1 %v11010_v26  ;;  %v2969_v12 = vand.u32 7, %v2946_v8  ;;  %v11015_v30 = vld [vmem:[#allocation6 + $0xb10] sm:$0xff]   ;;  %vm3043_vm5 = vcmp.ge.s32.totalorder %v12070_v13, 0 }
 0x1da   : > { %v9436_v57 = vadd.f32 %v9435_v40, %v9434_v59  ;;  %10006 = vmatpush3.bf16.msra.mxu0 %v11011_v32  ;;  %v12741_v24 = vld [vmem:[#allocation22_spill] sm:$0xff]  ;;  %v11017_v40 = vld [vmem:[#allocation6 + $0xb58] sm:$0xff]   ;;  %vm3050_vm6 = vcmp.lt.s32.totalorder %v12070_v13, 8 }
 0x1db   : > { %v12068_v58 = vadd.f32 %v9433_v44, %v2074_v25  ;;  %v2077_v1 = vadd.f32 %v9396_v10, %v12028_v2  ;;  %10046 = vmatpush3.bf16.msra.mxu1 %v11012_v33  ;;  %10007 = vmatprep.subr.bf16.mxu0 %v11013_v3  ;;  %v12078_v32 = vadd.s32 8, %v12741_v24  ;;  %v11020_v3 = vld [vmem:[#allocation6 + $0xb98] sm:$0xff]   ;;  %vm12143_vm9 = vmand %vm3043_vm5, %vm3050_vm6 }
 0x1dc   : > { %10047 = vmatprep.subr.bf16.mxu1 %v11014_v9 }
 0x1dd   : > { %v9397_v11 = vpop.f32.mrb[60].mxu0  ;;  %v12073_v25 = vadd.f32 %v9436_v57, %v2077_v1  ;;  %5445 = vmatmul.mubr.bf16.gmra.mrb[164].mxu0 %v11659_v53  ;;  %v11018_v57 = vld [vmem:[#allocation6 + $0xbd8] sm:$0xff]   ;;  %v12085_v1 = vadd.s32 1, %v2969_v12  ;;  %v11024_v12 = vld [vmem:[#allocation6 + $0xba0] sm:$0xff]  }
 0x1de   : > { %v9437_v48 = vpop.f32.mrb[60].mxu1  ;;  %v9398_v44 = vpop.f32.mrb[61].mxu0  ;;  %5510 = vmatmul.mubr.bf16.gmra.mrb[164].mxu1 %v11663_v55  ;;  %10008 = vmatpush3.bf16.msra.mxu0 %v11015_v30 }
 0x1df   : > { %v9399_v28 = vadd.f32 %v9398_v44, %v9397_v11  ;;  %v9438_v59 = vpop.f32.mrb[61].mxu1  ;;  %v9400_v26 = vpop.f32.mrb[62].mxu0  ;;  %5452 = vmatprep.mubr.bf16.mxu0 %v11673_v4  ;;  %10048 = vmatpush3.bf16.msra.mxu1 %v11016_v29  ;;  %v11023_v29 = vld [vmem:[#allocation6 + $0xb20] sm:$0xff]   ;;  %vm3044_vm7 = vcmp.ge.s32.totalorder %v12085_v1, 0  ;;  %vm3051_vm8 = vcmp.lt.s32.totalorder %v12085_v1, 8 }
 0x1e0   : > { %v9439_v8 = vadd.f32 %v9438_v59, %v9437_v48  ;;  %v9440_v2 = vpop.f32.mrb[62].mxu1  ;;  %v9401_v33 = vpop.f32.mrb[63].mxu0  ;;  %5517 = vmatprep.mubr.bf16.mxu1 %v11675_v5  ;;  %10009 = vmatprep.subr.bf16.mxu0 %v11017_v40  ;;  %v11019_v48 = vld [vmem:[#allocation6 + $0xb18] sm:$0xff]   ;;  %v11025_v40 = vld [vmem:[#allocation6 + $0xb68] sm:$0xff]   ;;  %vm12157_vm10 = vmand %vm3044_vm7, %vm3051_vm8 }
 0x1e1   : > { %v2082_v10 = vadd.f32 %v9399_v28, %v12032_v51  ;;  %v9441_v11 = vpop.f32.mrb[63].mxu1  ;;  %10049 = vmatprep.subr.bf16.mxu1 %v11018_v57  ;;  %v11021_v51 = vld [vmem:[#allocation6 + $0xb60] sm:$0xff]  }
 0x1e2   : > { %10010 = vmatpush3.bf16.msra.mxu0 %v11019_v48  ;;  %v11022_v28 = vld [vmem:[#allocation6 + $0xbe0] sm:$0xff]   ;;  %v11026_v11 = vld [vmem:[#allocation6 + $0xbe8] sm:$0xff]  }
 0x1e3   : > { %v12083_v9 = vadd.f32 %v9439_v8, %v2082_v10  ;;  %10050 = vmatpush3.bf16.msra.mxu1 %v11020_v3  ;;  %10011 = vmatprep.subr.bf16.mxu0 %v11021_v51  ;;  %v11027_v3 = vld [vmem:[#allocation6 + $0xb28] sm:$0xff]  }
 0x1e4   : > { %10051 = vmatprep.subr.bf16.mxu1 %v11022_v28  ;;  %v11028_v28 = vld [vmem:[#allocation6 + $0xba8] sm:$0xff]  }
 0x1e5   : > { %v9459_v44 = vpop.f32.mrb[64].mxu0  ;;  %5453 = vmatmul.mubr.bf16.gmra.mrb[168].mxu0 %v11677_v6 }
 0x1e6   : > { %v9499_v30 = vpop.f32.mrb[64].mxu1  ;;  %v9460_v59 = vpop.f32.mrb[65].mxu0  ;;  %5518 = vmatmul.mubr.bf16.gmra.mrb[168].mxu1 %v11679_v7  ;;  %10012 = vmatpush3.bf16.msra.mxu0 %v11023_v29  ;;  %v11029_v29 = vld [vmem:[#allocation6 + $0xb70] sm:$0xff]  }
 0x1e7   : > { %v9461_v26 = vadd.f32 %v9460_v59, %v9459_v44  ;;  %v9500_v8 = vpop.f32.mrb[65].mxu1  ;;  %v9462_v10 = vpop.f32.mrb[66].mxu0  ;;  %5460 = vmatprep.mubr.bf16.mxu0 %v11688_v19  ;;  %10052 = vmatpush3.bf16.msra.mxu1 %v11024_v12 }
 0x1e8   : > { %v9501_v2 = vadd.f32 %v9500_v8, %v9499_v30  ;;  %v9502_v33 = vpop.f32.mrb[66].mxu1  ;;  %v9463_v48 = vpop.f32.mrb[67].mxu0  ;;  %5525 = vmatprep.mubr.bf16.mxu1 %v11693_v22  ;;  %10013 = vmatprep.subr.bf16.mxu0 %v11025_v40 }
 0x1e9   : > { %v9464_v44 = vadd.f32 %v9463_v48, %v9462_v10  ;;  %v9503_v51 = vpop.f32.mrb[67].mxu1  ;;  %10053 = vmatprep.subr.bf16.mxu1 %v11026_v11  ;;  %v11032_v10 = vld [vmem:[#allocation6 + $0xbb0] sm:$0xff]   ;;  %v11033_v48 = vld [vmem:[#allocation6 + $0xb78] sm:$0xff]  }
 0x1ea   : > { %v12090_v57 = vadd.f32 %v9501_v2, %v9461_v26  ;;  %v9504_v30 = vadd.f32 %v9503_v51, %v9502_v33  ;;  %10014 = vmatpush3.bf16.msra.mxu0 %v11027_v3  ;;  %v11030_v26 = vld [vmem:[#allocation6 + $0xbf0] sm:$0xff]   ;;  %v11034_v51 = vld [vmem:[#allocation6 + $0xbf8] sm:$0xff]  }
 0x1eb   : > { %10054 = vmatpush3.bf16.msra.mxu1 %v11028_v28  ;;  %10015 = vmatprep.subr.bf16.mxu0 %v11029_v29  ;;  %v11031_v2 = vld [vmem:[#allocation6 + $0xb30] sm:$0xff]  }
 0x1ec   : > { %v12093_v24 = vadd.f32 %v9504_v30, %v9464_v44  ;;  %10055 = vmatprep.subr.bf16.mxu1 %v11030_v26  ;;  %v11035_v30 = vld [vmem:[#allocation6 + $0xb38] sm:$0xff]  }
 0x1ed   : > { %v9465_v59 = vpop.f32.mrb[68].mxu0  ;;  %5461 = vmatmul.mubr.bf16.gmra.mrb[172].mxu0 %v11691_v21  ;;  %v11036_v26 = vld [vmem:[#allocation6 + $0xbb8] sm:$0xff]  }
 0x1ee   : > { %v9505_v8 = vpop.f32.mrb[68].mxu1  ;;  %v9466_v12 = vpop.f32.mrb[69].mxu0  ;;  %5526 = vmatmul.mubr.bf16.gmra.mrb[172].mxu1 %v11695_v23  ;;  %10016 = vmatpush3.bf16.msra.mxu0 %v11031_v2 }
 0x1ef   : > { %v9467_v40 = vadd.f32 %v9466_v12, %v9465_v59  ;;  %v9506_v0 = vpop.f32.mrb[69].mxu1  ;;  %v9468_v11 = vpop.f32.mrb[70].mxu0  ;;  %5566 = vmatprep.mubr.bf16.mxu0 %v11703_v34  ;;  %10056 = vmatpush3.bf16.msra.mxu1 %v11032_v10  ;;  %v11037_v12 = vld [vmem:[#allocation6 + $0xc40] sm:$0xff]  }
 0x1f0   : > { %v9507_v33 = vadd.f32 %v9506_v0, %v9505_v8  ;;  %v9508_v3 = vpop.f32.mrb[70].mxu1  ;;  %v9469_v28 = vpop.f32.mrb[71].mxu0  ;;  %5631 = vmatprep.mubr.bf16.mxu1 %v11709_v42  ;;  %10017 = vmatprep.subr.bf16.mxu0 %v11033_v48 }
 0x1f1   : > { %v9470_v59 = vadd.f32 %v9469_v28, %v9468_v11  ;;  %v9509_v29 = vpop.f32.mrb[71].mxu1  ;;  %10057 = vmatprep.subr.bf16.mxu1 %v11034_v51  ;;  %v11040_v11 = vld [vmem:[#allocation6 + $0xc80] sm:$0xff]  }
 0x1f2   : > { %v12098_v44 = vadd.f32 %v9507_v33, %v9467_v40  ;;  %v9510_v0 = vadd.f32 %v9509_v29, %v9508_v3  ;;  %10018 = vmatpush3.bf16.msra.mxu0 %v11035_v30  ;;  %v11038_v40 = vld [vmem:[#allocation6 + $0xcc0] sm:$0xff]   ;;  %v11041_v3 = vld [vmem:[#allocation6 + $0xc48] sm:$0xff]  }
 0x1f3   : > { %10058 = vmatpush3.bf16.msra.mxu1 %v11036_v26  ;;  %10083 = vmatprep.subr.bf16.mxu0 %v11037_v12  ;;  %v11039_v33 = vld [vmem:[#allocation6 + $0xc00] sm:$0xff]   ;;  %v11043_v26 = vld [vmem:[#allocation6 + $0xc08] sm:$0xff]  }
 0x1f4   : > { %v12101_v52 = vadd.f32 %v9510_v0, %v9470_v59  ;;  %10123 = vmatprep.subr.bf16.mxu1 %v11038_v40  ;;  %v11042_v59 = vld [vmem:[#allocation6 + $0xcc8] sm:$0xff]   ;;  %v11045_v40 = vld [vmem:[#allocation6 + $0xc50] sm:$0xff]  }
 0x1f5   : > { %v9471_v8 = vpop.f32.mrb[72].mxu0  ;;  %5567 = vmatmul.mubr.bf16.vlgmr.msra.gmra.mrb[176].mxu0 %v11707_v41 }
 0x1f6   : > { %v9511_v2 = vpop.f32.mrb[72].mxu1  ;;  %v9472_v10 = vpop.f32.mrb[73].mxu0  ;;  %5632 = vmatmul.mubr.bf16.vlgmr.msra.gmra.mrb[176].mxu1 %v11711_v43  ;;  %10084 = vmatpush3.bf16.msra.mxu0 %v11039_v33  ;;  %v11046_v33 = vld [vmem:[#allocation6 + $0xcd0] sm:$0xff]  }
 0x1f7   : > { %v9473_v34 = vadd.f32 %v9472_v10, %v9471_v8  ;;  %v9512_v42 = vpop.f32.mrb[73].mxu1  ;;  %v9474_v51 = vpop.f32.mrb[74].mxu0  ;;  %10124 = vmatpush3.bf16.msra.mxu1 %v11040_v11  ;;  %5574 = vmatprep.mubr.bf16.mxu0 %v11721_v60 }
 0x1f8   : > { %v9513_v48 = vadd.f32 %v9512_v42, %v9511_v2  ;;  %v9514_v28 = vpop.f32.mrb[74].mxu1  ;;  %v9475_v29 = vpop.f32.mrb[75].mxu0  ;;  %10085 = vmatprep.subr.bf16.mxu0 %v11041_v3  ;;  %5639 = vmatprep.mubr.bf16.mxu1 %v11723_v61  ;;  %v11044_v42 = vld [vmem:[#allocation6 + $0xc88] sm:$0xff]  }
 0x1f9   : > { %v9476_v0 = vadd.f32 %v9475_v29, %v9474_v51  ;;  %v9515_v8 = vpop.f32.mrb[75].mxu1  ;;  %10125 = vmatprep.subr.bf16.mxu1 %v11042_v59  ;;  %v11048_v51 = vld [vmem:[#allocation6 + $0xc90] sm:$0xff]  }
 0x1fa   : > { %v12105_v30 = vadd.f32 %v9513_v48, %v9473_v34  ;;  %v9516_v12 = vadd.f32 %v9515_v8, %v9514_v28  ;;  %10086 = vmatpush3.bf16.msra.mxu0 %v11043_v26  ;;  %v11047_v48 = vld [vmem:[#allocation6 + $0xc10] sm:$0xff]   ;;  %v11049_v28 = vld [vmem:[#allocation6 + $0xc58] sm:$0xff]  }
 0x1fb   : > { %10126 = vmatpush3.bf16.msra.mxu1 %v11044_v42  ;;  %10087 = vmatprep.subr.bf16.mxu0 %v11045_v40  ;;  %v11050_v8 = vld [vmem:[#allocation6 + $0xcd8] sm:$0xff]  }
 0x1fc   : > { %v12109_v34 = vadd.f32 %v9516_v12, %v9476_v0  ;;  %10127 = vmatprep.subr.bf16.mxu1 %v11046_v33  ;;  %v11051_v12 = vld [vmem:[#allocation6 + $0xc18] sm:$0xff]  }
 0x1fd   : > { %v9477_v2 = vpop.f32.mrb[76].mxu0  ;;  %5575 = vmatmul.mubr.bf16.gmra.mrb[180].mxu0 %v11725_v62 }
 0x1fe   : > { %v9517_v10 = vpop.f32.mrb[76].mxu1  ;;  %v9478_v11 = vpop.f32.mrb[77].mxu0  ;;  %5640 = vmatmul.mubr.bf16.gmra.mrb[180].mxu1 %v11727_v63  ;;  %10088 = vmatpush3.bf16.msra.mxu0 %v11047_v48 }
 0x1ff   : > { %v9479_v3 = vadd.f32 %v9478_v11, %v9477_v2  ;;  %v9518_v60 = vpop.f32.mrb[77].mxu1  ;;  %v9480_v29 = vpop.f32.mrb[78].mxu0  ;;  %10128 = vmatpush3.bf16.msra.mxu1 %v11048_v51  ;;  %5582 = vmatprep.mubr.bf16.mxu0 %v11736_v15  ;;  %v11053_v11 = vld [vmem:[#allocation6 + $0xc60] sm:$0xff]  }
 0x200   : > { %v9519_v59 = vadd.f32 %v9518_v60, %v9517_v10  ;;  %v9520_v26 = vpop.f32.mrb[78].mxu1  ;;  %v9481_v42 = vpop.f32.mrb[79].mxu0  ;;  %10089 = vmatprep.subr.bf16.mxu0 %v11049_v28  ;;  %5647 = vmatprep.mubr.bf16.mxu1 %v11741_v18  ;;  %v11052_v60 = vld [vmem:[#allocation6 + $0xc98] sm:$0xff]   ;;  %v11054_v51 = vld [vmem:[#allocation6 + $0xce0] sm:$0xff]  }
 0x201   : > { %v9482_v2 = vadd.f32 %v9481_v42, %v9480_v29  ;;  %v9521_v40 = vpop.f32.mrb[79].mxu1  ;;  %10129 = vmatprep.subr.bf16.mxu1 %v11050_v8  ;;  %v11055_v15 = vld [vmem:[#allocation6 + $0xc20] sm:$0xff]  }
 0x202   : > { %v12113_v0 = vadd.f32 %v9519_v59, %v9479_v3  ;;  %v9522_v10 = vadd.f32 %v9521_v40, %v9520_v26  ;;  %10090 = vmatpush3.bf16.msra.mxu0 %v11051_v12  ;;  %v11056_v29 = vld [vmem:[#allocation6 + $0xca0] sm:$0xff]   ;;  %v11057_v12 = vld [vmem:[#allocation6 + $0xc68] sm:$0xff]  }
 0x203   : > { %10130 = vmatpush3.bf16.msra.mxu1 %v11052_v60  ;;  %10091 = vmatprep.subr.bf16.mxu0 %v11053_v11  ;;  %v11058_v40 = vld [vmem:[#allocation6 + $0xce8] sm:$0xff]  }
 0x204   : > { %v12117_v3 = vadd.f32 %v9522_v10, %v9482_v2  ;;  %10131 = vmatprep.subr.bf16.mxu1 %v11054_v51 }
 0x205   : > { %v9539_v33 = vpop.f32.mrb[80].mxu0  ;;  %5583 = vmatmul.mubr.bf16.gmra.mrb[184].mxu0 %v11739_v17 }
 0x206   : > { %v9579_v48 = vpop.f32.mrb[80].mxu1  ;;  %v9540_v59 = vpop.f32.mrb[81].mxu0  ;;  %5648 = vmatmul.mubr.bf16.gmra.mrb[184].mxu1 %v11743_v20  ;;  %10092 = vmatpush3.bf16.msra.mxu0 %v11055_v15  ;;  %v11060_v15 = vld [vmem:[#allocation6 + $0xca8] sm:$0xff]  }
 0x207   : > { %v9541_v28 = vadd.f32 %v9540_v59, %v9539_v33  ;;  %v9580_v63 = vpop.f32.mrb[81].mxu1  ;;  %v9542_v42 = vpop.f32.mrb[82].mxu0  ;;  %10132 = vmatpush3.bf16.msra.mxu1 %v11056_v29  ;;  %5590 = vmatprep.mubr.bf16.mxu0 %v11751_v36  ;;  %v11059_v33 = vld [vmem:[#allocation6 + $0xc28] sm:$0xff]   ;;  %v11062_v29 = vld [vmem:[#allocation6 + $0xcf0] sm:$0xff]  }
 0x208   : > { %v9581_v8 = vadd.f32 %v9580_v63, %v9579_v48  ;;  %v9582_v2 = vpop.f32.mrb[82].mxu1  ;;  %v9543_v60 = vpop.f32.mrb[83].mxu0  ;;  %10093 = vmatprep.subr.bf16.mxu0 %v11057_v12  ;;  %5655 = vmatprep.mubr.bf16.mxu1 %v11757_v46 }
 0x209   : > { %v2850_v26 = vadd.f32 %v9541_v28, %v12090_v57  ;;  %v9544_v63 = vadd.f32 %v9543_v60, %v9542_v42  ;;  %v9583_v11 = vpop.f32.mrb[83].mxu1  ;;  %10133 = vmatprep.subr.bf16.mxu1 %v11058_v40  ;;  %v11061_v28 = vld [vmem:[#allocation6 + $0xc70] sm:$0xff]   ;;  %v2151_v60 = vld [vmem:[#allocation2 + $0x8] sm:$0xff] }
 0x20a   : > { %v9584_v57 = vadd.f32 %v9583_v11, %v9582_v2  ;;  %10094 = vmatpush3.bf16.msra.mxu0 %v11059_v33  ;;  %v11064_v40 = vld [vmem:[#allocation6 + $0xcb0] sm:$0xff]  }
 0x20b   : > { %v2915_v10 = vadd.f32 %v9581_v8, %v2850_v26  ;;  %v2853_v59 = vadd.f32 %v9544_v63, %v12093_v24  ;;  %10134 = vmatpush3.bf16.msra.mxu1 %v11060_v15  ;;  %10095 = vmatprep.subr.bf16.mxu0 %v11061_v28  ;;  %v11063_v26 = vld [vmem:[#allocation6 + $0xc30] sm:$0xff]   ;;  %v11065_v63 = vld [vmem:[#allocation6 + $0xc78] sm:$0xff]  }
 0x20c   : > { %10135 = vmatprep.subr.bf16.mxu1 %v11062_v29  ;;  %v11066_v28 = vld [vmem:[#allocation6 + $0xcf8] sm:$0xff]  }
 0x20d   : > { %v9545_v48 = vpop.f32.mrb[84].mxu0  ;;  %v3086_v51 = vrot.slane %v2915_v10, 1  ;;  %v2918_v42 = vadd.f32 %v9584_v57, %v2853_v59  ;;  %5591 = vmatmul.mubr.bf16.gmra.mrb[188].mxu0 %v11755_v45  ;;  %v2158_v57 = vadd.f32 %v2151_v60, %v12041_v16 }
 0x20e   : > { %v9585_v8 = vpop.f32.mrb[84].mxu1  ;;  %v9546_v12 = vpop.f32.mrb[85].mxu0  ;;  %5656 = vmatmul.mubr.bf16.gmra.mrb[188].mxu1 %v11759_v47  ;;  %10096 = vmatpush3.bf16.msra.mxu0 %v11063_v26 }
 0x20f   : > { %v9547_v46 = vadd.f32 %v9546_v12, %v9545_v48  ;;  %v9586_v2 = vpop.f32.mrb[85].mxu1  ;;  %v3087_v11 = vrot.slane %v2918_v42, 1  ;;  %v9548_v10 = vpop.f32.mrb[86].mxu0  ;;  %10136 = vmatpush3.bf16.msra.mxu1 %v11064_v40  ;;  %6398 = vmatprep.mubr.bf16.mxu0 %v11640_v35  ;;  %v11067_v42 = vld [vmem:[#allocation6 + $0xc38] sm:$0xff]  }
 0x210   : > { %v9587_v24 = vadd.f32 %v9586_v2, %v9585_v8  ;;  %v9588_v15 = vpop.f32.mrb[86].mxu1  ;;  %v9549_v48 = vpop.f32.mrb[87].mxu0  ;;  %6463 = vmatprep.mubr.bf16.mxu1 %v11645_v38  ;;  %10097 = vmatprep.subr.bf16.mxu0 %v11065_v63  ;;  %v11068_v12 = vld [vmem:[#allocation6 + $0xcb8] sm:$0xff]   ;;  %v11070_v63 = vld [vmem:[#allocation6 + $0xdc0] sm:$0xff]  }
 0x211   : > { %v2858_v33 = vadd.f32 %v9547_v46, %v12098_v44  ;;  %v3088_v59 = vsel %vm3085_vm3, %v3086_v51, %v3087_v11  ;;  %v9550_v26 = vadd.f32 %v9549_v48, %v9548_v10  ;;  %v2152_v46 = vld [vmem:[#allocation2 + $0x10] sm:$0xff]  ;;  %10137 = vmatprep.subr.bf16.mxu1 %v11066_v28  ;;  %v9589_v40 = vpop.f32.mrb[87].mxu1  ;;  %v11071_v48 = vld [vmem:[#allocation6 + $0xd00] sm:$0xff]  }
 0x212   : > { %v3108_v29 = vsel %vm3049_vm4, %v3088_v59, 0.0  ;;  %10098 = vmatpush3.bf16.msra.mxu0 %v11067_v42  ;;  %v9590_v2 = vadd.f32 %v9589_v40, %v9588_v15  ;;  %v2159_v59 = vadd.f32 %v2152_v46, %v12045_v14  ;;  %v2153_v42 = vld [vmem:[#allocation2 + $0x18] sm:$0xff]  ;;  %v11072_v15 = vld [vmem:[#allocation6 + $0xd80] sm:$0xff]   ;;  %v11073_v40 = vld [vmem:[#allocation6 + $0xd48] sm:$0xff]  }
 0x213   : > { %v2923_v8 = vadd.f32 %v9587_v24, %v2858_v33  ;;  %v3122_v44 = vadd.f32 %v3108_v29, %v2158_v57  ;;  %v2861_v60 = vadd.f32 %v9550_v26, %v12101_v52  ;;  %v11069_v24 = vld [vmem:[#allocation6 + $0xd40] sm:$0xff]   ;;  %10138 = vmatpush3.bf16.msra.mxu1 %v11068_v12  ;;  %v2976_v12 = vand.u32 7, %v12078_v32 }
 0x214   : > { %10163 = vmatprep.subr.bf16.mxu0 %v11069_v24  ;;  %10203 = vmatprep.subr.bf16.mxu1 %v11070_v63  ;;  %v11075_v63 = vld [vmem:[#allocation6 + $0xd08] sm:$0xff]  }
 0x215   : > { %v3089_v51 = vrot.slane %v2923_v8, 1  ;;  %v9551_v10 = vpop.f32.mrb[88].mxu0  ;;  %3129 = vst [vmem:[#allocation2 + $0x8] sm:$0xff] %v3122_v44  ;;  %v2926_v28 = vadd.f32 %v9590_v2, %v2861_v60  ;;  %6399 = vmatmul.mubr.bf16.vlgmr.msra.gmra.mrb[192].mxu0 %v11643_v37  ;;  %v2160_v60 = vadd.f32 %v2153_v42, %v12053_v27  ;;  %v3038_v24 = vadd.s32 1, %v2976_v12 }
 0x216   : > { %v9591_v33 = vpop.f32.mrb[88].mxu1  ;;  %v9552_v57 = vpop.f32.mrb[89].mxu0  ;;  %6464 = vmatmul.mubr.bf16.vlgmr.msra.gmra.mrb[192].mxu1 %v11647_v39  ;;  %10164 = vmatpush3.bf16.msra.mxu0 %v11071_v48 }
 0x217   : > { %v3090_v13 = vsel %vm3085_vm3, %v3087_v11, %v3089_v51  ;;  %v9553_v29 = vadd.f32 %v9552_v57, %v9551_v10  ;;  %v9592_v8 = vpop.f32.mrb[89].mxu1  ;;  %v3091_v11 = vrot.slane %v2926_v28, 1  ;;  %10204 = vmatpush3.bf16.msra.mxu1 %v11072_v15  ;;  %v9554_v16 = vpop.f32.mrb[90].mxu0  ;;  %6406 = vmatprep.mubr.bf16.mxu0 %v11655_v50  ;;  %v11074_v10 = vld [vmem:[#allocation6 + $0xdc8] sm:$0xff]   ;;  %vm3045_vm11 = vcmp.ge.s32.totalorder %v3038_v24, 0 }
 0x218   : > { %v3109_v52 = vsel %vm12143_vm9, %v3090_v13, 0.0  ;;  %v9593_v26 = vadd.f32 %v9592_v8, %v9591_v33  ;;  %v9594_v33 = vpop.f32.mrb[90].mxu1  ;;  %6471 = vmatprep.mubr.bf16.mxu1 %v11661_v54  ;;  %10165 = vmatprep.subr.bf16.mxu0 %v11073_v40  ;;  %v11076_v57 = vld [vmem:[#allocation6 + $0xd88] sm:$0xff]   ;;  %vm3052_vm12 = vcmp.lt.s32.totalorder %v3038_v24, 8  ;;  %v11078_v40 = vld [vmem:[#allocation6 + $0xdd0] sm:$0xff]  }
 0x219   : > { %v3123_v44 = vadd.f32 %v3109_v52, %v2159_v59  ;;  %v2866_v46 = vadd.f32 %v9553_v29, %v12105_v30  ;;  %v3092_v1 = vsel %vm3085_vm3, %v3089_v51, %v3091_v11  ;;  %v2154_v30 = vld [vmem:[#allocation2 + $0x20] sm:$0xff]  ;;  %10205 = vmatprep.subr.bf16.mxu1 %v11074_v10  ;;  %v9555_v51 = vpop.f32.mrb[91].mxu0  ;;  %vm12173_vm13 = vmand %vm3045_vm11, %vm3052_vm12  ;;  %v9595_v48 = vpop.f32.mrb[91].mxu1  ;;  %v12748_v29 = vld [vmem:[#allocation23_spill] sm:$0xff] }
 0x21a   : > { %v3110_v32 = vsel %vm12157_vm10, %v3092_v1, 0.0  ;;  %10166 = vmatpush3.bf16.msra.mxu0 %v11075_v63  ;;  %v9556_v28 = vadd.f32 %v9555_v51, %v9554_v16  ;;  %v2948_v8 = vadd.s32 8, %v12748_v29  ;;  %v2161_v42 = vadd.f32 %v2154_v30, %v12060_v49  ;;  %v11079_v16 = vld [vmem:[#allocation6 + $0xd10] sm:$0xff]   ;;  %v12749_v10 = vld [vmem:[#allocation24_spill] sm:$0xff] }
 0x21b   : > { %3130 = vst [vmem:[#allocation2 + $0x10] sm:$0xff] %v3123_v44  ;;  %v12167_v2 = vadd.f32 %v9593_v26, %v2866_v46  ;;  %v3124_v59 = vadd.f32 %v3110_v32, %v2160_v60  ;;  %10206 = vmatpush3.bf16.msra.mxu1 %v11076_v57  ;;  %v9596_v15 = vadd.f32 %v9595_v48, %v9594_v33  ;;  %v11077_v26 = vld [vmem:[#allocation6 + $0xd50] sm:$0xff]   ;;  %v2949_v33 = vadd.s32 8, %v12749_v10  ;;  %v11081_v63 = vld [vmem:[#allocation6 + $0xd58] sm:$0xff]  }
 0x21c   : > { %v2869_v46 = vadd.f32 %v9556_v28, %v12109_v34  ;;  %v2983_v12 = vand.u32 7, %v2948_v8  ;;  %10167 = vmatprep.subr.bf16.mxu0 %v11077_v26  ;;  %10207 = vmatprep.subr.bf16.mxu1 %v11078_v40  ;;  %v2155_v34 = vld [vmem:[#allocation2 + $0x28] sm:$0xff]  ;;  %v11082_v57 = vld [vmem:[#allocation6 + $0xdd8] sm:$0xff]  }
 0x21d   : > { %v3093_v27 = vrot.slane %v12167_v2, 1  ;;  %3131 = vst [vmem:[#allocation2 + $0x18] sm:$0xff] %v3124_v59  ;;  %v9557_v44 = vpop.f32.mrb[92].mxu0  ;;  %6407 = vmatmul.mubr.bf16.gmra.mrb[196].mxu0 %v11659_v53  ;;  %v2990_v8 = vand.u32 7, %v2949_v33  ;;  %v11083_v26 = vld [vmem:[#allocation6 + $0xd18] sm:$0xff]  }
 0x21e   : > { %6472 = vmatmul.mubr.bf16.gmra.mrb[196].mxu1 %v11663_v55  ;;  %v2934_v49 = vadd.f32 %v9596_v15, %v2869_v46  ;;  %v3039_v1 = vadd.s32 1, %v2983_v12  ;;  %10168 = vmatpush3.bf16.msra.mxu0 %v11079_v16  ;;  %v9597_v2 = vpop.f32.mrb[92].mxu1  ;;  %v9558_v24 = vpop.f32.mrb[93].mxu0  ;;  %v11084_v40 = vld [vmem:[#allocation6 + $0xd98] sm:$0xff]  }
 0x21f   : > { %v3094_v52 = vsel %vm3085_vm3, %v3091_v11, %v3093_v27  ;;  %v11080_v11 = vld [vmem:[#allocation6 + $0xd90] sm:$0xff]   ;;  %v9559_v30 = vadd.f32 %v9558_v24, %v9557_v44  ;;  %v9598_v32 = vpop.f32.mrb[93].mxu1  ;;  %6414 = vmatprep.mubr.bf16.mxu0 %v11673_v4  ;;  %6479 = vmatprep.mubr.bf16.mxu1 %v11675_v5  ;;  %v9560_v13 = vpop.f32.mrb[94].mxu0  ;;  %v3040_v12 = vadd.s32 1, %v2990_v8  ;;  %v11086_v24 = vld [vmem:[#allocation6 + $0xde0] sm:$0xff]  }
 0x220   : > { %v3111_v14 = vsel %vm12173_vm13, %v3094_v52, 0.0  ;;  %vm3046_vm14 = vcmp.ge.s32.totalorder %v3039_v1, 0  ;;  %vm3053_vm15 = vcmp.lt.s32.totalorder %v3039_v1, 8  ;;  %v3095_v59 = vrot.slane %v2934_v49, 1  ;;  %10208 = vmatpush3.bf16.msra.mxu1 %v11080_v11  ;;  %10169 = vmatprep.subr.bf16.mxu0 %v11081_v63  ;;  %v9561_v44 = vpop.f32.mrb[95].mxu0  ;;  %v2156_v49 = vld [vmem:[#allocation2 + $0x30] sm:$0xff] }
 0x221   : > { %v3125_v60 = vadd.f32 %v3111_v14, %v2161_v42  ;;  %v9599_v51 = vadd.f32 %v9598_v32, %v9597_v2  ;;  %vm12188_vm0 = vmand %vm3046_vm14, %vm3053_vm15  ;;  %v2874_v48 = vadd.f32 %v9559_v30, %v12113_v0  ;;  %10209 = vmatprep.subr.bf16.mxu1 %v11082_v57  ;;  %v9600_v42 = vpop.f32.mrb[94].mxu1  ;;  %v2162_v52 = vadd.f32 %v2155_v34, %v12068_v58  ;;  %v11085_v2 = vld [vmem:[#allocation6 + $0xd60] sm:$0xff]  }
 0x222   : > { %v3096_v15 = vsel %vm3085_vm3, %v3093_v27, %v3095_v59  ;;  %v9562_v16 = vadd.f32 %v9561_v44, %v9560_v13  ;;  %10170 = vmatpush3.bf16.msra.mxu0 %v11083_v26  ;;  %v2950_v11 = vadd.s32 8, %v11949_v56  ;;  %vm3047_vm1 = vcmp.ge.s32.totalorder %v3040_v12, 0  ;;  %v2157_v13 = vld [vmem:[#allocation2 + $0x38] sm:$0xff]  ;;  %v11088_v8 = vld [vmem:[#allocation6 + $0xda0] sm:$0xff]   ;;  %v11089_v44 = vld [vmem:[#allocation6 + $0xd68] sm:$0xff]  }
 0x223   : > { %3132 = vst [vmem:[#allocation2 + $0x20] sm:$0xff] %v3125_v60  ;;  %v3112_v14 = vsel %vm12188_vm0, %v3096_v15, 0.0  ;;  %v2939_v46 = vadd.f32 %v9599_v51, %v2874_v48  ;;  %v9601_v60 = vpop.f32.mrb[95].mxu1  ;;  %vm3054_vm2 = vcmp.lt.s32.totalorder %v3040_v12, 8  ;;  %10171 = vmatprep.subr.bf16.mxu0 %v11085_v2  ;;  %v2163_v30 = vadd.f32 %v2156_v49, %v12073_v25 }
 0x224   : > { %v3126_v1 = vadd.f32 %v3112_v14, %v2162_v52  ;;  %v9602_v0 = vadd.f32 %v9601_v60, %v9600_v42  ;;  %10210 = vmatpush3.bf16.msra.mxu1 %v11084_v40  ;;  %v2877_v27 = vadd.f32 %v9562_v16, %v12117_v3  ;;  %vm12200_vm5 = vmand %vm3047_vm1, %vm3054_vm2  ;;  %v2997_v63 = vand.u32 7, %v2950_v11  ;;  %v11087_v3 = vld [vmem:[#allocation6 + $0xd20] sm:$0xff]   ;;  %v11090_v14 = vld [vmem:[#allocation6 + $0xde8] sm:$0xff]  }
 0x225   : > { %v3097_v58 = vrot.slane %v2939_v46, 1  ;;  %6415 = vmatmul.mubr.bf16.gmra.mrb[200].mxu0 %v11677_v6  ;;  %v9619_v34 = vpop.f32.mrb[96].mxu0  ;;  %10211 = vmatprep.subr.bf16.mxu1 %v11086_v24  ;;  %v2164_v46 = vadd.f32 %v2157_v13, %v12083_v9  ;;  %v11092_v11 = vld [vmem:[#allocation6 + $0xda8] sm:$0xff]   ;;  %v11093_v24 = vld [vmem:[#allocation6 + $0xd70] sm:$0xff]  }
 0x226   : > { %3133 = vst [vmem:[#allocation2 + $0x28] sm:$0xff] %v3126_v1  ;;  %6480 = vmatmul.mubr.bf16.gmra.mrb[200].mxu1 %v11679_v7  ;;  %v2942_v57 = vadd.f32 %v9602_v0, %v2877_v27  ;;  %v9659_v51 = vpop.f32.mrb[96].mxu1  ;;  %6422 = vmatprep.mubr.bf16.mxu0 %v11688_v19  ;;  %v3041_v48 = vadd.s32 1, %v2997_v63  ;;  %v9620_v42 = vpop.f32.mrb[97].mxu0  ;;  %v11091_v1 = vld [vmem:[#allocation6 + $0xd28] sm:$0xff]  }
 0x227   : > { %v3098_v32 = vsel %vm3085_vm3, %v3095_v59, %v3097_v58  ;;  %6487 = vmatprep.mubr.bf16.mxu1 %v11693_v22  ;;  %10172 = vmatpush3.bf16.msra.mxu0 %v11087_v3  ;;  %v9621_v25 = vadd.f32 %v9620_v42, %v9619_v34  ;;  %v9660_v59 = vpop.f32.mrb[97].mxu1  ;;  %v9622_v40 = vpop.f32.mrb[98].mxu0  ;;  %v12755_v3 = vld [vmem:[#allocation14_spill] sm:$0xff] }
 0x228   : > { %v3113_v28 = vsel %vm12200_vm5, %v3098_v32, 0.0  ;;  %v3099_v15 = vrot.slane %v2942_v57, 1  ;;  %vm3048_vm6 = vcmp.ge.s32.totalorder %v3041_v48, 0  ;;  %vm3055_vm7 = vcmp.lt.s32.totalorder %v3041_v48, 8  ;;  %10212 = vmatpush3.bf16.msra.mxu1 %v11088_v8  ;;  %v9662_v16 = vpop.f32.mrb[98].mxu1  ;;  %10173 = vmatprep.subr.bf16.mxu0 %v11089_v44  ;;  %v9623_v2 = vpop.f32.mrb[99].mxu0 }
 0x229   : > { %v3127_v52 = vadd.f32 %v3113_v28, %v2163_v30  ;;  %v9661_v26 = vadd.f32 %v9660_v59, %v9659_v51  ;;  %vm3062_vm8 = vmand %vm3048_vm6, %vm3055_vm7  ;;  %10213 = vmatprep.subr.bf16.mxu1 %v11090_v14  ;;  %v9663_v27 = vpop.f32.mrb[99].mxu1  ;;  %v9624_v9 = vadd.f32 %v9623_v2, %v9622_v40  ;;  %v11095_v30 = vld [vmem:[#allocation6 + $0xd30] sm:$0xff]   ;;  %v12754_v57 = vld [vmem:[#allocation13_spill] sm:$0xff] }
 0x22a   : > { %v3100_v12 = vsel %vm3085_vm3, %v3097_v58, %v3099_v15  ;;  %v9664_v33 = vadd.f32 %v9663_v27, %v9662_v16  ;;  %v11094_v58 = vld [vmem:[#allocation6 + $0xdf0] sm:$0xff]   ;;  %v11097_v48 = vld [vmem:[#allocation6 + $0xd78] sm:$0xff]   ;;  %v11104_v27 = vld [vmem:[#allocation6 + $0xe80] sm:$0xff]  }
 0x22b   : > { %3134 = vst [vmem:[#allocation2 + $0x30] sm:$0xff] %v3127_v52  ;;  %v3114_v60 = vsel %vm3062_vm8, %v3100_v12, 0.0  ;;  %v12213_v49 = vadd.f32 %v9661_v26, %v9621_v25  ;;  %10174 = vmatpush3.bf16.msra.mxu0 %v11091_v1  ;;  %v11096_v51 = vld [vmem:[#allocation6 + $0xdb0] sm:$0xff]   ;;  %v11098_v52 = vld [vmem:[#allocation6 + $0xdf8] sm:$0xff]   ;;  %v11101_v12 = vld [vmem:[#allocation6 + $0xe40] sm:$0xff]  }
 0x22c   : > { %v3128_v0 = vadd.f32 %v3114_v60, %v2164_v46  ;;  %10214 = vmatpush3.bf16.msra.mxu1 %v11092_v11  ;;  %10175 = vmatprep.subr.bf16.mxu0 %v11093_v24  ;;  %v12217_v34 = vadd.f32 %v9664_v33, %v9624_v9  ;;  %v11099_v59 = vld [vmem:[#allocation6 + $0xd38] sm:$0xff]   ;;  %v11102_v60 = vld [vmem:[#allocation6 + $0xec0] sm:$0xff]   ;;  %v11105_v33 = vld [vmem:[#allocation6 + $0xe48] sm:$0xff]  }
 0x22d   : > { %6423 = vmatmul.mubr.bf16.gmra.mrb[204].mxu0 %v11691_v21  ;;  %v9625_v63 = vpop.f32.mrb[100].mxu0  ;;  %10215 = vmatprep.subr.bf16.mxu1 %v11094_v58  ;;  %v11100_v44 = vld [vmem:[#allocation6 + $0xdb8] sm:$0xff]   ;;  %v11103_v11 = vld [vmem:[#allocation6 + $0xe00] sm:$0xff]  }
 0x22e   : > { %6488 = vmatmul.mubr.bf16.gmra.mrb[204].mxu1 %v11695_v23  ;;  %3135 = vst [vmem:[#allocation2 + $0x38] sm:$0xff] %v3128_v0  ;;  %v9665_v32 = vpop.f32.mrb[100].mxu1  ;;  %6528 = vmatprep.mubr.bf16.mxu0 %v12754_v57  ;;  %v9626_v13 = vpop.f32.mrb[101].mxu0 }
 0x22f   : > { %6593 = vmatprep.mubr.bf16.mxu1 %v12755_v3  ;;  %v9666_v28 = vpop.f32.mrb[101].mxu1  ;;  %10176 = vmatpush3.bf16.msra.mxu0 %v11095_v30  ;;  %v9627_v8 = vadd.f32 %v9626_v13, %v9625_v63  ;;  %v9628_v15 = vpop.f32.mrb[102].mxu0  ;;  %v11106_v30 = vld [vmem:[#allocation6 + $0xec8] sm:$0xff]  }
 0x230   : > { %v9667_v42 = vadd.f32 %v9666_v28, %v9665_v32  ;;  %10216 = vmatpush3.bf16.msra.mxu1 %v11096_v51  ;;  %10177 = vmatprep.subr.bf16.mxu0 %v11097_v48  ;;  %v9668_v25 = vpop.f32.mrb[102].mxu1  ;;  %v9629_v14 = vpop.f32.mrb[103].mxu0  ;;  %v11107_v13 = vld [vmem:[#allocation6 + $0xe08] sm:$0xff]   ;;  %v12756_v48 = vld [vmem:[#allocation15_spill] sm:$0xff] }
 0x231   : > { %10217 = vmatprep.subr.bf16.mxu1 %v11098_v52  ;;  %v9669_v46 = vpop.f32.mrb[103].mxu1  ;;  %v9630_v40 = vadd.f32 %v9629_v14, %v9628_v15  ;;  %v11109_v15 = vld [vmem:[#allocation6 + $0xe50] sm:$0xff]  }
 0x232   : > { %v12221_v26 = vadd.f32 %v9667_v42, %v9627_v8  ;;  %v9670_v16 = vadd.f32 %v9669_v46, %v9668_v25  ;;  %v11108_v8 = vld [vmem:[#allocation6 + $0xe88] sm:$0xff]  }
 0x233   : > { %10178 = vmatpush3.bf16.msra.mxu0 %v11099_v59 }
 0x234   : > { %10218 = vmatpush3.bf16.msra.mxu1 %v11100_v44  ;;  %10243 = vmatprep.subr.bf16.mxu0 %v11101_v12  ;;  %v12223_v0 = vadd.f32 %v9670_v16, %v9630_v40  ;;  %v11110_v44 = vld [vmem:[#allocation6 + $0xed0] sm:$0xff]  }
 0x235   : > { %v9631_v1 = vpop.f32.mrb[104].mxu0  ;;  %10283 = vmatprep.subr.bf16.mxu1 %v11102_v60  ;;  %v11111_v12 = vld [vmem:[#allocation6 + $0xe10] sm:$0xff]  }
 0x236   : > { %v9671_v2 = vpop.f32.mrb[104].mxu1  ;;  %6529 = vmatmul.mubr.bf16.vlgmr.msra.gmra.mrb[208].mxu0 %v11707_v41  ;;  %v9632_v24 = vpop.f32.mrb[105].mxu0  ;;  %v11112_v16 = vld [vmem:[#allocation6 + $0xe90] sm:$0xff]  }
 0x237   : > { %v9672_v9 = vpop.f32.mrb[105].mxu1  ;;  %6594 = vmatmul.mubr.bf16.vlgmr.msra.gmra.mrb[208].mxu1 %v11711_v43  ;;  %10244 = vmatpush3.bf16.msra.mxu0 %v11103_v11  ;;  %v9633_v58 = vadd.f32 %v9632_v24, %v9631_v1  ;;  %v9634_v32 = vpop.f32.mrb[106].mxu0  ;;  %v11113_v11 = vld [vmem:[#allocation6 + $0xe58] sm:$0xff]  }
 0x238   : > { %v9673_v63 = vadd.f32 %v9672_v9, %v9671_v2  ;;  %10284 = vmatpush3.bf16.msra.mxu1 %v11104_v27  ;;  %10245 = vmatprep.subr.bf16.mxu0 %v11105_v33  ;;  %v9674_v51 = vpop.f32.mrb[106].mxu1  ;;  %v9635_v42 = vpop.f32.mrb[107].mxu0  ;;  %v12757_v2 = vld [vmem:[#allocation16_spill] sm:$0xff] }
 0x239   : > { %6536 = vmatprep.mubr.bf16.mxu0 %v12756_v48  ;;  %6601 = vmatprep.mubr.bf16.mxu1 %v11723_v61  ;;  %v9675_v52 = vpop.f32.mrb[107].mxu1  ;;  %v9636_v25 = vadd.f32 %v9635_v42, %v9634_v32  ;;  %v11114_v9 = vld [vmem:[#allocation6 + $0xed8] sm:$0xff]   ;;  %v12758_v32 = vld [vmem:[#allocation17_spill] sm:$0xff] }
 0x23a   : > { %v12227_v28 = vadd.f32 %v9673_v63, %v9633_v58  ;;  %10285 = vmatprep.subr.bf16.mxu1 %v11106_v30  ;;  %v9676_v59 = vadd.f32 %v9675_v52, %v9674_v51  ;;  %v11115_v63 = vld [vmem:[#allocation6 + $0xe18] sm:$0xff]   ;;  %v11117_v42 = vld [vmem:[#allocation6 + $0xe60] sm:$0xff]  }
 0x23b   : > { %10246 = vmatpush3.bf16.msra.mxu0 %v11107_v13  ;;  %v11116_v51 = vld [vmem:[#allocation6 + $0xe98] sm:$0xff]  }
 0x23c   : > { %10286 = vmatpush3.bf16.msra.mxu1 %v11108_v8  ;;  %10247 = vmatprep.subr.bf16.mxu0 %v11109_v15  ;;  %v12231_v46 = vadd.f32 %v9676_v59, %v9636_v25  ;;  %v11118_v25 = vld [vmem:[#allocation6 + $0xee0] sm:$0xff]  }
 0x23d   : > { %v9637_v14 = vpop.f32.mrb[108].mxu0  ;;  %10287 = vmatprep.subr.bf16.mxu1 %v11110_v44 }
 0x23e   : > { %v9677_v40 = vpop.f32.mrb[108].mxu1  ;;  %6537 = vmatmul.mubr.bf16.gmra.mrb[212].mxu0 %v11725_v62  ;;  %v9638_v60 = vpop.f32.mrb[109].mxu0 }
 0x23f   : > { %v9678_v1 = vpop.f32.mrb[109].mxu1  ;;  %6602 = vmatmul.mubr.bf16.gmra.mrb[212].mxu1 %v12757_v2  ;;  %10248 = vmatpush3.bf16.msra.mxu0 %v11111_v12  ;;  %v9639_v27 = vadd.f32 %v9638_v60, %v9637_v14  ;;  %v9640_v33 = vpop.f32.mrb[110].mxu0  ;;  %v11119_v14 = vld [vmem:[#allocation6 + $0xe20] sm:$0xff]  }
 0x240   : > { %v9679_v24 = vadd.f32 %v9678_v1, %v9677_v40  ;;  %10288 = vmatpush3.bf16.msra.mxu1 %v11112_v16  ;;  %10249 = vmatprep.subr.bf16.mxu0 %v11113_v11  ;;  %v9680_v58 = vpop.f32.mrb[110].mxu1  ;;  %v9641_v13 = vpop.f32.mrb[111].mxu0  ;;  %v11120_v40 = vld [vmem:[#allocation6 + $0xea0] sm:$0xff]   ;;  %v12759_v1 = vld [vmem:[#allocation19_spill] sm:$0xff] }
 0x241   : > { %6544 = vmatprep.mubr.bf16.mxu0 %v12758_v32  ;;  %6609 = vmatprep.mubr.bf16.mxu1 %v11741_v18  ;;  %v9681_v8 = vpop.f32.mrb[111].mxu1  ;;  %v9642_v52 = vadd.f32 %v9641_v13, %v9640_v33  ;;  %v3910_v11 = vadd.s32 1, %v12759_v1 }
 0x242   : > { %v12235_v30 = vadd.f32 %v9679_v24, %v9639_v27  ;;  %10289 = vmatprep.subr.bf16.mxu1 %v11114_v9  ;;  %v9682_v15 = vadd.f32 %v9681_v8, %v9680_v58  ;;  %v11121_v58 = vld [vmem:[#allocation6 + $0xe68] sm:$0xff]  }
 0x243   : > { %10250 = vmatpush3.bf16.msra.mxu0 %v11115_v63  ;;  %v3922_v33 = vand.u32 7, %v3910_v11  ;;  %v12760_v8 = vld [vmem:[#allocation18_spill] sm:$0xff] }
 0x244   : > { %10290 = vmatpush3.bf16.msra.mxu1 %v11116_v51  ;;  %10251 = vmatprep.subr.bf16.mxu0 %v11117_v42  ;;  %v12239_v44 = vadd.f32 %v9682_v15, %v9642_v52  ;;  %v11122_v51 = vld [vmem:[#allocation6 + $0xee8] sm:$0xff]  }
 0x245   : > { %10291 = vmatprep.subr.bf16.mxu1 %v11118_v25  ;;  %v4014_v42 = vadd.s32 4294967295, %v3922_v33  ;;  %v11123_v52 = vld [vmem:[#allocation6 + $0xe28] sm:$0xff]  }
 0x246   : > { %6545 = vmatmul.mubr.bf16.gmra.mrb[216].mxu0 %v11739_v17  ;;  %v4070_v25 = vld [vmem:[#allocation2 + $0x1] sm:$0xff] }
 0x247   : > { %v9699_v59 = vpop.f32.mrb[112].mxu0  ;;  %v9739_v12 = vpop.f32.mrb[112].mxu1  ;;  %6610 = vmatmul.mubr.bf16.gmra.mrb[216].mxu1 %v11743_v20  ;;  %10252 = vmatpush3.bf16.msra.mxu0 %v11119_v14  ;;  %vm4022_vm9 = vcmp.ge.s32.totalorder %v4014_v42, 0  ;;  %v11128_v42 = vld [vmem:[#allocation6 + $0xeb0] sm:$0xff]  }
 0x248   : > { %v9700_v16 = vpop.f32.mrb[113].mxu0  ;;  %v9740_v60 = vpop.f32.mrb[113].mxu1  ;;  %10292 = vmatpush3.bf16.msra.mxu1 %v11120_v40  ;;  %6552 = vmatprep.mubr.bf16.mxu0 %v11751_v36  ;;  %v12761_v40 = vld [vmem:[#allocation20_spill] sm:$0xff] }
 0x249   : > { %v9701_v27 = vadd.f32 %v9700_v16, %v9699_v59  ;;  %v9741_v24 = vadd.f32 %v9740_v60, %v9739_v12  ;;  %v9702_v9 = vpop.f32.mrb[114].mxu0  ;;  %v9742_v13 = vpop.f32.mrb[114].mxu1  ;;  %6617 = vmatprep.mubr.bf16.mxu1 %v12760_v8  ;;  %10253 = vmatprep.subr.bf16.mxu0 %v11121_v58  ;;  %v11124_v59 = vld [vmem:[#allocation6 + $0xea8] sm:$0xff]   ;;  %v3911_v16 = vadd.s32 1, %v12761_v40  ;;  %v11125_v60 = vld [vmem:[#allocation6 + $0xe70] sm:$0xff]   ;;  %v11132_v40 = vld [vmem:[#allocation6 + $0xeb8] sm:$0xff]  }
 0x24a   : > { %10293 = vmatprep.subr.bf16.mxu1 %v11122_v51  ;;  %v9703_v14 = vpop.f32.mrb[115].mxu0  ;;  %v9743_v12 = vpop.f32.mrb[115].mxu1  ;;  %v11127_v58 = vld [vmem:[#allocation6 + $0xe30] sm:$0xff]  }
 0x24b   : > { %v3814_v63 = vadd.f32 %v9701_v27, %v12213_v49  ;;  %10254 = vmatpush3.bf16.msra.mxu0 %v11123_v52  ;;  %v9704_v11 = vadd.f32 %v9703_v14, %v9702_v9  ;;  %v9744_v49 = vadd.f32 %v9743_v12, %v9742_v13  ;;  %v11126_v27 = vld [vmem:[#allocation6 + $0xef0] sm:$0xff]   ;;  %v3929_v8 = vand.u32 7, %v3911_v16 }
 0x24c   : > { %10294 = vmatpush3.bf16.msra.mxu1 %v11124_v59  ;;  %10255 = vmatprep.subr.bf16.mxu0 %v11125_v60  ;;  %v11129_v59 = vld [vmem:[#allocation6 + $0xe78] sm:$0xff]  }
 0x24d   : > { %v3879_v15 = vadd.f32 %v9741_v24, %v3814_v63  ;;  %v3817_v24 = vadd.f32 %v9704_v11, %v12217_v34  ;;  %10295 = vmatprep.subr.bf16.mxu1 %v11126_v27  ;;  %v4015_v51 = vadd.s32 4294967295, %v3929_v8  ;;  %v4071_v34 = vld [vmem:[#allocation2 + $0x9] sm:$0xff] }
 0x24e   : > { %6553 = vmatmul.mubr.bf16.gmra.mrb[220].mxu0 %v11755_v45 }
 0x24f   : > { %v4062_v31 = vsel %vm4022_vm9, %v3879_v15, 0.0  ;;  %v9705_v63 = vpop.f32.mrb[116].mxu0  ;;  %6618 = vmatmul.mubr.bf16.gmra.mrb[220].mxu1 %v11759_v47  ;;  %7272 = vmatprep.mubr.bf16.mxu0 %v11640_v35  ;;  %v3882_v9 = vadd.f32 %v9744_v49, %v3817_v24  ;;  %v9745_v13 = vpop.f32.mrb[116].mxu1  ;;  %v12762_v15 = vld [vmem:[#allocation21_spill] sm:$0xff]  ;;  %vm4023_vm10 = vcmp.ge.s32.totalorder %v4015_v51, 0  ;;  %vm4031_vm11 = vcmp.lt.s32.totalorder %v4015_v51, 8 }
 0x250   : > { %v4078_v33 = vadd.f32 %v4070_v25, %v4062_v31  ;;  %10256 = vmatpush3.bf16.msra.mxu0 %v11127_v58  ;;  %v9706_v52 = vpop.f32.mrb[117].mxu0  ;;  %v3912_v31 = vadd.s32 1, %v12762_v15  ;;  %7336 = vmatprep.mubr.bf16.mxu1 %v11645_v38  ;;  %v9746_v8 = vpop.f32.mrb[117].mxu1  ;;  %vm4039_vm12 = vmand %vm4023_vm10, %vm4031_vm11  ;;  %v11130_v49 = vld [vmem:[#allocation6 + $0xef8] sm:$0xff]  }
 0x251   : > { %10296 = vmatpush3.bf16.msra.mxu1 %v11128_v42  ;;  %v9707_v25 = vadd.f32 %v9706_v52, %v9705_v63  ;;  %v9747_v14 = vadd.f32 %v9746_v8, %v9745_v13  ;;  %v9708_v16 = vpop.f32.mrb[118].mxu0  ;;  %v4063_v60 = vsel %vm4039_vm12, %v3882_v9, 0.0  ;;  %10257 = vmatprep.subr.bf16.mxu0 %v11129_v59  ;;  %v9748_v27 = vpop.f32.mrb[118].mxu1  ;;  %v12763_v52 = vld [vmem:[#allocation22_spill] sm:$0xff] }
 0x252   : > { %4086 = vst [vmem:[#allocation2 + $0x1] sm:$0xff] %v4078_v33  ;;  %v3936_v12 = vand.u32 7, %v3912_v31  ;;  %v11131_v33 = vld [vmem:[#allocation6 + $0xe38] sm:$0xff]   ;;  %v4079_v24 = vadd.f32 %v4071_v34, %v4063_v60  ;;  %10297 = vmatprep.subr.bf16.mxu1 %v11130_v49  ;;  %v9709_v63 = vpop.f32.mrb[119].mxu0  ;;  %v9749_v42 = vpop.f32.mrb[119].mxu1  ;;  %v3913_v15 = vadd.s32 1, %v12763_v52 }
 0x253   : > { %v3822_v11 = vadd.f32 %v9707_v25, %v12221_v26  ;;  %v4072_v9 = vld [vmem:[#allocation2 + $0x11] sm:$0xff]  ;;  %v9710_v26 = vadd.f32 %v9709_v63, %v9708_v16  ;;  %v9750_v13 = vadd.f32 %v9749_v42, %v9748_v27  ;;  %v11133_v25 = vld [vmem:[#allocation6 + $0xf40] sm:$0xff]  }
 0x254   : > { %v4016_v58 = vadd.s32 4294967295, %v3936_v12  ;;  %10258 = vmatpush3.bf16.msra.mxu0 %v11131_v33  ;;  %4087 = vst [vmem:[#allocation2 + $0x9] sm:$0xff] %v4079_v24  ;;  %v3943_v31 = vand.u32 7, %v3913_v15  ;;  %v11134_v12 = vld [vmem:[#allocation6 + $0xfc0] sm:$0xff]   ;;  %v3914_v33 = vadd.s32 1, %v12748_v29 }
 0x255   : > { %v3887_v51 = vadd.f32 %v9747_v14, %v3822_v11  ;;  %10298 = vmatpush3.bf16.msra.mxu1 %v11132_v40  ;;  %v3825_v14 = vadd.f32 %v9710_v26, %v12223_v0  ;;  %10323 = vmatprep.subr.bf16.mxu0 %v11133_v25  ;;  %v11135_v49 = vld [vmem:[#allocation6 + $0xf00] sm:$0xff]   ;;  %v11139_v25 = vld [vmem:[#allocation6 + $0xf08] sm:$0xff]  }
 0x256   : > { %vm4024_vm13 = vcmp.ge.s32.totalorder %v4016_v58, 0  ;;  %vm4032_vm14 = vcmp.lt.s32.totalorder %v4016_v58, 8  ;;  %v4017_v11 = vadd.s32 4294967295, %v3943_v31  ;;  %10363 = vmatprep.subr.bf16.mxu1 %v11134_v12  ;;  %v11136_v16 = vld [vmem:[#allocation6 + $0xf80] sm:$0xff]   ;;  %v3950_v63 = vand.u32 7, %v3914_v33  ;;  %v11140_v12 = vld [vmem:[#allocation6 + $0xf88] sm:$0xff]  }
 0x257   : > { %vm4040_vm15 = vmand %vm4024_vm13, %vm4032_vm14  ;;  %v9711_v34 = vpop.f32.mrb[120].mxu0  ;;  %v9751_v8 = vpop.f32.mrb[120].mxu1  ;;  %7273 = vmatmul.mubr.bf16.vlgmr.msra.gmra.mrb[224].mxu0 %v11643_v37  ;;  %v3890_v40 = vadd.f32 %v9750_v13, %v3825_v14  ;;  %v4073_v0 = vld [vmem:[#allocation2 + $0x19] sm:$0xff]  ;;  %v11138_v13 = vld [vmem:[#allocation6 + $0xfc8] sm:$0xff]  }
 0x258   : > { %v4064_v59 = vsel %vm4040_vm15, %v3887_v51, 0.0  ;;  %7337 = vmatmul.mubr.bf16.vlgmr.msra.gmra.mrb[224].mxu1 %v11647_v39  ;;  %v9712_v27 = vpop.f32.mrb[121].mxu0  ;;  %v9752_v15 = vpop.f32.mrb[121].mxu1  ;;  %7279 = vmatprep.mubr.bf16.mxu0 %v11655_v50  ;;  %vm4025_vm0 = vcmp.ge.s32.totalorder %v4017_v11, 0  ;;  %vm4033_vm1 = vcmp.lt.s32.totalorder %v4017_v11, 8  ;;  %v11137_v51 = vld [vmem:[#allocation6 + $0xf48] sm:$0xff]  }
 0x259   : > { %v4080_v60 = vadd.f32 %v4072_v9, %v4064_v59  ;;  %10324 = vmatpush3.bf16.msra.mxu0 %v11135_v49  ;;  %v9713_v24 = vadd.f32 %v9712_v27, %v9711_v34  ;;  %v9753_v58 = vadd.f32 %v9752_v15, %v9751_v8  ;;  %7343 = vmatprep.mubr.bf16.mxu1 %v11661_v54  ;;  %vm4041_vm2 = vmand %vm4025_vm0, %vm4033_vm1  ;;  %v9714_v42 = vpop.f32.mrb[122].mxu0  ;;  %v9754_v31 = vpop.f32.mrb[122].mxu1  ;;  %v4018_v14 = vadd.s32 4294967295, %v3950_v63  ;;  %v4074_v11 = vld [vmem:[#allocation2 + $0x21] sm:$0xff] }
 0x25a   : > { %10364 = vmatpush3.bf16.msra.mxu1 %v11136_v16  ;;  %v4065_v9 = vsel %vm4041_vm2, %v3890_v40, 0.0  ;;  %10325 = vmatprep.subr.bf16.mxu0 %v11137_v51  ;;  %v9715_v34 = vpop.f32.mrb[123].mxu0  ;;  %v9755_v8 = vpop.f32.mrb[123].mxu1  ;;  %v3915_v16 = vadd.s32 1, %v12749_v10  ;;  %v11143_v51 = vld [vmem:[#allocation6 + $0xf10] sm:$0xff]  }
 0x25b   : > { %4088 = vst [vmem:[#allocation2 + $0x11] sm:$0xff] %v4080_v60  ;;  %v3830_v26 = vadd.f32 %v9713_v24, %v12227_v28  ;;  %v4081_v59 = vadd.f32 %v4073_v0, %v4065_v9  ;;  %10365 = vmatprep.subr.bf16.mxu1 %v11138_v13  ;;  %vm4026_vm5 = vcmp.ge.s32.totalorder %v4018_v14, 0  ;;  %vm4034_vm6 = vcmp.lt.s32.totalorder %v4018_v14, 8  ;;  %v11141_v28 = vld [vmem:[#allocation6 + $0xf50] sm:$0xff]  }
 0x25c   : > { %v9716_v49 = vadd.f32 %v9715_v34, %v9714_v42  ;;  %v9756_v40 = vadd.f32 %v9755_v8, %v9754_v31  ;;  %vm4042_vm7 = vmand %vm4026_vm5, %vm4034_vm6  ;;  %v11142_v0 = vld [vmem:[#allocation6 + $0xfd0] sm:$0xff]   ;;  %v3916_v13 = vadd.s32 1, %v11949_v56 }
 0x25d   : > { %v3895_v60 = vadd.f32 %v9753_v58, %v3830_v26  ;;  %10326 = vmatpush3.bf16.msra.mxu0 %v11139_v25  ;;  %4089 = vst [vmem:[#allocation2 + $0x19] sm:$0xff] %v4081_v59  ;;  %v3957_v58 = vand.u32 7, %v3915_v16  ;;  %v11144_v42 = vld [vmem:[#allocation6 + $0xf90] sm:$0xff]  }
 0x25e   : > { %10366 = vmatpush3.bf16.msra.mxu1 %v11140_v12  ;;  %v3833_v33 = vadd.f32 %v9716_v49, %v12231_v46  ;;  %10327 = vmatprep.subr.bf16.mxu0 %v11141_v28  ;;  %v11145_v46 = vld [vmem:[#allocation6 + $0xf58] sm:$0xff]   ;;  %v3964_v12 = vand.u32 7, %v3916_v13  ;;  %v4075_v34 = vld [vmem:[#allocation2 + $0x29] sm:$0xff] }
 0x25f   : > { %7280 = vmatmul.mubr.bf16.gmra.mrb[228].mxu0 %v11659_v53  ;;  %v9717_v27 = vpop.f32.mrb[124].mxu0  ;;  %v4066_v15 = vsel %vm4042_vm7, %v3895_v60, 0.0  ;;  %10367 = vmatprep.subr.bf16.mxu1 %v11142_v0  ;;  %v9757_v9 = vpop.f32.mrb[124].mxu1  ;;  %v4019_v31 = vadd.s32 4294967295, %v3957_v58  ;;  %v11146_v60 = vld [vmem:[#allocation6 + $0xfd8] sm:$0xff]   ;;  %v12275_v58 = vadd.s32 56, %v12759_v1 }
 0x260   : > { %7344 = vmatmul.mubr.bf16.gmra.mrb[228].mxu1 %v11663_v55  ;;  %7287 = vmatprep.mubr.bf16.mxu0 %v11673_v4  ;;  %v4082_v24 = vadd.f32 %v4074_v11, %v4066_v15  ;;  %v3898_v63 = vadd.f32 %v9756_v40, %v3833_v33  ;;  %v9718_v26 = vpop.f32.mrb[125].mxu0  ;;  %v9758_v59 = vpop.f32.mrb[125].mxu1  ;;  %v4020_v40 = vadd.s32 4294967295, %v3964_v12  ;;  %v11147_v15 = vld [vmem:[#allocation6 + $0xf18] sm:$0xff]  }
 0x261   : > { %7351 = vmatprep.mubr.bf16.mxu1 %v11675_v5  ;;  %10328 = vmatpush3.bf16.msra.mxu0 %v11143_v51  ;;  %v9719_v25 = vadd.f32 %v9718_v26, %v9717_v27  ;;  %v9759_v14 = vadd.f32 %v9758_v59, %v9757_v9  ;;  %vm4027_vm8 = vcmp.ge.s32.totalorder %v4019_v31, 0  ;;  %vm4035_vm9 = vcmp.lt.s32.totalorder %v4019_v31, 8  ;;  %v9720_v11 = vpop.f32.mrb[126].mxu0  ;;  %v9760_v49 = vpop.f32.mrb[126].mxu1  ;;  %12764 = vst [vmem:[#allocation23_spill] sm:$0xff] %v12275_v58  ;;  %v11149_v51 = vld [vmem:[#allocation6 + $0xf60] sm:$0xff]  }
 0x262   : > { %4090 = vst [vmem:[#allocation2 + $0x21] sm:$0xff] %v4082_v24  ;;  %10368 = vmatpush3.bf16.msra.mxu1 %v11144_v42  ;;  %10329 = vmatprep.subr.bf16.mxu0 %v11145_v46  ;;  %vm4043_vm10 = vmand %vm4027_vm8, %vm4035_vm9  ;;  %v9721_v28 = vpop.f32.mrb[127].mxu0  ;;  %vm4028_vm11 = vcmp.ge.s32.totalorder %v4020_v40, 0  ;;  %vm4036_vm12 = vcmp.lt.s32.totalorder %v4020_v40, 8  ;;  %v9761_v24 = vpop.f32.mrb[127].mxu1 }
 0x263   : > { %v3838_v8 = vadd.f32 %v9719_v25, %v12235_v30  ;;  %10369 = vmatprep.subr.bf16.mxu1 %v11146_v60  ;;  %v4067_v16 = vsel %vm4043_vm10, %v3898_v63, 0.0  ;;  %v9722_v33 = vadd.f32 %v9721_v28, %v9720_v11  ;;  %v11148_v30 = vld [vmem:[#allocation6 + $0xf98] sm:$0xff]   ;;  %vm4044_vm13 = vmand %vm4028_vm11, %vm4036_vm12  ;;  %v9762_v9 = vadd.f32 %v9761_v24, %v9760_v49  ;;  %v11152_v11 = vld [vmem:[#allocation6 + $0xfa0] sm:$0xff]  }
 0x264   : > { %v4083_v0 = vadd.f32 %v4075_v34, %v4067_v16  ;;  %v4076_v63 = vld [vmem:[#allocation2 + $0x31] sm:$0xff]  ;;  %v3917_v25 = vadd.s32 1, %v12275_v58  ;;  %v11151_v34 = vld [vmem:[#allocation6 + $0xf20] sm:$0xff]   ;;  %v11153_v28 = vld [vmem:[#allocation6 + $0xf68] sm:$0xff]   ;;  %vm6676_vm10 = vcmask 1040384  }
 0x265   : > { %v3903_v27 = vadd.f32 %v9759_v14, %v3838_v8  ;;  %10330 = vmatpush3.bf16.msra.mxu0 %v11147_v15  ;;  %v3841_v42 = vadd.f32 %v9722_v33, %v12239_v44  ;;  %v11150_v14 = vld [vmem:[#allocation6 + $0xfe0] sm:$0xff]   ;;  %v11154_v16 = vld [vmem:[#allocation6 + $0xfe8] sm:$0xff]  }
 0x266   : > { %4091 = vst [vmem:[#allocation2 + $0x29] sm:$0xff] %v4083_v0  ;;  %10370 = vmatpush3.bf16.msra.mxu1 %v11148_v30  ;;  %10331 = vmatprep.subr.bf16.mxu0 %v11149_v51  ;;  %v3971_v60 = vand.u32 7, %v3917_v25  ;;  %v11155_v33 = vld [vmem:[#allocation6 + $0xf28] sm:$0xff]   ;;  %v4077_v0 = vld [vmem:[#allocation2 + $0x39] sm:$0x7f] }
 0x267   : > { %7288 = vmatmul.mubr.bf16.gmra.mrb[232].mxu0 %v11677_v6  ;;  %v9779_v26 = vpop.f32.mrb[128].mxu0  ;;  %v4068_v31 = vsel %vm4044_vm13, %v3903_v27, 0.0  ;;  %v3906_v46 = vadd.f32 %v9762_v9, %v3841_v42  ;;  %10371 = vmatprep.subr.bf16.mxu1 %v11150_v14  ;;  %v11156_v42 = vld [vmem:[#allocation6 + $0xfa8] sm:$0xff]   ;;  %v11158_v14 = vld [vmem:[#allocation6 + $0xff0] sm:$0xff]  }
 0x268   : > { %7352 = vmatmul.mubr.bf16.gmra.mrb[232].mxu1 %v11679_v7  ;;  %7295 = vmatprep.mubr.bf16.mxu0 %v11688_v19  ;;  %v9819_v13 = vpop.f32.mrb[128].mxu1  ;;  %v4084_v59 = vadd.f32 %v4076_v63, %v4068_v31  ;;  %v9780_v12 = vpop.f32.mrb[129].mxu0  ;;  %v4021_v49 = vadd.s32 4294967295, %v3971_v60  ;;  %v11157_v31 = vld [vmem:[#allocation6 + $0xf70] sm:$0xff]  }
 0x269   : > { %7359 = vmatprep.mubr.bf16.mxu1 %v11693_v22  ;;  %v9781_v8 = vadd.f32 %v9780_v12, %v9779_v26  ;;  %v9820_v44 = vpop.f32.mrb[129].mxu1  ;;  %10332 = vmatpush3.bf16.msra.mxu0 %v11151_v34  ;;  %v9782_v27 = vpop.f32.mrb[130].mxu0  ;;  %v11159_v60 = vld [vmem:[#allocation6 + $0xf30] sm:$0xff]  }
 0x26a   : > { %4092 = vst [vmem:[#allocation2 + $0x31] sm:$0xff] %v4084_v59  ;;  %v9821_v40 = vadd.f32 %v9820_v44, %v9819_v13  ;;  %10372 = vmatpush3.bf16.msra.mxu1 %v11152_v11  ;;  %v9822_v15 = vpop.f32.mrb[130].mxu1  ;;  %vm4029_vm14 = vcmp.ge.s32.totalorder %v4021_v49, 0  ;;  %vm4037_vm15 = vcmp.lt.s32.totalorder %v4021_v49, 8  ;;  %10333 = vmatprep.subr.bf16.mxu0 %v11153_v28  ;;  %v9783_v24 = vpop.f32.mrb[131].mxu0  ;;  %v11161_v49 = vld [vmem:[#allocation6 + $0xf78] sm:$0xff]  }
 0x26b   : > { %vm4045_vm0 = vmand %vm4029_vm14, %vm4037_vm15  ;;  %10373 = vmatprep.subr.bf16.mxu1 %v11154_v16  ;;  %v9823_v51 = vpop.f32.mrb[131].mxu1  ;;  %v9784_v9 = vadd.f32 %v9783_v24, %v9782_v27  ;;  %v11162_v28 = vld [vmem:[#allocation6 + $0xff8] sm:$0xff]  }
 0x26c   : > { %v12281_v30 = vadd.f32 %v9821_v40, %v9781_v8  ;;  %v4069_v63 = vsel %vm4045_vm0, %v3906_v46, 0.0  ;;  %v9824_v26 = vadd.f32 %v9823_v51, %v9822_v15  ;;  %v11160_v46 = vld [vmem:[#allocation6 + $0xfb0] sm:$0xff]   ;;  %v11163_v15 = vld [vmem:[#allocation6 + $0xf38] sm:$0xff]  }
 0x26d   : > { %10334 = vmatpush3.bf16.msra.mxu0 %v11155_v33  ;;  %v4085_v13 = vadd.f32 %v4077_v0, %v4069_v63  ;;  %v11164_v0 = vld [vmem:[#allocation6 + $0xfb8] sm:$0xff]  }
 0x26e   : > { %10374 = vmatpush3.bf16.msra.mxu1 %v11156_v42  ;;  %v12286_v59 = vadd.f32 %v9824_v26, %v9784_v9  ;;  %10335 = vmatprep.subr.bf16.mxu0 %v11157_v31  ;;  %v11165_v42 = vld [vmem:[#allocation6 + $0x1040] sm:$0xff]  }
 0x26f   : > { %7296 = vmatmul.mubr.bf16.gmra.mrb[236].mxu0 %v11691_v21  ;;  %v9785_v25 = vpop.f32.mrb[132].mxu0  ;;  %4093 = vst [vmem:[#allocation2 + $0x39] sm:$0x7f] %v4085_v13  ;;  %10375 = vmatprep.subr.bf16.mxu1 %v11158_v14  ;;  %v11166_v26 = vld [vmem:[#allocation6 + $0x10c0] sm:$0xff]  }
 0x270   : > { %7360 = vmatmul.mubr.bf16.gmra.mrb[236].mxu1 %v11695_v23  ;;  %7400 = vmatprep.mubr.bf16.mxu0 %v12754_v57  ;;  %v9825_v12 = vpop.f32.mrb[132].mxu1  ;;  %v9786_v34 = vpop.f32.mrb[133].mxu0 }
 0x271   : > { %7464 = vmatprep.mubr.bf16.mxu1 %v12755_v3  ;;  %v9787_v8 = vadd.f32 %v9786_v34, %v9785_v25  ;;  %v9826_v11 = vpop.f32.mrb[133].mxu1  ;;  %10336 = vmatpush3.bf16.msra.mxu0 %v11159_v60  ;;  %v9788_v40 = vpop.f32.mrb[134].mxu0  ;;  %v11167_v25 = vld [vmem:[#allocation6 + $0x1000] sm:$0xff]  }
 0x272   : > { %v9827_v44 = vadd.f32 %v9826_v11, %v9825_v12  ;;  %10376 = vmatpush3.bf16.msra.mxu1 %v11160_v46  ;;  %v9828_v16 = vpop.f32.mrb[134].mxu1  ;;  %10337 = vmatprep.subr.bf16.mxu0 %v11161_v49  ;;  %v9789_v33 = vpop.f32.mrb[135].mxu0  ;;  %v11168_v12 = vld [vmem:[#allocation6 + $0x1080] sm:$0xff]  }
 0x273   : > { %10377 = vmatprep.subr.bf16.mxu1 %v11162_v28  ;;  %v9790_v24 = vadd.f32 %v9789_v33, %v9788_v40  ;;  %v9829_v51 = vpop.f32.mrb[135].mxu1  ;;  %v11171_v28 = vld [vmem:[#allocation6 + $0x1008] sm:$0xff]  }
 0x274   : > { %v12288_v27 = vadd.f32 %v9827_v44, %v9787_v8  ;;  %v9830_v63 = vadd.f32 %v9829_v51, %v9828_v16  ;;  %v11169_v8 = vld [vmem:[#allocation6 + $0x1048] sm:$0xff]   ;;  %v11173_v51 = vld [vmem:[#allocation6 + $0x1050] sm:$0xff]  }
 0x275   : > { %10338 = vmatpush3.bf16.msra.mxu0 %v11163_v15  ;;  %v11170_v44 = vld [vmem:[#allocation6 + $0x10c8] sm:$0xff]  }
 0x276   : > { %10378 = vmatpush3.bf16.msra.mxu1 %v11164_v0  ;;  %v12290_v31 = vadd.f32 %v9830_v63, %v9790_v24  ;;  %10403 = vmatprep.subr.bf16.mxu0 %v11165_v42  ;;  %v11172_v15 = vld [vmem:[#allocation6 + $0x1088] sm:$0xff]   ;;  %v11174_v42 = vld [vmem:[#allocation6 + $0x10d0] sm:$0xff]  }
 0x277   : > { %v9791_v9 = vpop.f32.mrb[136].mxu0  ;;  %10443 = vmatprep.subr.bf16.mxu1 %v11166_v26 }
 0x278   : > { %v9831_v13 = vpop.f32.mrb[136].mxu1  ;;  %v9792_v14 = vpop.f32.mrb[137].mxu0  ;;  %7401 = vmatmul.mubr.bf16.vlgmr.msra.gmra.mrb[240].mxu0 %v11707_v41 }
 0x279   : > { %v9793_v60 = vadd.f32 %v9792_v14, %v9791_v9  ;;  %v9832_v34 = vpop.f32.mrb[137].mxu1  ;;  %7465 = vmatmul.mubr.bf16.vlgmr.msra.gmra.mrb[240].mxu1 %v11711_v43  ;;  %10404 = vmatpush3.bf16.msra.mxu0 %v11167_v25  ;;  %v9794_v11 = vpop.f32.mrb[138].mxu0  ;;  %v11176_v14 = vld [vmem:[#allocation6 + $0x1090] sm:$0xff]  }
 0x27a   : > { %v9833_v46 = vadd.f32 %v9832_v34, %v9831_v13  ;;  %10444 = vmatpush3.bf16.msra.mxu1 %v11168_v12  ;;  %v9834_v49 = vpop.f32.mrb[138].mxu1  ;;  %7407 = vmatprep.mubr.bf16.mxu0 %v12756_v48  ;;  %v9795_v16 = vpop.f32.mrb[139].mxu0  ;;  %v11175_v13 = vld [vmem:[#allocation6 + $0x1010] sm:$0xff]  }
 0x27b   : > { %10405 = vmatprep.subr.bf16.mxu0 %v11169_v8  ;;  %7471 = vmatprep.mubr.bf16.mxu1 %v11723_v61  ;;  %v9796_v33 = vadd.f32 %v9795_v16, %v9794_v11  ;;  %v9835_v0 = vpop.f32.mrb[139].mxu1  ;;  %v11178_v11 = vld [vmem:[#allocation6 + $0x10d8] sm:$0xff]  }
 0x27c   : > { %v12295_v40 = vadd.f32 %v9833_v46, %v9793_v60  ;;  %10445 = vmatprep.subr.bf16.mxu1 %v11170_v44  ;;  %v9836_v24 = vadd.f32 %v9835_v0, %v9834_v49  ;;  %v11177_v46 = vld [vmem:[#allocation6 + $0x1058] sm:$0xff]  }
 0x27d   : > { %10406 = vmatpush3.bf16.msra.mxu0 %v11171_v28  ;;  %v11179_v28 = vld [vmem:[#allocation6 + $0x1018] sm:$0xff]  }
 0x27e   : > { %10446 = vmatpush3.bf16.msra.mxu1 %v11172_v15  ;;  %v12298_v26 = vadd.f32 %v9836_v24, %v9796_v33  ;;  %10407 = vmatprep.subr.bf16.mxu0 %v11173_v51  ;;  %v11180_v15 = vld [vmem:[#allocation6 + $0x1098] sm:$0xff]   ;;  %v11181_v51 = vld [vmem:[#allocation6 + $0x1060] sm:$0xff]  }
 0x27f   : > { %v9797_v63 = vpop.f32.mrb[140].mxu0  ;;  %10447 = vmatprep.subr.bf16.mxu1 %v11174_v42  ;;  %v11182_v42 = vld [vmem:[#allocation6 + $0x10e0] sm:$0xff]  }
 0x280   : > { %v9837_v9 = vpop.f32.mrb[140].mxu1  ;;  %v9798_v25 = vpop.f32.mrb[141].mxu0  ;;  %7408 = vmatmul.mubr.bf16.gmra.mrb[244].mxu0 %v11725_v62 }
 0x281   : > { %v9799_v12 = vadd.f32 %v9798_v25, %v9797_v63  ;;  %v9838_v60 = vpop.f32.mrb[141].mxu1  ;;  %7472 = vmatmul.mubr.bf16.gmra.mrb[244].mxu1 %v12757_v2  ;;  %10408 = vmatpush3.bf16.msra.mxu0 %v11175_v13  ;;  %v9800_v8 = vpop.f32.mrb[142].mxu0  ;;  %v11183_v25 = vld [vmem:[#allocation6 + $0x1020] sm:$0xff]  }
 0x282   : > { %v9839_v34 = vadd.f32 %v9838_v60, %v9837_v9  ;;  %10448 = vmatpush3.bf16.msra.mxu1 %v11176_v14  ;;  %v9840_v44 = vpop.f32.mrb[142].mxu1  ;;  %7415 = vmatprep.mubr.bf16.mxu0 %v12758_v32  ;;  %v9801_v16 = vpop.f32.mrb[143].mxu0 }
 0x283   : > { %10409 = vmatprep.subr.bf16.mxu0 %v11177_v46  ;;  %7479 = vmatprep.mubr.bf16.mxu1 %v11741_v18  ;;  %v9802_v33 = vadd.f32 %v9801_v16, %v9800_v8  ;;  %v9841_v0 = vpop.f32.mrb[143].mxu1  ;;  %v11186_v16 = vld [vmem:[#allocation6 + $0x10e8] sm:$0xff]  }
 0x284   : > { %v12303_v49 = vadd.f32 %v9839_v34, %v9799_v12  ;;  %10449 = vmatprep.subr.bf16.mxu1 %v11178_v11  ;;  %v9842_v24 = vadd.f32 %v9841_v0, %v9840_v44  ;;  %v11184_v12 = vld [vmem:[#allocation6 + $0x10a0] sm:$0xff]   ;;  %v11185_v11 = vld [vmem:[#allocation6 + $0x1068] sm:$0xff]  }
 0x285   : > { %10410 = vmatpush3.bf16.msra.mxu0 %v11179_v28 }
 0x286   : > { %10450 = vmatpush3.bf16.msra.mxu1 %v11180_v15  ;;  %v12306_v13 = vadd.f32 %v9842_v24, %v9802_v33  ;;  %10411 = vmatprep.subr.bf16.mxu0 %v11181_v51  ;;  %v11187_v33 = vld [vmem:[#allocation6 + $0x1028] sm:$0xff]  }
 0x287   : > { %10451 = vmatprep.subr.bf16.mxu1 %v11182_v42  ;;  %v12765_v51 = vld [vmem:[#allocation18_spill] sm:$0xff] }
 0x288   : > { %v9859_v63 = vpop.f32.mrb[144].mxu0  ;;  %7416 = vmatmul.mubr.bf16.gmra.mrb[248].mxu0 %v11739_v17  ;;  %v11188_v42 = vld [vmem:[#allocation6 + $0x10a8] sm:$0xff]  }
 0x289   : > { %v9899_v9 = vpop.f32.mrb[144].mxu1  ;;  %v9860_v14 = vpop.f32.mrb[145].mxu0  ;;  %7480 = vmatmul.mubr.bf16.gmra.mrb[248].mxu1 %v11743_v20  ;;  %10412 = vmatpush3.bf16.msra.mxu0 %v11183_v25 }
 0x28a   : > { %v9861_v60 = vadd.f32 %v9860_v14, %v9859_v63  ;;  %v9900_v34 = vpop.f32.mrb[145].mxu1  ;;  %v9862_v46 = vpop.f32.mrb[146].mxu0  ;;  %10452 = vmatpush3.bf16.msra.mxu1 %v11184_v12  ;;  %7423 = vmatprep.mubr.bf16.mxu0 %v11751_v36  ;;  %v11189_v12 = vld [vmem:[#allocation6 + $0x1070] sm:$0xff]  }
 0x28b   : > { %v9901_v8 = vadd.f32 %v9900_v34, %v9899_v9  ;;  %v9902_v44 = vpop.f32.mrb[146].mxu1  ;;  %v9863_v15 = vpop.f32.mrb[147].mxu0  ;;  %10413 = vmatprep.subr.bf16.mxu0 %v11185_v11  ;;  %7487 = vmatprep.mubr.bf16.mxu1 %v12765_v51  ;;  %v11190_v34 = vld [vmem:[#allocation6 + $0x10f0] sm:$0xff]  }
 0x28c   : > { %v4772_v28 = vadd.f32 %v9861_v60, %v12281_v30  ;;  %v9864_v0 = vadd.f32 %v9863_v15, %v9862_v46  ;;  %v9903_v24 = vpop.f32.mrb[147].mxu1  ;;  %10453 = vmatprep.subr.bf16.mxu1 %v11186_v16  ;;  %v11191_v15 = vld [vmem:[#allocation6 + $0x1030] sm:$0xff]  }
 0x28d   : > { %v9904_v9 = vadd.f32 %v9903_v24, %v9902_v44  ;;  %10414 = vmatpush3.bf16.msra.mxu0 %v11187_v33  ;;  %v11192_v44 = vld [vmem:[#allocation6 + $0x10b0] sm:$0xff]   ;;  %v11193_v24 = vld [vmem:[#allocation6 + $0x1078] sm:$0xff]  }
 0x28e   : > { %v12313_v63 = vadd.f32 %v9901_v8, %v4772_v28  ;;  %v4775_v30 = vadd.f32 %v9864_v0, %v12286_v59  ;;  %10454 = vmatpush3.bf16.msra.mxu1 %v11188_v42  ;;  %10415 = vmatprep.subr.bf16.mxu0 %v11189_v12 }
 0x28f   : > { %10455 = vmatprep.subr.bf16.mxu1 %v11190_v34 }
 0x290   : > { %v9865_v25 = vpop.f32.mrb[148].mxu0  ;;  %v12316_v46 = vadd.f32 %v9904_v9, %v4775_v30  ;;  %7424 = vmatmul.mubr.bf16.gmra.mrb[252].mxu0 %v11755_v45 }
 0x291   : > { %v9905_v14 = vpop.f32.mrb[148].mxu1  ;;  %v9866_v60 = vpop.f32.mrb[149].mxu0  ;;  %7488 = vmatmul.mubr.bf16.gmra.mrb[252].mxu1 %v11759_v47  ;;  %10416 = vmatpush3.bf16.msra.mxu0 %v11191_v15 }
 0x292   : > { %v9867_v11 = vadd.f32 %v9866_v60, %v9865_v25  ;;  %v9906_v58 = vpop.f32.mrb[149].mxu1  ;;  %v9868_v28 = vpop.f32.mrb[150].mxu0  ;;  %10456 = vmatpush3.bf16.msra.mxu1 %v11192_v44  ;;  %8062 = vmatprep.mubr.bf16.mxu0 %v11640_v35  ;;  %v11196_v60 = vld [vmem:[#allocation6 + $0x10b8] sm:$0xff]  }
 0x293   : > { %v9907_v8 = vadd.f32 %v9906_v58, %v9905_v14  ;;  %v9908_v33 = vpop.f32.mrb[150].mxu1  ;;  %v9869_v59 = vpop.f32.mrb[151].mxu0  ;;  %v11194_v58 = vld [vmem:[#allocation6 + $0x10f8] sm:$0xff]   ;;  %8126 = vmatprep.mubr.bf16.mxu1 %v11645_v38  ;;  %10417 = vmatprep.subr.bf16.mxu0 %v11193_v24  ;;  %v11200_v24 = vld [vmem:[#allocation6 + $0x1180] sm:$0xff]  }
 0x294   : > { %v4780_v16 = vadd.f32 %v9867_v11, %v12288_v27  ;;  %v9870_v42 = vadd.f32 %v9869_v59, %v9868_v28  ;;  %v9909_v9 = vpop.f32.mrb[151].mxu1  ;;  %v11195_v27 = vld [vmem:[#allocation6 + $0x1038] sm:$0xff]   ;;  %10457 = vmatprep.subr.bf16.mxu1 %v11194_v58 }
 0x295   : > { %v9910_v25 = vadd.f32 %v9909_v9, %v9908_v33  ;;  %10418 = vmatpush3.bf16.msra.mxu0 %v11195_v27  ;;  %v11199_v33 = vld [vmem:[#allocation6 + $0x1100] sm:$0xff]  }
 0x296   : > { %v12321_v0 = vadd.f32 %v9907_v8, %v4780_v16  ;;  %v4783_v30 = vadd.f32 %v9870_v42, %v12290_v31  ;;  %v11197_v8 = vld [vmem:[#allocation6 + $0x1140] sm:$0xff]   ;;  %10458 = vmatpush3.bf16.msra.mxu1 %v11196_v60  ;;  %v11203_v60 = vld [vmem:[#allocation6 + $0x1108] sm:$0xff]  }
 0x297   : > { %v11198_v16 = vld [vmem:[#allocation6 + $0x11c0] sm:$0xff]   ;;  %10483 = vmatprep.subr.bf16.mxu0 %v11197_v8 }
 0x298   : > { %v9871_v14 = vpop.f32.mrb[152].mxu0  ;;  %v12326_v15 = vadd.f32 %v9910_v25, %v4783_v30  ;;  %8063 = vmatmul.mubr.bf16.vlgmr.msra.gmra.mrb[0].mxu0 %v11643_v37  ;;  %10523 = vmatprep.subr.bf16.mxu1 %v11198_v16 }
 0x299   : > { %v9911_v12 = vpop.f32.mrb[152].mxu1  ;;  %v9872_v34 = vpop.f32.mrb[153].mxu0  ;;  %8127 = vmatmul.mubr.bf16.vlgmr.msra.gmra.mrb[0].mxu1 %v11647_v39  ;;  %10484 = vmatpush3.bf16.msra.mxu0 %v11199_v33  ;;  %v11204_v39 = vld [vmem:[#allocation6 + $0x1188] sm:$0xff]  }
 0x29a   : > { %v9912_v11 = vpop.f32.mrb[153].mxu1  ;;  %v9873_v28 = vadd.f32 %v9872_v34, %v9871_v14  ;;  %v9874_v44 = vpop.f32.mrb[154].mxu0  ;;  %v11201_v14 = vld [vmem:[#allocation6 + $0x1148] sm:$0xff]   ;;  %10524 = vmatpush3.bf16.msra.mxu1 %v11200_v24  ;;  %8069 = vmatprep.mubr.bf16.mxu0 %v11655_v50 }
 0x29b   : > { %v9913_v35 = vadd.f32 %v9912_v11, %v9911_v12  ;;  %v9914_v38 = vpop.f32.mrb[154].mxu1  ;;  %v9875_v31 = vpop.f32.mrb[155].mxu0  ;;  %v11202_v12 = vld [vmem:[#allocation6 + $0x11c8] sm:$0xff]   ;;  %10485 = vmatprep.subr.bf16.mxu0 %v11201_v14  ;;  %8133 = vmatprep.mubr.bf16.mxu1 %v11661_v54 }
 0x29c   : > { %v4788_v59 = vadd.f32 %v9873_v28, %v12295_v40  ;;  %v9876_v42 = vadd.f32 %v9875_v31, %v9874_v44  ;;  %v9915_v9 = vpop.f32.mrb[155].mxu1  ;;  %10525 = vmatprep.subr.bf16.mxu1 %v11202_v12  ;;  %v11207_v31 = vld [vmem:[#allocation6 + $0x1110] sm:$0xff]  }
 0x29d   : > { %v9916_v27 = vadd.f32 %v9915_v9, %v9914_v38  ;;  %10486 = vmatpush3.bf16.msra.mxu0 %v11203_v60  ;;  %v11206_v38 = vld [vmem:[#allocation6 + $0x11d0] sm:$0xff]  }
 0x29e   : > { %v12331_v25 = vadd.f32 %v9913_v35, %v4788_v59  ;;  %v4791_v40 = vadd.f32 %v9876_v42, %v12298_v26  ;;  %10526 = vmatpush3.bf16.msra.mxu1 %v11204_v39  ;;  %v11205_v26 = vld [vmem:[#allocation6 + $0x1150] sm:$0xff]  }
 0x29f   : > { %10487 = vmatprep.subr.bf16.mxu0 %v11205_v26  ;;  %10527 = vmatprep.subr.bf16.mxu1 %v11206_v38  ;;  %v11208_v9 = vld [vmem:[#allocation6 + $0x1190] sm:$0xff]  }
 0x2a0   : > { %v9877_v58 = vpop.f32.mrb[156].mxu0  ;;  %v12336_v8 = vadd.f32 %v9916_v27, %v4791_v40  ;;  %8070 = vmatmul.mubr.bf16.gmra.mrb[4].mxu0 %v11659_v53  ;;  %v11209_v27 = vld [vmem:[#allocation6 + $0x1158] sm:$0xff]  }
 0x2a1   : > { %v9917_v30 = vpop.f32.mrb[156].mxu1  ;;  %v9878_v37 = vpop.f32.mrb[157].mxu0  ;;  %8134 = vmatmul.mubr.bf16.gmra.mrb[4].mxu1 %v11663_v55  ;;  %10488 = vmatpush3.bf16.msra.mxu0 %v11207_v31  ;;  %v11210_v53 = vld [vmem:[#allocation6 + $0x11d8] sm:$0xff]  }
 0x2a2   : > { %v9879_v34 = vadd.f32 %v9878_v37, %v9877_v58  ;;  %v9918_v11 = vpop.f32.mrb[157].mxu1  ;;  %v9880_v35 = vpop.f32.mrb[158].mxu0  ;;  %8077 = vmatprep.mubr.bf16.mxu0 %v11673_v4  ;;  %10528 = vmatpush3.bf16.msra.mxu1 %v11208_v9  ;;  %v11211_v55 = vld [vmem:[#allocation6 + $0x1118] sm:$0xff]  }
 0x2a3   : > { %v9919_v28 = vadd.f32 %v9918_v11, %v9917_v30  ;;  %v9920_v16 = vpop.f32.mrb[158].mxu1  ;;  %v9881_v50 = vpop.f32.mrb[159].mxu0  ;;  %8141 = vmatprep.mubr.bf16.mxu1 %v11675_v5  ;;  %10489 = vmatprep.subr.bf16.mxu0 %v11209_v27  ;;  %v4874_v11 = vld [vmem:[#allocation2 + $0x38] sm:$0xff]  ;;  %v11214_v5 = vld [vmem:[#allocation6 + $0x11e0] sm:$0xff]   ;;  %v11218_v27 = vld [vmem:[#allocation6 + $0x11e8] sm:$0xff]  }
 0x2a4   : > { %v4796_v44 = vadd.f32 %v9879_v34, %v12303_v49  ;;  %v9882_v59 = vadd.f32 %v9881_v50, %v9880_v35  ;;  %v9921_v54 = vpop.f32.mrb[159].mxu1  ;;  %10529 = vmatprep.subr.bf16.mxu1 %v11210_v53  ;;  %v11220_v53 = vld [vmem:[#allocation6 + $0x11a8] sm:$0xff]  }
 0x2a5   : > { %v9922_v24 = vadd.f32 %v9921_v54, %v9920_v16  ;;  %10490 = vmatpush3.bf16.msra.mxu0 %v11211_v55 }
 0x2a6   : > { %v12339_v33 = vadd.f32 %v9919_v28, %v4796_v44  ;;  %v4799_v49 = vadd.f32 %v9882_v59, %v12306_v13  ;;  %v11212_v13 = vld [vmem:[#allocation6 + $0x1198] sm:$0xff]   ;;  %v11213_v44 = vld [vmem:[#allocation6 + $0x1160] sm:$0xff]  }
 0x2a7   : > { %10530 = vmatpush3.bf16.msra.mxu1 %v11212_v13  ;;  %10491 = vmatprep.subr.bf16.mxu0 %v11213_v44  ;;  %v11215_v59 = vld [vmem:[#allocation6 + $0x1120] sm:$0xff]  }
 0x2a8   : > { %v9939_v42 = vpop.f32.mrb[160].mxu0  ;;  %v4864_v40 = vadd.f32 %v9922_v24, %v4799_v49  ;;  %8078 = vmatmul.mubr.bf16.gmra.mrb[8].mxu0 %v11677_v6  ;;  %10531 = vmatprep.subr.bf16.mxu1 %v11214_v5  ;;  %v11216_v24 = vld [vmem:[#allocation6 + $0x11a0] sm:$0xff]   ;;  %v11217_v49 = vld [vmem:[#allocation6 + $0x1168] sm:$0xff]   ;;  %v11226_v5 = vld [vmem:[#allocation6 + $0x11f8] sm:$0xff]  }
 0x2a9   : > { %v9979_v58 = vpop.f32.mrb[160].mxu1  ;;  %v9940_v14 = vpop.f32.mrb[161].mxu0  ;;  %8142 = vmatmul.mubr.bf16.gmra.mrb[8].mxu1 %v11679_v7  ;;  %10492 = vmatpush3.bf16.msra.mxu0 %v11215_v59 }
 0x2aa   : > { %v9941_v30 = vadd.f32 %v9940_v14, %v9939_v42  ;;  %v9980_v12 = vpop.f32.mrb[161].mxu1  ;;  %v9942_v60 = vpop.f32.mrb[162].mxu0  ;;  %v4882_v4 = vadd.f32 %v4874_v11, %v4864_v40  ;;  %8085 = vmatprep.mubr.bf16.mxu0 %v11688_v19  ;;  %8149 = vmatprep.mubr.bf16.mxu1 %v11693_v22  ;;  %v11223_v22 = vld [vmem:[#allocation6 + $0x1130] sm:$0xff]  }
 0x2ab   : > { %v9981_v37 = vadd.f32 %v9980_v12, %v9979_v58  ;;  %v9982_v34 = vpop.f32.mrb[162].mxu1  ;;  %v9943_v28 = vpop.f32.mrb[163].mxu0  ;;  %10532 = vmatpush3.bf16.msra.mxu1 %v11216_v24  ;;  %10493 = vmatprep.subr.bf16.mxu0 %v11217_v49 }
 0x2ac   : > { %v9983_v35 = vpop.f32.mrb[163].mxu1  ;;  %v9944_v16 = vadd.f32 %v9943_v28, %v9942_v60  ;;  %4890 = vst [vmem:[#allocation2 + $0x38] sm:$0xff] %v4882_v4  ;;  %10533 = vmatprep.subr.bf16.mxu1 %v11218_v27  ;;  %v11221_v60 = vld [vmem:[#allocation6 + $0x1170] sm:$0xff]  }
 0x2ad   : > { %v12346_v39 = vadd.f32 %v9981_v37, %v9941_v30  ;;  %v9984_v26 = vadd.f32 %v9983_v35, %v9982_v34  ;;  %v11219_v30 = vld [vmem:[#allocation6 + $0x1128] sm:$0xff]   ;;  %v11222_v34 = vld [vmem:[#allocation6 + $0x11f0] sm:$0xff]  }
 0x2ae   : > { %10494 = vmatpush3.bf16.msra.mxu0 %v11219_v30  ;;  %v11224_v35 = vld [vmem:[#allocation6 + $0x11b0] sm:$0xff]  }
 0x2af   : > { %v12349_v54 = vadd.f32 %v9984_v26, %v9944_v16  ;;  %10534 = vmatpush3.bf16.msra.mxu1 %v11220_v53  ;;  %10495 = vmatprep.subr.bf16.mxu0 %v11221_v60  ;;  %v11225_v16 = vld [vmem:[#allocation6 + $0x1178] sm:$0xff]  }
 0x2b0   : > { %v9945_v50 = vpop.f32.mrb[164].mxu0  ;;  %8086 = vmatmul.mubr.bf16.gmra.mrb[12].mxu0 %v11691_v21  ;;  %10535 = vmatprep.subr.bf16.mxu1 %v11222_v34 }
 0x2b1   : > { %v9985_v38 = vpop.f32.mrb[164].mxu1  ;;  %v9946_v31 = vpop.f32.mrb[165].mxu0  ;;  %8150 = vmatmul.mubr.bf16.gmra.mrb[12].mxu1 %v11695_v23  ;;  %8190 = vmatprep.mubr.bf16.mxu0 %v12754_v57 }
 0x2b2   : > { %v9947_v42 = vadd.f32 %v9946_v31, %v9945_v50  ;;  %v9986_v9 = vpop.f32.mrb[165].mxu1  ;;  %v9948_v14 = vpop.f32.mrb[166].mxu0  ;;  %10496 = vmatpush3.bf16.msra.mxu0 %v11223_v22  ;;  %8254 = vmatprep.mubr.bf16.mxu1 %v12755_v3  ;;  %v11228_v31 = vld [vmem:[#allocation6 + $0x11b8] sm:$0xff]  }
 0x2b3   : > { %v9987_v58 = vadd.f32 %v9986_v9, %v9985_v38  ;;  %v9988_v6 = vpop.f32.mrb[166].mxu1  ;;  %v9949_v7 = vpop.f32.mrb[167].mxu0  ;;  %10536 = vmatpush3.bf16.msra.mxu1 %v11224_v35  ;;  %10497 = vmatprep.subr.bf16.mxu0 %v11225_v16  ;;  %v11227_v38 = vld [vmem:[#allocation6 + $0x1138] sm:$0xff]  }
 0x2b4   : > { %v9950_v40 = vadd.f32 %v9949_v7, %v9948_v14  ;;  %v9989_v37 = vpop.f32.mrb[167].mxu1  ;;  %10537 = vmatprep.subr.bf16.mxu1 %v11226_v5 }
 0x2b5   : > { %v12354_v12 = vadd.f32 %v9987_v58, %v9947_v42  ;;  %v9990_v55 = vadd.f32 %v9989_v37, %v9988_v6 }
 0x2b6   : > { %10498 = vmatpush3.bf16.msra.mxu0 %v11227_v38 }
 0x2b7   : > { %v12357_v11 = vadd.f32 %v9990_v55, %v9950_v40  ;;  %10538 = vmatpush3.bf16.msra.mxu1 %v11228_v31 }
 0x2b8   : > { %v9951_v19 = vpop.f32.mrb[168].mxu0 }
 0x2b9   : > { %v9991_v13 = vpop.f32.mrb[168].mxu1  ;;  %v9952_v28 = vpop.f32.mrb[169].mxu0  ;;  %8191 = vmatmul.mubr.bf16.vlgmr.msra.gmra.mrb[16].mxu0 %v11707_v41 }
 0x2ba   : > { %v9953_v4 = vadd.f32 %v9952_v28, %v9951_v19  ;;  %v9992_v44 = vpop.f32.mrb[169].mxu1  ;;  %v9954_v50 = vpop.f32.mrb[170].mxu0  ;;  %8255 = vmatmul.mubr.bf16.vlgmr.msra.gmra.mrb[16].mxu1 %v11711_v43  ;;  %8197 = vmatprep.mubr.bf16.mxu0 %v12756_v48 }
 0x2bb   : > { %v9993_v26 = vadd.f32 %v9992_v44, %v9991_v13  ;;  %v9994_v21 = vpop.f32.mrb[170].mxu1  ;;  %v9955_v23 = vpop.f32.mrb[171].mxu0  ;;  %8261 = vmatprep.mubr.bf16.mxu1 %v11723_v61 }
 0x2bc   : > { %v9956_v24 = vadd.f32 %v9955_v23, %v9954_v50  ;;  %v9995_v42 = vpop.f32.mrb[171].mxu1 }
 0x2bd   : > { %v12362_v59 = vadd.f32 %v9993_v26, %v9953_v4  ;;  %v9996_v9 = vadd.f32 %v9995_v42, %v9994_v21  ;;  %v5668_v4 = vand.u32 7, %v12759_v1  ;;  %v12766_v42 = vld [vmem:[#allocation21_spill] sm:$0xff]  ;;  %v12769_v1 = vld [vmem:[#allocation20_spill] sm:$0xff] }
 0x2bf   : > { %v12364_v27 = vadd.f32 %v9996_v9, %v9956_v24  ;;  %v12379_v38 = vadd.s32 1, %v5668_v4  ;;  %v5675_v9 = vand.u32 7, %v12766_v42 }
 0x2c0   : > { %v9957_v49 = vpop.f32.mrb[172].mxu0 }
 0x2c1   : > { %v9997_v57 = vpop.f32.mrb[172].mxu1  ;;  %v9958_v58 = vpop.f32.mrb[173].mxu0  ;;  %8198 = vmatmul.mubr.bf16.gmra.mrb[20].mxu0 %v11725_v62  ;;  %vm5762_vm1 = vcmp.lt.s32.totalorder %v12379_v38, 8  ;;  %v4867_v62 = vld [vmem:[#allocation2] sm:$0xff] }
 0x2c2   : > { %v9998_v14 = vpop.f32.mrb[173].mxu1  ;;  %v9959_v3 = vadd.f32 %v9958_v58, %v9957_v49  ;;  %v9960_v30 = vpop.f32.mrb[174].mxu0  ;;  %8262 = vmatmul.mubr.bf16.gmra.mrb[20].mxu1 %v12757_v2  ;;  %8205 = vmatprep.mubr.bf16.mxu0 %v12758_v32  ;;  %v4875_v32 = vadd.f32 %v4867_v62, %v12313_v63  ;;  %v5682_v63 = vand.u32 7, %v12763_v52 }
 0x2c3   : > { %v9999_v6 = vadd.f32 %v9998_v14, %v9997_v57  ;;  %v10000_v7 = vpop.f32.mrb[174].mxu1  ;;  %v9961_v53 = vpop.f32.mrb[175].mxu0  ;;  %8269 = vmatprep.mubr.bf16.mxu1 %v11741_v18 }
 0x2c4   : > { %v10001_v40 = vpop.f32.mrb[175].mxu1  ;;  %v9962_v60 = vadd.f32 %v9961_v53, %v9960_v30 }
 0x2c5   : > { %v12369_v37 = vadd.f32 %v9999_v6, %v9959_v3  ;;  %v10002_v55 = vadd.f32 %v10001_v40, %v10000_v7 }
 0x2c7   : > { %v12372_v22 = vadd.f32 %v10002_v55, %v9962_v60 }
 0x2c8   : > { %v10019_v19 = vpop.f32.mrb[176].mxu0 }
 0x2c9   : > { %v10059_v34 = vpop.f32.mrb[176].mxu1  ;;  %v10020_v13 = vpop.f32.mrb[177].mxu0  ;;  %8206 = vmatmul.mubr.bf16.gmra.mrb[24].mxu0 %v11739_v17 }
 0x2ca   : > { %v10021_v28 = vadd.f32 %v10020_v13, %v10019_v19  ;;  %v10060_v35 = vpop.f32.mrb[177].mxu1  ;;  %v10022_v41 = vpop.f32.mrb[178].mxu0  ;;  %v12397_v13 = vadd.s32 1, %v5675_v9  ;;  %8270 = vmatmul.mubr.bf16.gmra.mrb[24].mxu1 %v11743_v20  ;;  %8213 = vmatprep.mubr.bf16.mxu0 %v11751_v36 }
 0x2cb   : > { %v10061_v44 = vadd.f32 %v10060_v35, %v10059_v34  ;;  %v10062_v43 = vpop.f32.mrb[178].mxu1  ;;  %v10023_v16 = vpop.f32.mrb[179].mxu0  ;;  %8277 = vmatprep.mubr.bf16.mxu1 %v12765_v51  ;;  %v12413_v51 = vadd.s32 1, %v5682_v63 }
 0x2cc   : > { %v5569_v48 = vadd.f32 %v10021_v28, %v12346_v39  ;;  %v10024_v26 = vadd.f32 %v10023_v16, %v10022_v41  ;;  %v10063_v50 = vpop.f32.mrb[179].mxu1  ;;  %v5689_v16 = vand.u32 7, %v12748_v29  ;;  %vm5763_vm2 = vcmp.lt.s32.totalorder %v12397_v13, 8 }
 0x2cd   : > { %v10064_v5 = vadd.f32 %v10063_v50, %v10062_v43  ;;  %vm5764_vm5 = vcmp.lt.s32.totalorder %v12413_v51, 8 }
 0x2ce   : > { %v5634_v21 = vadd.f32 %v10061_v44, %v5569_v48  ;;  %v5572_v61 = vadd.f32 %v10024_v26, %v12349_v54  ;;  %v4869_v48 = vld [vmem:[#allocation2 + $0x10] sm:$0xff] }
 0x2d0   : > { %v5637_v23 = vadd.f32 %v10064_v5, %v5572_v61  ;;  %v10025_v31 = vpop.f32.mrb[180].mxu0  ;;  %v5798_v49 = vrot.slane %v5634_v21, 1  ;;  %v4877_v5 = vadd.f32 %v4869_v48, %v12321_v0 }
 0x2d1   : > { %v10065_v39 = vpop.f32.mrb[180].mxu1  ;;  %v10026_v24 = vpop.f32.mrb[181].mxu0  ;;  %8214 = vmatmul.mubr.bf16.gmra.mrb[28].mxu0 %v11755_v45 }
 0x2d2   : > { %v5799_v54 = vrot.slane %v5637_v23, 1  ;;  %v10027_v57 = vadd.f32 %v10026_v24, %v10025_v31  ;;  %v10066_v58 = vpop.f32.mrb[181].mxu1  ;;  %v10028_v14 = vpop.f32.mrb[182].mxu0  ;;  %8278 = vmatmul.mubr.bf16.gmra.mrb[28].mxu1 %v11759_v47 }
 0x2d3   : > { %v10067_v3 = vadd.f32 %v10066_v58, %v10065_v39  ;;  %v10068_v2 = vpop.f32.mrb[182].mxu1  ;;  %v10029_v6 = vpop.f32.mrb[183].mxu0 }
 0x2d4   : > { %v5800_v30 = vsel %vm3085_vm3, %v5798_v49, %v5799_v54  ;;  %v5577_v18 = vadd.f32 %v10027_v57, %v12354_v12  ;;  %v10030_v7 = vadd.f32 %v10029_v6, %v10028_v14  ;;  %v10069_v53 = vpop.f32.mrb[183].mxu1  ;;  %v4868_v12 = vld [vmem:[#allocation2 + $0x8] sm:$0xff]  ;;  %v5696_v6 = vand.u32 7, %v12749_v10 }
 0x2d5   : > { %v5821_v40 = vsel %vm5762_vm1, %v5800_v30, 0.0  ;;  %v10070_v60 = vadd.f32 %v10069_v53, %v10068_v2  ;;  %v4876_v44 = vadd.f32 %v4868_v12, %v12316_v46  ;;  %v12426_v2 = vadd.s32 1, %v5689_v16 }
 0x2d6   : > { %v12392_v55 = vadd.f32 %v5821_v40, %v4875_v32  ;;  %v5642_v19 = vadd.f32 %v10067_v3, %v5577_v18  ;;  %v5580_v34 = vadd.f32 %v10030_v7, %v12357_v11  ;;  %v5703_v40 = vand.u32 7, %v11949_v56 }
 0x2d7   : > { %vm5765_vm6 = vcmp.lt.s32.totalorder %v12426_v2, 8 }
 0x2d8   : > { %v5801_v28 = vrot.slane %v5642_v19, 1  ;;  %v5645_v35 = vadd.f32 %v10070_v60, %v5580_v34  ;;  %v10031_v41 = vpop.f32.mrb[184].mxu0  ;;  %v12768_v60 = vld [vmem:[#allocation23_spill] sm:$0xff]  ;;  %v4871_v34 = vld [vmem:[#allocation2 + $0x20] sm:$0xff] }
 0x2d9   : > { %v10071_v11 = vpop.f32.mrb[184].mxu1  ;;  %v10032_v43 = vpop.f32.mrb[185].mxu0  ;;  %v5710_v19 = vand.u32 7, %v12768_v60 }
 0x2da   : > { %v5802_v17 = vsel %vm3085_vm3, %v5799_v54, %v5801_v28  ;;  %v5803_v26 = vrot.slane %v5645_v35, 1  ;;  %v10033_v20 = vadd.f32 %v10032_v43, %v10031_v41  ;;  %v10072_v50 = vpop.f32.mrb[185].mxu1  ;;  %v10034_v36 = vpop.f32.mrb[186].mxu0  ;;  %v4879_v41 = vadd.f32 %v4871_v34, %v12331_v25 }
 0x2db   : > { %v5822_v46 = vsel %vm3049_vm4, %v5802_v17, 0.0  ;;  %v10073_v61 = vadd.f32 %v10072_v50, %v10071_v11  ;;  %v10074_v23 = vpop.f32.mrb[186].mxu1  ;;  %v10035_v31 = vpop.f32.mrb[187].mxu0  ;;  %v12442_v11 = vadd.s32 1, %v5696_v6 }
 0x2dc   : > { %v12415_v39 = vadd.f32 %v5822_v46, %v4876_v44  ;;  %v5804_v24 = vsel %vm3085_vm3, %v5801_v28, %v5803_v26  ;;  %v5585_v49 = vadd.f32 %v10033_v20, %v12362_v59  ;;  %v10036_v54 = vadd.f32 %v10035_v31, %v10034_v36  ;;  %v10075_v57 = vpop.f32.mrb[187].mxu1  ;;  %v4870_v59 = vld [vmem:[#allocation2 + $0x18] sm:$0xff] }
 0x2dd   : > { %v5823_v0 = vsel %vm5763_vm2, %v5804_v24, 0.0  ;;  %v10076_v58 = vadd.f32 %v10075_v57, %v10074_v23  ;;  %v4878_v7 = vadd.f32 %v4870_v59, %v12326_v15  ;;  %v5754_v46 = vadd.s32 1, %v5710_v19  ;;  %v5836_v19 = vld [vmem:[#allocation2 + $0x38] sm:$0x7f] }
 0x2de   : > { %v12421_v14 = vadd.f32 %v5823_v0, %v4877_v5  ;;  %v5650_v62 = vadd.f32 %v10073_v61, %v5585_v49  ;;  %v5588_v3 = vadd.f32 %v10036_v54, %v12364_v27  ;;  %v12455_v24 = vadd.s32 1, %v5703_v40  ;;  %v4872_v54 = vld [vmem:[#allocation2 + $0x28] sm:$0xff] }
 0x2df   : > { %vm5766_vm7 = vcmp.lt.s32.totalorder %v12442_v11, 8  ;;  %vm5768_vm8 = vcmp.lt.s32.totalorder %v5754_v46, 8  ;;  %v4880_v0 = vadd.f32 %v4872_v54, %v12336_v8 }
 0x2e0   : > { %v5805_v32 = vrot.slane %v5650_v62, 1  ;;  %v5653_v30 = vadd.f32 %v10076_v58, %v5588_v3  ;;  %v10037_v18 = vpop.f32.mrb[188].mxu0  ;;  %v4873_v58 = vld [vmem:[#allocation2 + $0x30] sm:$0xff]  ;;  %vm5767_vm9 = vcmp.lt.s32.totalorder %v12455_v24, 8 }
 0x2e1   : > { %v10077_v53 = vpop.f32.mrb[188].mxu1  ;;  %v10038_v27 = vpop.f32.mrb[189].mxu0 }
 0x2e2   : > { %v5806_v45 = vsel %vm3085_vm3, %v5803_v26, %v5805_v32  ;;  %v5807_v12 = vrot.slane %v5653_v30, 1  ;;  %v10039_v47 = vadd.f32 %v10038_v27, %v10037_v18  ;;  %v10078_v28 = vpop.f32.mrb[189].mxu1  ;;  %v10040_v35 = vpop.f32.mrb[190].mxu0 }
 0x2e3   : > { %v5824_v15 = vsel %vm5764_vm5, %v5806_v45, 0.0  ;;  %v10079_v44 = vadd.f32 %v10078_v28, %v10077_v53  ;;  %v10080_v43 = vpop.f32.mrb[190].mxu1  ;;  %v10041_v48 = vpop.f32.mrb[191].mxu0 }
 0x2e4   : > { %v12444_v17 = vadd.f32 %v5824_v15, %v4878_v7  ;;  %v5808_v26 = vsel %vm3085_vm3, %v5805_v32, %v5807_v12  ;;  %v5593_v20 = vadd.f32 %v10039_v47, %v12369_v37  ;;  %v10042_v50 = vadd.f32 %v10041_v48, %v10040_v35  ;;  %v10081_v36 = vpop.f32.mrb[191].mxu1 }
 0x2e5   : > { %v5825_v25 = vsel %vm5765_vm6, %v5808_v26, 0.0  ;;  %v10082_v5 = vadd.f32 %v10081_v36, %v10080_v43  ;;  %v4881_v32 = vadd.f32 %v4873_v58, %v12339_v33 }
 0x2e6   : > { %v12450_v61 = vadd.f32 %v5825_v25, %v4879_v41  ;;  %v5658_v23 = vadd.f32 %v10079_v44, %v5593_v20  ;;  %v5596_v31 = vadd.f32 %v10042_v50, %v12372_v22 }
 0x2e8   : > { %v5809_v49 = vrot.slane %v5658_v23, 1  ;;  %v5661_v37 = vadd.f32 %v10082_v5, %v5596_v31  ;;  %v10099_v57 = vpop.f32.mrb[192].mxu0  ;;  %v12475_v5 = vld [vmem:[#allocation8] ss:$0 sm:$0xff] }
 0x2e9   : > { %v10139_v22 = vpop.f32.mrb[192].mxu1  ;;  %v10100_v59 = vpop.f32.mrb[193].mxu0 }
 0x2ea   : > { %v5810_v62 = vsel %vm3085_vm3, %v5807_v12, %v5809_v49  ;;  %v5811_v3 = vrot.slane %v5661_v37, 1  ;;  %v10101_v18 = vadd.f32 %v10100_v59, %v10099_v57  ;;  %v10140_v7 = vpop.f32.mrb[193].mxu1  ;;  %v10102_v53 = vpop.f32.mrb[194].mxu0 }
 0x2eb   : > { %v5826_v30 = vsel %vm5766_vm7, %v5810_v62, 0.0  ;;  %v10141_v34 = vadd.f32 %v10140_v7, %v10139_v22  ;;  %v10142_v45 = vpop.f32.mrb[194].mxu1  ;;  %v10103_v12 = vpop.f32.mrb[195].mxu0 }
 0x2ec   : > { %v12464_v27 = vadd.f32 %v5826_v30, %v4880_v0  ;;  %v5812_v8 = vsel %vm3085_vm3, %v5809_v49, %v5811_v3  ;;  %v5828_v60 = vsel %vm5768_vm8, %v5811_v3, 0.0  ;;  %v10104_v28 = vadd.f32 %v10103_v12, %v10102_v53  ;;  %v10143_v35 = vpop.f32.mrb[195].mxu1 }
 0x2ed   : > { %v5827_v33 = vsel %vm5767_vm9, %v5812_v8, 0.0  ;;  %v5844_v47 = vadd.f32 %v5836_v19, %v5828_v60  ;;  %v6466_v15 = vadd.f32 %v10141_v34, %v10101_v18  ;;  %v10144_v44 = vadd.f32 %v10143_v35, %v10142_v45 }
 0x2ee   : > { %v12470_v41 = vadd.f32 %v5827_v33, %v4881_v32 }
 0x2ef   : > { %5852 = vst [vmem:[#allocation2 + $0x38] sm:$0x7f] %v5844_v47  ;;  %v12472_v43 = vadd.f32 %v10144_v44, %v10104_v28 }
 0x2f0   : > { %v10105_v48 = vpop.f32.mrb[196].mxu0 }
 0x2f1   : > { %v10145_v26 = vpop.f32.mrb[196].mxu1  ;;  %v10106_v20 = vpop.f32.mrb[197].mxu0 }
 0x2f2   : > { %v10107_v50 = vadd.f32 %v10106_v20, %v10105_v48  ;;  %v10146_v36 = vpop.f32.mrb[197].mxu1  ;;  %v10108_v25 = vpop.f32.mrb[198].mxu0 }
 0x2f3   : > { %v10147_v46 = vadd.f32 %v10146_v36, %v10145_v26  ;;  %v10148_v23 = vpop.f32.mrb[198].mxu1  ;;  %v10109_v31 = vpop.f32.mrb[199].mxu0 }
 0x2f4   : > { %v10110_v49 = vadd.f32 %v10109_v31, %v10108_v25  ;;  %v10149_v37 = vpop.f32.mrb[199].mxu1 }
 0x2f5   : > { %v12477_v57 = vadd.f32 %v10147_v46, %v10107_v50  ;;  %v10150_v0 = vadd.f32 %v10149_v37, %v10148_v23 }
 0x2f6   : > { %v8348_v54 = vld [vmem:[#allocation2 + $0x38] sm:$0xff] }
 0x2f7   : > { %v8363_v58 = vadd.f32 %v12475_v5, %v8348_v54  ;;  %v12480_v62 = vadd.f32 %v10150_v0, %v10110_v49 }
 0x2f8   : > { %v10111_v3 = vpop.f32.mrb[200].mxu0 }
 0x2f9   : > { %8371 = vst [vmem:[%s12482_s22 + $0x38] sm:$0xff] %v8363_v58  ;;  %v10151_v22 = vpop.f32.mrb[200].mxu1  ;;  %v10112_v59 = vpop.f32.mrb[201].mxu0 }
 0x2fa   : > { %v10113_v32 = vadd.f32 %v10112_v59, %v10111_v3  ;;  %v10152_v30 = vpop.f32.mrb[201].mxu1  ;;  %v10114_v18 = vpop.f32.mrb[202].mxu0 }
 0x2fb   : > { %v10153_v7 = vadd.f32 %v10152_v30, %v10151_v22  ;;  %v10154_v53 = vpop.f32.mrb[202].mxu1  ;;  %v10115_v8 = vpop.f32.mrb[203].mxu0 }
 0x2fc   : > { %v10116_v60 = vadd.f32 %v10115_v8, %v10114_v18  ;;  %v10155_v19 = vpop.f32.mrb[203].mxu1 }
 0x2fd   : > { %v12485_v34 = vadd.f32 %v10153_v7, %v10113_v32  ;;  %v10156_v45 = vadd.f32 %v10155_v19, %v10154_v53  ;;  %v6626_v19 = vadd.s32 4294967295, %v5668_v4  ;;  %v12770_v4 = vand.u32 7, %v12769_v1 }
 0x2ff   : > { %v12487_v12 = vadd.f32 %v10156_v45, %v10116_v60  ;;  %vm6633_vm11 = vcmp.ge.s32.totalorder %v6626_v19, 0 }
 0x300   : > { %v10117_v33 = vpop.f32.mrb[204].mxu0 }
 0x301   : > { %v10157_v47 = vpop.f32.mrb[204].mxu1  ;;  %v10118_v28 = vpop.f32.mrb[205].mxu0 }
 0x302   : > { %v10119_v35 = vadd.f32 %v10118_v28, %v10117_v33  ;;  %v10158_v44 = vpop.f32.mrb[205].mxu1  ;;  %v10120_v48 = vpop.f32.mrb[206].mxu0 }
 0x303   : > { %v10159_v26 = vadd.f32 %v10158_v44, %v10157_v47  ;;  %v10160_v20 = vpop.f32.mrb[206].mxu1  ;;  %v10121_v50 = vpop.f32.mrb[207].mxu0 }
 0x304   : > { %v10122_v36 = vadd.f32 %v10121_v50, %v10120_v48  ;;  %v10161_v25 = vpop.f32.mrb[207].mxu1 }
 0x305   : > { %v12489_v46 = vadd.f32 %v10159_v26, %v10119_v35  ;;  %v10162_v23 = vadd.f32 %v10161_v25, %v10160_v20 }
 0x307   : > { %v12491_v31 = vadd.f32 %v10162_v23, %v10122_v36  ;;  %v6627_v23 = vadd.s32 4294967295, %v12770_v4 }
 0x309   : > { %v10179_v49 = vpop.f32.mrb[208].mxu0  ;;  %vm6634_vm12 = vcmp.ge.s32.totalorder %v6627_v23, 0 }
 0x30a   : > { %v10219_v37 = vpop.f32.mrb[208].mxu1  ;;  %v10180_v54 = vpop.f32.mrb[209].mxu0 }
 0x30b   : > { %v10181_v0 = vadd.f32 %v10180_v54, %v10179_v49  ;;  %v10220_v58 = vpop.f32.mrb[209].mxu1  ;;  %v10182_v3 = vpop.f32.mrb[210].mxu0 }
 0x30c   : > { %v10221_v22 = vadd.f32 %v10220_v58, %v10219_v37  ;;  %v10222_v59 = vpop.f32.mrb[210].mxu1  ;;  %v10183_v32 = vpop.f32.mrb[211].mxu0 }
 0x30d   : > { %v6531_v30 = vadd.f32 %v10181_v0, %v6466_v15  ;;  %v10184_v18 = vadd.f32 %v10183_v32, %v10182_v3  ;;  %v10223_v7 = vpop.f32.mrb[211].mxu1 }
 0x30e   : > { %v10224_v53 = vadd.f32 %v10223_v7, %v10222_v59  ;;  %v6628_v59 = vadd.s32 4294967295, %v5675_v9 }
 0x30f   : > { %v6596_v8 = vadd.f32 %v10221_v22, %v6531_v30  ;;  %v6534_v60 = vadd.f32 %v10184_v18, %v12472_v43 }
 0x310   : > { %vm6635_vm13 = vcmp.ge.s32.totalorder %v6628_v59, 0 }
 0x311   : > { %v6599_v45 = vadd.f32 %v10224_v53, %v6534_v60  ;;  %v10185_v33 = vpop.f32.mrb[212].mxu0  ;;  %v6677_v35 = vrot.slane %v6596_v8, 7 }
 0x312   : > { %v10225_v47 = vpop.f32.mrb[212].mxu1  ;;  %v10186_v28 = vpop.f32.mrb[213].mxu0 }
 0x313   : > { %v6678_v44 = vrot.slane %v6599_v45, 7  ;;  %v10187_v48 = vadd.f32 %v10186_v28, %v10185_v33  ;;  %v10226_v26 = vpop.f32.mrb[213].mxu1  ;;  %v10188_v15 = vpop.f32.mrb[214].mxu0 }
 0x314   : > { %v10227_v20 = vadd.f32 %v10226_v26, %v10225_v47  ;;  %v10228_v50 = vpop.f32.mrb[214].mxu1  ;;  %v10189_v36 = vpop.f32.mrb[215].mxu0 }
 0x315   : > { %v6679_v25 = vsel %vm6676_vm10, %v6677_v35, %v6678_v44  ;;  %v6539_v43 = vadd.f32 %v10187_v48, %v12477_v57  ;;  %v10190_v49 = vadd.f32 %v10189_v36, %v10188_v15  ;;  %v10229_v37 = vpop.f32.mrb[215].mxu1 }
 0x316   : > { %v6699_v54 = vsel %vm6633_vm11, %v6679_v25, 0.0  ;;  %v10230_v0 = vadd.f32 %v10229_v37, %v10228_v50 }
 0x317   : > { %v12501_v58 = vadd.f32 %v6699_v54, %v12392_v55  ;;  %v6604_v3 = vadd.f32 %v10227_v20, %v6539_v43  ;;  %v6542_v22 = vadd.f32 %v10190_v49, %v12480_v62  ;;  %v6629_v62 = vadd.s32 4294967295, %v5682_v63 }
 0x318   : > { %v6630_v63 = vadd.s32 4294967295, %v5689_v16 }
 0x319   : > { %v6680_v32 = vrot.slane %v6604_v3, 7  ;;  %v6607_v30 = vadd.f32 %v10230_v0, %v6542_v22  ;;  %v10191_v57 = vpop.f32.mrb[216].mxu0  ;;  %vm6636_vm14 = vcmp.ge.s32.totalorder %v6629_v62, 0 }
 0x31a   : > { %v10231_v18 = vpop.f32.mrb[216].mxu1  ;;  %v10192_v7 = vpop.f32.mrb[217].mxu0  ;;  %vm6637_vm15 = vcmp.ge.s32.totalorder %v6630_v63, 0 }
 0x31b   : > { %v6681_v53 = vsel %vm6676_vm10, %v6678_v44, %v6680_v32  ;;  %v6682_v8 = vrot.slane %v6607_v30, 7  ;;  %v10193_v60 = vadd.f32 %v10192_v7, %v10191_v57  ;;  %v10232_v19 = vpop.f32.mrb[217].mxu1  ;;  %v10194_v55 = vpop.f32.mrb[218].mxu0 }
 0x31c   : > { %v6700_v45 = vsel %vm6634_vm12, %v6681_v53, 0.0  ;;  %v10233_v33 = vadd.f32 %v10232_v19, %v10231_v18  ;;  %v10234_v42 = vpop.f32.mrb[218].mxu1  ;;  %v10195_v9 = vpop.f32.mrb[219].mxu0 }
 0x31d   : > { %v12510_v47 = vadd.f32 %v6700_v45, %v12415_v39  ;;  %v6683_v28 = vsel %vm6676_vm10, %v6680_v32, %v6682_v8  ;;  %v6547_v35 = vadd.f32 %v10193_v60, %v12485_v34  ;;  %v10196_v44 = vadd.f32 %v10195_v9, %v10194_v55  ;;  %v10235_v48 = vpop.f32.mrb[219].mxu1 }
 0x31e   : > { %v6701_v26 = vsel %vm6635_vm13, %v6683_v28, 0.0  ;;  %v10236_v15 = vadd.f32 %v10235_v48, %v10234_v42 }
 0x31f   : > { %v12515_v20 = vadd.f32 %v6701_v26, %v12421_v14  ;;  %v6612_v50 = vadd.f32 %v10233_v33, %v6547_v35  ;;  %v6550_v52 = vadd.f32 %v10196_v44, %v12487_v12  ;;  %v6631_v12 = vadd.s32 4294967295, %v5696_v6 }
 0x320   : > { %v6632_v6 = vadd.s32 4294967295, %v5703_v40 }
 0x321   : > { %v6684_v39 = vrot.slane %v6612_v50, 7  ;;  %v6615_v36 = vadd.f32 %v10236_v15, %v6550_v52  ;;  %v10197_v25 = vpop.f32.mrb[220].mxu0  ;;  %vm6638_vm0 = vcmp.ge.s32.totalorder %v6631_v12, 0 }
 0x322   : > { %v10237_v43 = vpop.f32.mrb[220].mxu1  ;;  %v10198_v1 = vpop.f32.mrb[221].mxu0  ;;  %vm6639_vm8 = vcmp.ge.s32.totalorder %v6632_v6, 0 }
 0x323   : > { %v6685_v34 = vsel %vm6676_vm10, %v6682_v8, %v6684_v39  ;;  %v6686_v4 = vrot.slane %v6615_v36, 7  ;;  %v10199_v23 = vadd.f32 %v10198_v1, %v10197_v25  ;;  %v10238_v49 = vpop.f32.mrb[221].mxu1  ;;  %v10200_v14 = vpop.f32.mrb[222].mxu0 }
 0x324   : > { %v6702_v37 = vsel %vm6636_vm14, %v6685_v34, 0.0  ;;  %v10239_v54 = vadd.f32 %v10238_v49, %v10237_v43  ;;  %v10240_v29 = vpop.f32.mrb[222].mxu1  ;;  %v10201_v16 = vpop.f32.mrb[223].mxu0 }
 0x325   : > { %v12524_v0 = vadd.f32 %v6702_v37, %v12444_v17  ;;  %v6687_v3 = vsel %vm6676_vm10, %v6684_v39, %v6686_v4  ;;  %v6555_v22 = vadd.f32 %v10199_v23, %v12489_v46  ;;  %v10202_v59 = vadd.f32 %v10201_v16, %v10200_v14  ;;  %v10241_v32 = vpop.f32.mrb[223].mxu1 }
 0x326   : > { %v6703_v30 = vsel %vm6637_vm15, %v6687_v3, 0.0  ;;  %v10242_v57 = vadd.f32 %v10241_v32, %v10240_v29 }
 0x327   : > { %v12529_v18 = vadd.f32 %v6703_v30, %v12450_v61  ;;  %v6620_v7 = vadd.f32 %v10239_v54, %v6555_v22  ;;  %v6558_v10 = vadd.f32 %v10202_v59, %v12491_v31 }
 0x329   : > { %v6688_v17 = vrot.slane %v6620_v7, 7  ;;  %v6623_v53 = vadd.f32 %v10242_v57, %v6558_v10 }
 0x32a   : > { %v10259_v60 = vpop.f32.mrb[224].mxu0 }
 0x32b   : > { %v6689_v8 = vsel %vm6676_vm10, %v6686_v4, %v6688_v17  ;;  %v6690_v46 = vrot.slane %v6623_v53, 7  ;;  %v10299_v55 = vpop.f32.mrb[224].mxu1  ;;  %v10260_v45 = vpop.f32.mrb[225].mxu0 }
 0x32c   : > { %v6704_v19 = vsel %vm6638_vm0, %v6689_v8, 0.0  ;;  %v10300_v31 = vpop.f32.mrb[225].mxu1  ;;  %v10262_v62 = vpop.f32.mrb[226].mxu0 }
 0x32d   : > { %v12536_v61 = vadd.f32 %v6704_v19, %v12464_v27  ;;  %v6691_v33 = vsel %vm6676_vm10, %v6688_v17, %v6690_v46  ;;  %v10302_v40 = vpop.f32.mrb[226].mxu1  ;;  %v10263_v42 = vpop.f32.mrb[227].mxu0 }
 0x32e   : > { %v6705_v56 = vsel %vm6639_vm8, %v6691_v33, 0.0  ;;  %v10264_v28 = vadd.f32 %v10263_v42, %v10262_v62  ;;  %v10303_v35 = vpop.f32.mrb[227].mxu1 }
 0x32f   : > { %v12540_v9 = vadd.f32 %v6705_v56, %v12470_v41  ;;  %v10304_v44 = vadd.f32 %v10303_v35, %v10302_v40 }
 0x331   : > { %v7341_v48 = vadd.f32 %v10304_v44, %v10264_v28 }
 0x332   : > { %v10265_v26 = vpop.f32.mrb[228].mxu0 }
 0x333   : > { %v10305_v15 = vpop.f32.mrb[228].mxu1  ;;  %v10266_v50 = vpop.f32.mrb[229].mxu0 }
 0x334   : > { %v10267_v52 = vadd.f32 %v10266_v50, %v10265_v26  ;;  %v10306_v27 = vpop.f32.mrb[229].mxu1  ;;  %v10268_v63 = vpop.f32.mrb[230].mxu0 }
 0x335   : > { %v10307_v39 = vadd.f32 %v10306_v27, %v10305_v15  ;;  %v10308_v36 = vpop.f32.mrb[230].mxu1  ;;  %v10269_v25 = vpop.f32.mrb[231].mxu0 }
 0x336   : > { %v10270_v43 = vadd.f32 %v10269_v25, %v10268_v63  ;;  %v10309_v1 = vpop.f32.mrb[231].mxu1 }
 0x337   : > { %v7346_v34 = vadd.f32 %v10307_v39, %v10267_v52  ;;  %v10310_v4 = vadd.f32 %v10309_v1, %v10308_v36 }
 0x339   : > { %v7349_v23 = vadd.f32 %v10310_v4, %v10270_v43 }
 0x33a   : > { %v10271_v41 = vpop.f32.mrb[232].mxu0 }
 0x33b   : > { %v10311_v49 = vpop.f32.mrb[232].mxu1  ;;  %v10272_v14 = vpop.f32.mrb[233].mxu0 }
 0x33c   : > { %v10273_v37 = vadd.f32 %v10272_v14, %v10271_v41  ;;  %v10312_v54 = vpop.f32.mrb[233].mxu1  ;;  %v10274_v12 = vpop.f32.mrb[234].mxu0 }
 0x33d   : > { %v10313_v29 = vadd.f32 %v10312_v54, %v10311_v49  ;;  %v10314_v16 = vpop.f32.mrb[234].mxu1  ;;  %v10275_v3 = vpop.f32.mrb[235].mxu0 }
 0x33e   : > { %v10276_v22 = vadd.f32 %v10275_v3, %v10274_v12  ;;  %v10315_v59 = vpop.f32.mrb[235].mxu1 }
 0x33f   : > { %v7354_v32 = vadd.f32 %v10313_v29, %v10273_v37  ;;  %v10316_v30 = vadd.f32 %v10315_v59, %v10314_v16 }
 0x341   : > { %v7357_v57 = vadd.f32 %v10316_v30, %v10276_v22 }
 0x342   : > { %v10277_v7 = vpop.f32.mrb[236].mxu0 }
 0x343   : > { %v10317_v10 = vpop.f32.mrb[236].mxu1  ;;  %v10278_v6 = vpop.f32.mrb[237].mxu0 }
 0x344   : > { %v10279_v17 = vadd.f32 %v10278_v6, %v10277_v7  ;;  %v10318_v53 = vpop.f32.mrb[237].mxu1  ;;  %v10280_v8 = vpop.f32.mrb[238].mxu0 }
 0x345   : > { %v10319_v46 = vadd.f32 %v10318_v53, %v10317_v10  ;;  %v10320_v60 = vpop.f32.mrb[238].mxu1  ;;  %v10281_v19 = vpop.f32.mrb[239].mxu0 }
 0x346   : > { %v10282_v55 = vadd.f32 %v10281_v19, %v10280_v8  ;;  %v10321_v45 = vpop.f32.mrb[239].mxu1 }
 0x347   : > { %v7362_v33 = vadd.f32 %v10319_v46, %v10279_v17  ;;  %v10322_v31 = vadd.f32 %v10321_v45, %v10320_v60 }
 0x349   : > { %v12542_v62 = vadd.f32 %v10322_v31, %v10282_v55 }
 0x34b   : > { %v10339_v56 = vpop.f32.mrb[240].mxu0 }
 0x34c   : > { %v10379_v40 = vpop.f32.mrb[240].mxu1  ;;  %v10340_v42 = vpop.f32.mrb[241].mxu0 }
 0x34d   : > { %v10380_v28 = vpop.f32.mrb[241].mxu1  ;;  %v10342_v35 = vpop.f32.mrb[242].mxu0 }
 0x34e   : > { %v10382_v44 = vpop.f32.mrb[242].mxu1  ;;  %v10343_v26 = vpop.f32.mrb[243].mxu0 }
 0x34f   : > { %v10344_v15 = vadd.f32 %v10343_v26, %v10342_v35  ;;  %v10383_v50 = vpop.f32.mrb[243].mxu1 }
 0x350   : > { %v10384_v52 = vadd.f32 %v10383_v50, %v10382_v44 }
 0x351   : > { %v7405_v27 = vadd.f32 %v10344_v15, %v7341_v48 }
 0x353   : > { %v7469_v63 = vadd.f32 %v10384_v52, %v7405_v27  ;;  %v10345_v39 = vpop.f32.mrb[244].mxu0 }
 0x354   : > { %v10385_v36 = vpop.f32.mrb[244].mxu1  ;;  %v10346_v25 = vpop.f32.mrb[245].mxu0 }
 0x355   : > { %v12545_v43 = vadd.f32 %v7469_v63, %v12501_v58  ;;  %v10347_v1 = vadd.f32 %v10346_v25, %v10345_v39  ;;  %v10386_v4 = vpop.f32.mrb[245].mxu1  ;;  %v10348_v41 = vpop.f32.mrb[246].mxu0 }
 0x356   : > { %v10387_v49 = vadd.f32 %v10386_v4, %v10385_v36  ;;  %v10388_v14 = vpop.f32.mrb[246].mxu1  ;;  %v10349_v37 = vpop.f32.mrb[247].mxu0 }
 0x357   : > { %v7410_v54 = vadd.f32 %v10347_v1, %v7346_v34  ;;  %v10350_v12 = vadd.f32 %v10349_v37, %v10348_v41  ;;  %v10389_v29 = vpop.f32.mrb[247].mxu1 }
 0x358   : > { %v10390_v16 = vadd.f32 %v10389_v29, %v10388_v14 }
 0x359   : > { %v7474_v3 = vadd.f32 %v10387_v49, %v7410_v54  ;;  %v7413_v22 = vadd.f32 %v10350_v12, %v7349_v23 }
 0x35b   : > { %v12548_v48 = vadd.f32 %v7474_v3, %v12510_v47  ;;  %v7477_v59 = vadd.f32 %v10390_v16, %v7413_v22  ;;  %v10351_v30 = vpop.f32.mrb[248].mxu0 }
 0x35c   : > { %v10391_v7 = vpop.f32.mrb[248].mxu1  ;;  %v10352_v58 = vpop.f32.mrb[249].mxu0 }
 0x35d   : > { %v12551_v10 = vadd.f32 %v7477_v59, %v12515_v20  ;;  %v10353_v6 = vadd.f32 %v10352_v58, %v10351_v30  ;;  %v10392_v17 = vpop.f32.mrb[249].mxu1  ;;  %v10354_v53 = vpop.f32.mrb[250].mxu0 }
 0x35e   : > { %v10393_v8 = vadd.f32 %v10392_v17, %v10391_v7  ;;  %v10394_v34 = vpop.f32.mrb[250].mxu1  ;;  %v10355_v46 = vpop.f32.mrb[251].mxu0 }
 0x35f   : > { %v7418_v60 = vadd.f32 %v10353_v6, %v7354_v32  ;;  %v10356_v19 = vadd.f32 %v10355_v46, %v10354_v53  ;;  %v10395_v55 = vpop.f32.mrb[251].mxu1 }
 0x360   : > { %v10396_v23 = vadd.f32 %v10395_v55, %v10394_v34 }
 0x361   : > { %v7482_v45 = vadd.f32 %v10393_v8, %v7418_v60  ;;  %v7421_v47 = vadd.f32 %v10356_v19, %v7357_v57 }
 0x363   : > { %v12554_v31 = vadd.f32 %v7482_v45, %v12524_v0  ;;  %v7485_v56 = vadd.f32 %v10396_v23, %v7421_v47  ;;  %v10357_v40 = vpop.f32.mrb[252].mxu0 }
 0x364   : > { %v10397_v42 = vpop.f32.mrb[252].mxu1  ;;  %v10358_v20 = vpop.f32.mrb[253].mxu0 }
 0x365   : > { %v12557_v28 = vadd.f32 %v7485_v56, %v12529_v18  ;;  %v10359_v35 = vadd.f32 %v10358_v20, %v10357_v40  ;;  %v10398_v44 = vpop.f32.mrb[253].mxu1  ;;  %v10360_v26 = vpop.f32.mrb[254].mxu0 }
 0x366   : > { %v10399_v15 = vadd.f32 %v10398_v44, %v10397_v42  ;;  %v10400_v32 = vpop.f32.mrb[254].mxu1  ;;  %v10361_v50 = vpop.f32.mrb[255].mxu0 }
 0x367   : > { %v7426_v52 = vadd.f32 %v10359_v35, %v7362_v33  ;;  %v10362_v27 = vadd.f32 %v10361_v50, %v10360_v26  ;;  %v10401_v63 = vpop.f32.mrb[255].mxu1 }
 0x368   : > { %v10402_v57 = vadd.f32 %v10401_v63, %v10400_v32 }
 0x369   : > { %v7490_v39 = vadd.f32 %v10399_v15, %v7426_v52  ;;  %v7429_v0 = vadd.f32 %v10362_v27, %v12542_v62 }
 0x36b   : > { %v12561_v36 = vadd.f32 %v7490_v39, %v12536_v61  ;;  %v7493_v25 = vadd.f32 %v10402_v57, %v7429_v0  ;;  %v10419_v1 = vpop.f32.mrb[0].mxu0 }
 0x36c   : > { %v10459_v4 = vpop.f32.mrb[0].mxu1  ;;  %v10420_v41 = vpop.f32.mrb[1].mxu0 }
 0x36d   : > { %v7509_v18 = vadd.f32 %v7493_v25, %v12540_v9  ;;  %v10460_v49 = vpop.f32.mrb[1].mxu1  ;;  %v10422_v14 = vpop.f32.mrb[2].mxu0 }
 0x36e   : > { %v10462_v37 = vpop.f32.mrb[2].mxu1  ;;  %v10423_v33 = vpop.f32.mrb[3].mxu0 }
 0x36f   : > { %7516 = vst [vmem:[#allocation2 + $0x30] sm:$0xff] %v7509_v18  ;;  %v10424_v54 = vadd.f32 %v10423_v33, %v10422_v14  ;;  %v10463_v12 = vpop.f32.mrb[3].mxu1 }
 0x370   : > { %v10464_v29 = vadd.f32 %v10463_v12, %v10462_v37 }
 0x372   : > { %v8131_v16 = vadd.f32 %v10464_v29, %v10424_v54 }
 0x373   : > { %v10425_v3 = vpop.f32.mrb[4].mxu0 }
 0x374   : > { %v10465_v62 = vpop.f32.mrb[4].mxu1  ;;  %v10426_v22 = vpop.f32.mrb[5].mxu0 }
 0x375   : > { %v10427_v61 = vadd.f32 %v10426_v22, %v10425_v3  ;;  %v10466_v59 = vpop.f32.mrb[5].mxu1  ;;  %v10428_v30 = vpop.f32.mrb[6].mxu0 }
 0x376   : > { %v10467_v7 = vadd.f32 %v10466_v59, %v10465_v62  ;;  %v10468_v58 = vpop.f32.mrb[6].mxu1  ;;  %v10429_v9 = vpop.f32.mrb[7].mxu0 }
 0x377   : > { %v10430_v6 = vadd.f32 %v10429_v9, %v10428_v30  ;;  %v10469_v17 = vpop.f32.mrb[7].mxu1 }
 0x378   : > { %v8136_v53 = vadd.f32 %v10467_v7, %v10427_v61  ;;  %v10470_v8 = vadd.f32 %v10469_v17, %v10468_v58 }
 0x37a   : > { %v8139_v34 = vadd.f32 %v10470_v8, %v10430_v6 }
 0x37b   : > { %v10431_v46 = vpop.f32.mrb[8].mxu0 }
 0x37c   : > { %v10471_v60 = vpop.f32.mrb[8].mxu1  ;;  %v10432_v19 = vpop.f32.mrb[9].mxu0 }
 0x37d   : > { %v10433_v55 = vadd.f32 %v10432_v19, %v10431_v46  ;;  %v10472_v23 = vpop.f32.mrb[9].mxu1  ;;  %v10434_v45 = vpop.f32.mrb[10].mxu0 }
 0x37e   : > { %v10473_v47 = vadd.f32 %v10472_v23, %v10471_v60  ;;  %v10474_v56 = vpop.f32.mrb[10].mxu1  ;;  %v10435_v40 = vpop.f32.mrb[11].mxu0 }
 0x37f   : > { %v10436_v42 = vadd.f32 %v10435_v40, %v10434_v45  ;;  %v10475_v20 = vpop.f32.mrb[11].mxu1 }
 0x380   : > { %v8144_v35 = vadd.f32 %v10473_v47, %v10433_v55  ;;  %v10476_v44 = vadd.f32 %v10475_v20, %v10474_v56 }
 0x382   : > { %v12564_v26 = vadd.f32 %v10476_v44, %v10436_v42 }
 0x383   : > { %v10437_v15 = vpop.f32.mrb[12].mxu0 }
 0x384   : > { %v10477_v32 = vpop.f32.mrb[12].mxu1  ;;  %v10438_v50 = vpop.f32.mrb[13].mxu0 }
 0x385   : > { %v10439_v52 = vadd.f32 %v10438_v50, %v10437_v15  ;;  %v10478_v27 = vpop.f32.mrb[13].mxu1  ;;  %v10440_v63 = vpop.f32.mrb[14].mxu0 }
 0x386   : > { %v10479_v57 = vadd.f32 %v10478_v27, %v10477_v32  ;;  %v10480_v39 = vpop.f32.mrb[14].mxu1  ;;  %v10441_v0 = vpop.f32.mrb[15].mxu0 }
 0x387   : > { %v10442_v25 = vadd.f32 %v10441_v0, %v10440_v63  ;;  %v10481_v1 = vpop.f32.mrb[15].mxu1 }
 0x388   : > { %v12566_v18 = vadd.f32 %v10479_v57, %v10439_v52  ;;  %v10482_v4 = vadd.f32 %v10481_v1, %v10480_v39 }
 0x38a   : > { %v12568_v41 = vadd.f32 %v10482_v4, %v10442_v25 }
 0x38c   : > { %v10499_v49 = vpop.f32.mrb[16].mxu0 }
 0x38d   : > { %v10539_v14 = vpop.f32.mrb[16].mxu1  ;;  %v10500_v37 = vpop.f32.mrb[17].mxu0 }
 0x38e   : > { %v10540_v33 = vpop.f32.mrb[17].mxu1  ;;  %v10502_v54 = vpop.f32.mrb[18].mxu0 }
 0x38f   : > { %v10542_v12 = vpop.f32.mrb[18].mxu1  ;;  %v10503_v29 = vpop.f32.mrb[19].mxu0 }
 0x390   : > { %v10504_v3 = vadd.f32 %v10503_v29, %v10502_v54  ;;  %v10543_v62 = vpop.f32.mrb[19].mxu1 }
 0x391   : > { %v10544_v22 = vadd.f32 %v10543_v62, %v10542_v12 }
 0x392   : > { %v8195_v61 = vadd.f32 %v10504_v3, %v8131_v16 }
 0x394   : > { %v8259_v59 = vadd.f32 %v10544_v22, %v8195_v61  ;;  %v10505_v30 = vpop.f32.mrb[20].mxu0 }
 0x395   : > { %v10545_v7 = vpop.f32.mrb[20].mxu1  ;;  %v10506_v58 = vpop.f32.mrb[21].mxu0 }
 0x396   : > { %v10507_v9 = vadd.f32 %v10506_v58, %v10505_v30  ;;  %v10546_v6 = vpop.f32.mrb[21].mxu1  ;;  %v10508_v17 = vpop.f32.mrb[22].mxu0  ;;  %v8293_v40 = vrot.slane %v8259_v59, 1 }
 0x397   : > { %v10547_v8 = vadd.f32 %v10546_v6, %v10545_v7  ;;  %v10548_v46 = vpop.f32.mrb[22].mxu1  ;;  %v10509_v60 = vpop.f32.mrb[23].mxu0 }
 0x398   : > { %v8200_v19 = vadd.f32 %v10507_v9, %v8136_v53  ;;  %v10510_v55 = vadd.f32 %v10509_v60, %v10508_v17  ;;  %v10549_v23 = vpop.f32.mrb[23].mxu1 }
 0x399   : > { %v10550_v45 = vadd.f32 %v10549_v23, %v10548_v46 }
 0x39a   : > { %v8264_v47 = vadd.f32 %v10547_v8, %v8200_v19  ;;  %v8203_v56 = vadd.f32 %v10510_v55, %v8139_v34 }
 0x39c   : > { %v8294_v42 = vrot.slane %v8264_v47, 1  ;;  %v8267_v20 = vadd.f32 %v10550_v45, %v8203_v56  ;;  %v10511_v16 = vpop.f32.mrb[24].mxu0 }
 0x39d   : > { %v10551_v44 = vpop.f32.mrb[24].mxu1  ;;  %v10512_v15 = vpop.f32.mrb[25].mxu0 }
 0x39e   : > { %v8295_v32 = vsel %vm3085_vm3, %v8293_v40, %v8294_v42  ;;  %v8296_v50 = vrot.slane %v8267_v20, 1  ;;  %v10513_v52 = vadd.f32 %v10512_v15, %v10511_v16  ;;  %v10552_v27 = vpop.f32.mrb[25].mxu1  ;;  %v10514_v63 = vpop.f32.mrb[26].mxu0  ;;  %v8326_v16 = vld [vmem:[#allocation2 + $0x30] sm:$0x7f] }
 0x39f   : > { %v8313_v53 = vsel %vm5762_vm1, %v8295_v32, 0.0  ;;  %v10553_v57 = vadd.f32 %v10552_v27, %v10551_v44  ;;  %v10554_v39 = vpop.f32.mrb[26].mxu1  ;;  %v10515_v0 = vpop.f32.mrb[27].mxu0 }
 0x3a0   : > { %v8327_v34 = vadd.f32 %v8313_v53, %v12545_v43  ;;  %v8297_v25 = vsel %vm3085_vm3, %v8294_v42, %v8296_v50  ;;  %v8208_v1 = vadd.f32 %v10513_v52, %v8144_v35  ;;  %v10516_v4 = vadd.f32 %v10515_v0, %v10514_v63  ;;  %v10555_v49 = vpop.f32.mrb[27].mxu1 }
 0x3a1   : > { %v8314_v14 = vsel %vm3049_vm4, %v8297_v25, 0.0  ;;  %v10556_v37 = vadd.f32 %v10555_v49, %v10554_v39 }
 0x3a2   : > { %8334 = vst [vmem:[#allocation2] sm:$0xff] %v8327_v34  ;;  %v8356_v33 = vadd.f32 %v12475_v5, %v8327_v34  ;;  %v8328_v38 = vadd.f32 %v8314_v14, %v12548_v48  ;;  %v8272_v54 = vadd.f32 %v10553_v57, %v8208_v1  ;;  %v8211_v12 = vadd.f32 %v10516_v4, %v12564_v26 }
 0x3a4   : > { %8335 = vst [vmem:[#allocation2 + $0x8] sm:$0xff] %v8328_v38  ;;  %v8357_v43 = vadd.f32 %v12475_v5, %v8328_v38  ;;  %v8298_v29 = vrot.slane %v8272_v54, 1  ;;  %v8275_v35 = vadd.f32 %v10556_v37, %v8211_v12  ;;  %v10517_v3 = vpop.f32.mrb[28].mxu0  ;;  %8364 = vst [vmem:[%s12482_s22] sm:$0xff] %v8356_v33 }
 0x3a5   : > { %v10557_v62 = vpop.f32.mrb[28].mxu1  ;;  %v10518_v21 = vpop.f32.mrb[29].mxu0 }
 0x3a6   : > { %v8299_v22 = vsel %vm3085_vm3, %v8296_v50, %v8298_v29  ;;  %v8300_v61 = vrot.slane %v8275_v35, 1  ;;  %v10519_v59 = vadd.f32 %v10518_v21, %v10517_v3  ;;  %v10558_v30 = vpop.f32.mrb[29].mxu1  ;;  %v10520_v7 = vpop.f32.mrb[30].mxu0  ;;  %8365 = vst [vmem:[%s12482_s22 + $0x8] sm:$0xff] %v8357_v43 }
 0x3a7   : > { %v8315_v48 = vsel %vm5763_vm2, %v8299_v22, 0.0  ;;  %v10559_v26 = vadd.f32 %v10558_v30, %v10557_v62  ;;  %v10560_v58 = vpop.f32.mrb[30].mxu1  ;;  %v10521_v9 = vpop.f32.mrb[31].mxu0 }
 0x3a8   : > { %v8329_v6 = vadd.f32 %v8315_v48, %v12551_v10  ;;  %v8301_v17 = vsel %vm3085_vm3, %v8298_v29, %v8300_v61  ;;  %v8216_v8 = vadd.f32 %v10519_v59, %v12566_v18  ;;  %v10522_v46 = vadd.f32 %v10521_v9, %v10520_v7  ;;  %v10561_v60 = vpop.f32.mrb[31].mxu1 }
 0x3a9   : > { %v8316_v19 = vsel %vm5764_vm5, %v8301_v17, 0.0  ;;  %v10562_v55 = vadd.f32 %v10561_v60, %v10560_v58 }
 0x3aa   : > { %8336 = vst [vmem:[#allocation2 + $0x10] sm:$0xff] %v8329_v6  ;;  %v8358_v13 = vadd.f32 %v12475_v5, %v8329_v6  ;;  %v8330_v23 = vadd.f32 %v8316_v19, %v12554_v31  ;;  %v8280_v45 = vadd.f32 %v10559_v26, %v8216_v8  ;;  %v8219_v10 = vadd.f32 %v10522_v46, %v12568_v41 }
 0x3ac   : > { %8337 = vst [vmem:[#allocation2 + $0x18] sm:$0xff] %v8330_v23  ;;  %v8359_v47 = vadd.f32 %v12475_v5, %v8330_v23  ;;  %v8302_v56 = vrot.slane %v8280_v45, 1  ;;  %v8283_v18 = vadd.f32 %v10562_v55, %v8219_v10  ;;  %8366 = vst [vmem:[%s12482_s22 + $0x10] sm:$0xff] %v8358_v13 }
 0x3ae   : > { %v8303_v40 = vsel %vm3085_vm3, %v8300_v61, %v8302_v56  ;;  %v8304_v51 = vrot.slane %v8283_v18, 1  ;;  %8367 = vst [vmem:[%s12482_s22 + $0x18] sm:$0xff] %v8359_v47 }
 0x3af   : > { %v8317_v42 = vsel %vm5765_vm6, %v8303_v40, 0.0 }
 0x3b0   : > { %v8331_v31 = vadd.f32 %v8317_v42, %v12557_v28  ;;  %v8305_v41 = vsel %vm3085_vm3, %v8302_v56, %v8304_v51  ;;  %v8319_v20 = vsel %vm5767_vm9, %v8304_v51, 0.0 }
 0x3b1   : > { %v8318_v44 = vsel %vm5766_vm7, %v8305_v41, 0.0  ;;  %v8333_v15 = vadd.f32 %v8326_v16, %v8319_v20 }
 0x3b2   : > { %8338 = vst [vmem:[#allocation2 + $0x20] sm:$0xff] %v8331_v31  ;;  %v8360_v2 = vadd.f32 %v12475_v5, %v8331_v31  ;;  %v8332_v32 = vadd.f32 %v8318_v44, %v12561_v36 }
 0x3b3   : > { %8340 = vst [vmem:[#allocation2 + $0x30] sm:$0x7f] %v8333_v15 }
 0x3b4   : > { %8339 = vst [vmem:[#allocation2 + $0x28] sm:$0xff] %v8332_v32  ;;  %v8361_v28 = vadd.f32 %v12475_v5, %v8332_v32  ;;  %8368 = vst [vmem:[%s12482_s22 + $0x20] sm:$0xff] %v8360_v2 }
 0x3b6   : > { %8369 = vst [vmem:[%s12482_s22 + $0x28] sm:$0xff] %v8361_v28 }
 0x3ba   : > { %v8347_v24 = vld [vmem:[#allocation2 + $0x30] sm:$0xff] }
 0x3bb   : > { %v8362_v11 = vadd.f32 %v12475_v5, %v8347_v24 }
 0x3bd   : > { %8370 = vst [vmem:[%s12482_s22 + $0x30] sm:$0xff] %v8362_v11 }
 0x3be   : > { %11328 = shalt.err (!%p11325_p11)
}
 0x3bf   : > { %s11329_s10 = scalar_lea.hbm %s12616_s9, 1024  ;;  %s11333_s29 = scalar_lea.hbm %s12672_s3, 2048 }
 0x3c0   : > { %p11330_p0 = scmp.ne.s32.totalorder %s12616_s9, %s11329_s10  ;;  %p11334_p6 = scmp.lt.u32.totalorder %s12616_s9, %s12672_s3 }
 0x3c1   : > { %p11335_p7 = scmp.lt.u32.totalorder %s11333_s29, %s11329_s10  ;;  %p11337_p8 = scmp.lt.u32.totalorder %s11329_s10, %s12616_s9 }
 0x3c2   : > { %p11331_p4 = pnand %p11330_p0, %p12771_p12 }
 0x3c3   : > { %p11336_p2 = por %p11335_p7, %p11334_p6 }
 0x3c4   : > { %p11332_p13 = pneg %p11331_p4 }
 0x3c5   : > { %p11338_p1 = por %p11337_p8, %p11336_p2 }
 0x3c7   : > { %p11339_p10 = pnand %p11338_p1, %p11332_p13 }
 0x3c9   : > { %11342 = shalt.err (!%p11339_p10)
}
 0x3ca   : > { %s11412_s22 = smov 128   ;;  %s11413_s24 = smov 8  }
 0x3cb   : > { %10573 = dma.vmem_to_hbm [thread:$0]  (%p12771_p12), %s12618_s7, 1024, %s12616_s9, %s8373_s28, %s11412_s22, %s11412_s22, %s11413_s24  }
 0x3cc PF: > { %s8402_s8 = sand.u32 1, %s11381_s12   ;;  %p12772_p3 = scmp.ne.s32.totalorder %s12708_s23, 0 }
 0x3cd   : > { %p12773_p5 = scmp.ge.s32.totalorder %s11401_s17, 2  ;;  %s8403_s26 = scalar_lea.sflag [#allocation5], %s8402_s8 }
 0x3cf   : > { %p10587_p9 = pnand %p12773_p5, %p12772_p3 }
 0x3d1   : > { %11376 = dma.done.wait (!%p10587_p9), %s8403_s26, 1024  }
 0x3d2   : > { %11378 = vsyncadd (!%p10587_p9), %s8403_s26, 4294966272  ;;  %s20_s17 = sadd.s32 1, %s11401_s17   ;;  %s12774_s12 = smov %s11385_s13 }
 0x3d3   : > { %p17_p11 = scmp.ge.s32.totalorder %s20_s17, 4   ;;  %s12775_s13 = smov %s11389_s14 }
 0x3d4   : > { %s12776_s14 = smov %s11577_s4  ;;  %s12777_s15 = smov %s11397_s16 }
 0x3d5   : > { %s12778_s16 = smov %s12780_s18  ;;  %19 = sbr.rel (!%p17_p11) target bundleno = 7 (0x7), region = 95 }
 0x3dc   :  { %8408 = vsyncpa [#allocation4], 1 }
 0x3dd   :  { %8410 = vsyncpa [#allocation4 + $0x1], 1 }
 0x3de   :  { %8411 = vsyncpa [#allocation7], 1 }
 0x3df   :  { %8412 = vsyncpa [#allocation5], 1 }
 0x3e0   :  { %8414 = vsyncpa [#allocation5 + $0x1], 1 }

</bundles_post_ra>
